<compile_context>
chip_gen: v5e
topology: v5e:2x2
jax: 0.10.0
libtpu: 0.0.40
codegen_flags: <defaults>
</compile_context>

<pallas_src>
import functools

import jax
import jax.numpy as jnp
import numpy as np
from jax import lax
from jax.experimental import pallas as pl
from jax.experimental.pallas import tpu as pltpu


def _calibrator_kernel(topics_ref, logits_ref, exp_a_ref, b_ref, out_ref, *,
                       n_topics, share_a, share_b, shift_then_scale):
    # topics_ref : VMEM (TM, 1)            int32   row -> topic id
    # logits_ref : VMEM (TM, C)            float32
    # exp_a_ref  : VMEM (1, 1) / (1, T)    float32 precomputed exp(loga)
    # b_ref      : VMEM (1, C) / (T, C)    float32 VMEM-resident bias table
    # out_ref    : VMEM (TM, C)            float32
    x = logits_ref[...]                                   # (TM, C)
    tm = x.shape[0]

    need_onehot = (not share_a) or (not share_b)
    if need_onehot:
        t = topics_ref[...]                               # (TM, 1) int32
        iota = lax.broadcasted_iota(jnp.int32, (tm, n_topics), 1)
        onehot = (t == iota).astype(jnp.float32)          # (TM, n_topics)

    if share_a:
        scale = exp_a_ref[...]                            # (1, 1), broadcasts
    else:
        # lane-select + reduce over the (small) topic axis -> (TM, 1)
        scale = jnp.sum(onehot * exp_a_ref[...], axis=-1, keepdims=True)

    if share_b:
        bb = b_ref[...]                                   # (1, C), broadcasts
    else:
        # Gather TM bias rows with one matmul on the otherwise-idle MXU.
        bb = jnp.dot(onehot, b_ref[...],
                     preferred_element_type=jnp.float32,
                     precision=lax.Precision.HIGHEST)     # (TM, C)

    if shift_then_scale:
        out_ref[...] = (x + bb) * scale
    else:
        out_ref[...] = x * scale + bb


def calibrator_forward(logits, topics, loga, b, *, n_topics, n_classes,
                       share_a, share_b, shift_then_scale, block_rows=512):
    """Pallas implementation of TorchCalibrator.forward.

    logits: [N, C] f32, topics: [N] int.
    loga:   (1,) if share_a else (n_topics,)
    b:      (n_classes,) if share_b else (n_topics, n_classes)
    """
    N, C = logits.shape
    assert C == n_classes

    logits = logits.astype(jnp.float32)
    topics2d = topics.astype(jnp.int32).reshape(N, 1)

    # exp(loga) computed once here: n_topics transcendentals instead of N.
    if share_a:
        exp_a = jnp.exp(loga.astype(jnp.float32)).reshape(1, 1)
    else:
        exp_a = jnp.exp(loga.astype(jnp.float32)).reshape(1, n_topics)

    # share_b: keep b as a single (1, C) row (no broadcast_to materialization).
    if share_b:
        b2d = b.astype(jnp.float32).reshape(1, n_classes)
    else:
        b2d = b.astype(jnp.float32).reshape(n_topics, n_classes)

    tm = min(block_rows, N)           # tm == N (full dim) or a multiple of 8
    grid = (pl.cdiv(N, tm),)

    kernel = functools.partial(_calibrator_kernel, n_topics=n_topics,
                               share_a=share_a, share_b=share_b,
                               shift_then_scale=shift_then_scale)

    return pl.pallas_call(
        kernel,
        out_shape=jax.ShapeDtypeStruct((N, C), jnp.float32),
        grid=grid,
        in_specs=[
            pl.BlockSpec((tm, 1), lambda i: (i, 0)),       # topics (per-tile)
            pl.BlockSpec((tm, C), lambda i: (i, 0)),       # logits (per-tile)
            pl.BlockSpec(exp_a.shape, lambda i: (0, 0)),   # exp(loga), resident
            pl.BlockSpec(b2d.shape, lambda i: (0, 0)),     # bias table, resident
        ],
        out_specs=pl.BlockSpec((tm, C), lambda i: (i, 0)),
        compiler_params=pltpu.CompilerParams(
            dimension_semantics=("parallel",)),            # shard tiles on v7x
    )(topics2d, logits, exp_a, b2d)


def calibrator_reference(logits, topics, loga, b, *, share_a, share_b,
                         shift_then_scale):
    """Pure-JAX reference mirroring the PyTorch forward exactly."""
    if share_a:
        scales = jnp.broadcast_to(jnp.exp(loga[0]), (logits.shape[0], 1))
    else:
        scales = jnp.exp(loga)[topics][:, None]
    if share_b:
        b_per = jnp.broadcast_to(b[None, :], (logits.shape[0], b.shape[0]))
    else:
        b_per = b[topics]
    if shift_then_scale:
        return (logits + b_per) * scales
    return logits * scales + b_per


if __name__ == "__main__":
    # Config (exercise the general, non-shared gather path).
    share_a = False
    share_b = False
    shift_then_scale = True

    N = 1024        # batch of examples (2 row-tiles of 512)
    n_classes = 128  # lane-dense output (multiple of 128)
    n_topics = 8

    key = jax.random.PRNGKey(0)
    k_logits, k_topics, k_loga, k_b = jax.random.split(key, 4)

    logits = jax.random.normal(k_logits, (N, n_classes), dtype=jnp.float32)
    topics = jax.random.randint(k_topics, (N,), 0, n_topics, dtype=jnp.int32)

    # Deterministic, non-trivial parameter init (module's __init__ uses zeros;
    # we use small random values so the kernel actually does work).
    loga = 0.1 * jax.random.normal(k_loga, (1,) if share_a else (n_topics,),
                                   dtype=jnp.float32)
    b = 0.1 * jax.random.normal(
        k_b, (n_classes,) if share_b else (n_topics, n_classes),
        dtype=jnp.float32)

    out = calibrator_forward(logits, topics, loga, b,
                             n_topics=n_topics, n_classes=n_classes,
                             share_a=share_a, share_b=share_b,
                             shift_then_scale=shift_then_scale)
    out = jax.block_until_ready(out)

    ref = calibrator_reference(logits, topics, loga, b,
                               share_a=share_a, share_b=share_b,
                               shift_then_scale=shift_then_scale)
    np.testing.assert_allclose(np.asarray(out), np.asarray(ref),
                               rtol=1e-5, atol=1e-5)
    print("KERNEL_OK")
</pallas_src>

<mosaic_0001>
module attributes {stable_mosaic.version = 11 : i64} {
  func.func @_calibrator_kernel(%arg0: i32, %arg1: memref<512x1xi32, #tpu.memory_space<vmem>>, %arg2: memref<512x128xf32, #tpu.memory_space<vmem>>, %arg3: memref<1x8xf32, #tpu.memory_space<vmem>>, %arg4: memref<8x128xf32, #tpu.memory_space<vmem>>, %arg5: memref<512x128xf32, #tpu.memory_space<vmem>>) attributes {dimension_semantics = [#tpu.dimension_semantics<parallel>], iteration_bounds = array<i64: 2>, scalar_prefetch = 0 : i64, scratch_operands = 0 : i64, tpu.core_type = #tpu.core_type<tc>, window_params = [{transform_indices = @transform_0, window_bounds = array<i64: 512, 1>}, {transform_indices = @transform_1, window_bounds = array<i64: 512, 128>}, {pipeline_mode = #tpu.pipeline_mode<synchronous>, transform_indices = @transform_2, window_bounds = array<i64: 1, 8>}, {pipeline_mode = #tpu.pipeline_mode<synchronous>, transform_indices = @transform_3, window_bounds = array<i64: 8, 128>}, {transform_indices = @transform_4, window_bounds = array<i64: 512, 128>}]} {
    %c0 = arith.constant 0 : index
    %c0_0 = arith.constant 0 : index
    %0 = vector.load %arg2[%c0, %c0_0] : memref<512x128xf32, #tpu.memory_space<vmem>>, vector<512x128xf32>
    %c0_1 = arith.constant 0 : index
    %c0_2 = arith.constant 0 : index
    %1 = vector.load %arg1[%c0_1, %c0_2] : memref<512x1xi32, #tpu.memory_space<vmem>>, vector<512x1xi32>
    %2 = tpu.iota {dimensions = array<i32: 1>} : vector<512x8xi32>
    %3 = vector.broadcast %1 : vector<512x1xi32> to vector<512x8xi32>
    %4 = arith.cmpi eq, %3, %2 : vector<512x8xi32>
    %5 = arith.extui %4 : vector<512x8xi1> to vector<512x8xi32>
    %6 = arith.sitofp %5 : vector<512x8xi32> to vector<512x8xf32>
    %c0_3 = arith.constant 0 : index
    %c0_4 = arith.constant 0 : index
    %7 = vector.load %arg3[%c0_3, %c0_4] : memref<1x8xf32, #tpu.memory_space<vmem>>, vector<1x8xf32>
    %8 = vector.broadcast %7 : vector<1x8xf32> to vector<512x8xf32>
    %9 = arith.mulf %6, %8 : vector<512x8xf32>
    %cst = arith.constant dense<0.000000e+00> : vector<512xf32>
    %10 = vector.multi_reduction <add>, %9, %cst [1] : vector<512x8xf32> to vector<512xf32>
    %11 = vector.shape_cast %10 : vector<512xf32> to vector<512x1xf32>
    %c0_5 = arith.constant 0 : index
    %c0_6 = arith.constant 0 : index
    %12 = vector.load %arg4[%c0_5, %c0_6] : memref<8x128xf32, #tpu.memory_space<vmem>>, vector<8x128xf32>
    %cst_7 = arith.constant dense<0.000000e+00> : vector<512x128xf32>
    %13 = tpu.matmul %6, %12, %cst_7 {dimension_numbers = #tpu.dot_dimension_numbers<[1], [0], [0], [1], [0, 0, 1, 1], [], []>, precision = #tpu.contract_precision<fp32>} : vector<512x8xf32>, vector<8x128xf32>, vector<512x128xf32> -> vector<512x128xf32>
    %14 = arith.addf %0, %13 : vector<512x128xf32>
    %15 = vector.broadcast %11 : vector<512x1xf32> to vector<512x128xf32>
    %16 = arith.mulf %14, %15 : vector<512x128xf32>
    %c0_8 = arith.constant 0 : index
    %c0_9 = arith.constant 0 : index
    %17 = vector.load %arg5[%c0_8, %c0_9] : memref<512x128xf32, #tpu.memory_space<vmem>>, vector<512x128xf32>
    tpu.vector_store %arg5[%c0_8, %c0_9], %16 {strides = array<i32>} : memref<512x128xf32, #tpu.memory_space<vmem>>, vector<512x128xf32>,
    return
  }
  func.func @transform_0(%arg0: i32) -> (i32, i32) {
    %c0_i32 = arith.constant 0 : i32
    %c0_i32_0 = arith.constant 0 : i32
    return %arg0, %c0_i32 : i32, i32
  }
  func.func @transform_1(%arg0: i32) -> (i32, i32) {
    %c0_i32 = arith.constant 0 : i32
    %c0_i32_0 = arith.constant 0 : i32
    return %arg0, %c0_i32 : i32, i32
  }
  func.func @transform_2(%arg0: i32) -> (i32, i32) {
    %c0_i32 = arith.constant 0 : i32
    %c0_i32_0 = arith.constant 0 : i32
    %c0_i32_1 = arith.constant 0 : i32
    return %c0_i32, %c0_i32_0 : i32, i32
  }
  func.func @transform_3(%arg0: i32) -> (i32, i32) {
    %c0_i32 = arith.constant 0 : i32
    %c0_i32_0 = arith.constant 0 : i32
    %c0_i32_1 = arith.constant 0 : i32
    return %c0_i32, %c0_i32_0 : i32, i32
  }
  func.func @transform_4(%arg0: i32) -> (i32, i32) {
    %c0_i32 = arith.constant 0 : i32
    %c0_i32_0 = arith.constant 0 : i32
    return %arg0, %c0_i32 : i32, i32
  }
}

</mosaic_0001>

<bundles_post_ra>
// kernel: tpu_custom_call.1
= control target key start
LH: loop header
LB: loop body
LE: loop exit
PB: predicated region body
PF: predicated region fallthrough
CT: control target
= control target key end

     0   :  { %9 = vsyncpa [#allocation3], 0  ;;  %s6315_s0 = inlined_call_operand.vmem [shape: s32[1024,1], index: 0, kind: input, shape index: {}]   ;;  %s6316_s1 = inlined_call_operand.vmem [shape: f32[1024,128], index: 1, kind: input, shape index: {}]   ;;  %s6317_s2 = inlined_call_operand.hbm [shape: f32[1,8], index: 2, kind: input, shape index: {}]   ;;  %s6318_s3 = inlined_call_operand.vmem [shape: f32[8,128], index: 3, kind: input, shape index: {}]   ;;  %s6319_s4 = inlined_call_operand.hbm [shape: f32[1024,128], index: 4, kind: output, shape index: {}]  }
   0x1   :  { %10 = vsyncpa [#allocation4], 0 }
   0x2   :  { %12 = vsyncpa [#allocation4 + $0x1], 0  ;;  %s4059_s15 = smov 0   ;;  %s4061_s16 = smov 0  }
   0x3   :  { %s4063_s17 = smov 0   ;;  %s4065_s18 = smov 0  }
   0x4 LB: > { %s4080_s19 = sadd.s32 4294967295, %s4027_s18   ;;  %s3597_s20 = sadd.s32 4294967294, %s4027_s18   ;;  %s4027_s18 = sphi %s4065_s18, %s7028_s18   ;;  %s4023_s17 = sphi %s4063_s17, %s7027_s17   ;;  %s4019_s16 = sphi %s4061_s16, %s7026_s16   ;;  %s4015_s15 = sphi %s4059_s15, %s7025_s15  }
   0x5   : > { %s4084_s21 = sadd.s32 1, %s4027_s18   ;;  %s119_s22 = sadd.s32 1, %s4023_s17 }
   0x6   : > { %s116_s23 = ssub.s32 %s4027_s18, %s4084_s21  ;;  %p129_p0 = scmp.ne.s32.totalorder %s4023_s17, %s4019_s16 }
   0x7   : > { %p117_p1 = scmp.eq.s32.totalorder %s116_s23, 0  ;;  %p130_p2 = scmp.eq.s32.totalorder %s4080_s19, 1 }
   0x8   : > { %p135_p3 = scmp.ne.s32.totalorder %s4019_s16, %s4015_s15  ;;  %p136_p4 = scmp.eq.s32.totalorder %s3597_s20, 1 }
   0x9   : > { %s4095_s24 = scalar_select %p117_p1, %s4023_s17, %s119_s22  }
   0xa   : > { %p4097_p5 = por %p130_p2, %p129_p0  ;;  %p4101_p6 = por %p136_p4, %p135_p3 }
   0xb   : > { %p3598_p7 = scmp.ge.s32.totalorder %s4027_s18, 1  ;;  %p143_p8 = scmp.lt.s32.totalorder %s4027_s18, 3 }
   0xc   : > { %p3886_p9 = scmp.eq.s32.totalorder %s4080_s19, 0  ;;  %s155_s29 = sshll.u32 %s6317_s2, 4  ;;  %s156_s29 = int_to_ptr.hbm [resolvable:$true] %s155_s29 }
   0xd   : > { %p144_p10 = pnand %p3598_p7, %p143_p8  ;;  %s4029_s30 = smov [#allocation2]  }
   0xe   : > { %s157_s5 = sshll.u32 %s4029_s30, 4  ;;  %s158_s5 = int_to_ptr.vmem [resolvable:$true] %s157_s5 }
   0xf   : > { %p3878_p11 = pneg %p144_p10  ;;  %191 = sbr.rel (%p144_p10) target bundleno = 1062 (0x426), region = 36 }
  0x11   : > { %p3879_p12 = pnand %p3886_p9, %p3878_p11 }
  0x13   : > { %3881 = dma.hbm_to_vmem [thread:$0]  (!%p3879_p12), %s156_s29, 16, %s158_s5, [#allocation3]  }
  0x14   : > { %4006 = dma.done.wait (%p3886_p9), [#allocation3], 16  }
  0x15   : > { %4008 = vsyncadd (%p3886_p9), [#allocation3], 4294967280  ;;  %s3604_s6 = sshll.u32 %s4080_s19, 6  ;;  %v4030_v0 = vmov 0   ;;  %v1011_v31 = vld [vmem:[%s6318_s3] sm:$0xff]  ;;  %v364_v51 = vlaneseq  ;;  %v6350_v57 = vmov 0.0  }
  0x16   : > { %3928 = vset.pattern.permute.xlu2 %v4030_v0  ;;  %3927 = vset.pattern.permute.xlu1 %v4030_v0  ;;  %p224_p13 = scmp.lt.s32.totalorder %s3604_s6, 127  ;;  %v1219_v32 = vand.u32 4294901760, %v1011_v31  ;;  %vm818_vm1 = vcmask 64512   ;;  %s220_s22 = sand.u32 1, %s4019_s16  }
  0x17   : > { %3926 = vset.pattern.permute.xlu0 %v4030_v0  ;;  %v4171_v53 = vand.u32 127, %v364_v51  ;;  %s3603_s23 = sshll.u32 %s220_s22, 9  ;;  %s3869_s28 = sshll.u32 %s4080_s19, 9 }
  0x18   : > { %s7030_s6 = smov (!%p224_p13, %s3604_s6), 127  ;;  %v1750_v35 = vsub.f32 %v1011_v31, %v1219_v32  ;;  %1220 = vmatpush.msra.mxu0 %v1219_v32  ;;  %3870 = vmatpush.msra.mxu2 %v1219_v32  ;;  %s5744_s27 = scalar_lea.vmem [#allocation5], %s3603_s23 }
  0x19   : > { %s3605_s7 = sshll.u32 %s7030_s6, 3  ;;  %s3507_s5 = scalar_lea.hbm %s6319_s4, %s3869_s28 }
  0x1a   : > { %s4120_s10 = scalar_lea.vmem %s6315_s0, %s3605_s7  ;;  %v1751_v37 = vand.u32 4294901760, %v1750_v35  ;;  %2029 = vmatpush.msrb.mxu2 %v1750_v35  ;;  %s5727_s20 = scalar_lea.vmem %s6316_s1, %s3605_s7 }
  0x1b   : > { %v332_v1 = vld [vmem:[%s4120_s10 + $0x100] sm:$0xff]  ;;  %v301_v2 = vld [vmem:[%s4120_s10 + $0x8] sm:$0xff]  ;;  %v335_v5 = vld [vmem:[%s4120_s10 + $0x118] sm:$0xff]  ;;  %s3508_s6 = sshll.u32 %s5744_s27, 4  ;;  %s3510_s7 = sshll.u32 %s3507_s5, 4  ;;  %s3509_s6 = int_to_ptr.vmem [resolvable:$true] %s3508_s6  ;;  %s3511_s7 = int_to_ptr.hbm [resolvable:$true] %s3510_s7 }
  0x1c   : > { %v300_v3 = vld [vmem:[%s4120_s10] sm:$0xff]  ;;  %463 = vperm.xlu0 %3926, %v332_v1   ;;  %370 = vperm.xlu2 %3928, %v301_v2   ;;  %v333_v4 = vld [vmem:[%s4120_s10 + $0x108] sm:$0xff]  ;;  %v334_v6 = vld [vmem:[%s4120_s10 + $0x110] sm:$0xff]  ;;  %v1752_v38 = vsub.f32 %v1750_v35, %v1751_v37  ;;  %s3496_s19 = scalar_lea.sflag [#allocation4], %s220_s22  ;;  %s3975_s8 = sshra.s32 %s3511_s7, 4  ;;  %s3976_s8 = int_to_ptr.hbm [resolvable:$true] %s3975_s8 }
  0x1d   : > { %367 = vperm.xlu1 %3927, %v300_v3   ;;  %v302_v7 = vld [vmem:[%s4120_s10 + $0x10] sm:$0xff]  ;;  %v303_v8 = vld [vmem:[%s4120_s10 + $0x18] sm:$0xff]  ;;  %v336_v9 = vld [vmem:[%s4120_s10 + $0x120] sm:$0xff]  ;;  %2771 = vmatpush.msrb.mxu0 %v1751_v37  ;;  %s3977_s9 = scalar_lea.hbm %s3976_s8, 512  ;;  %s3981_s12 = scalar_lea.hbm %s6319_s4, 1024 }
  0x1e   : > { %v337_v10 = vld [vmem:[%s4120_s10 + $0x128] sm:$0xff]  ;;  %v338_v11 = vld [vmem:[%s4120_s10 + $0x130] sm:$0xff]  ;;  %v304_v12 = vld [vmem:[%s4120_s10 + $0x20] sm:$0xff]  ;;  %v1753_v39 = vand.u32 4294901760, %v1752_v38  ;;  %p3978_p0 = scmp.ne.s32.totalorder %s3976_s8, %s3977_s9  ;;  %p3982_p3 = scmp.lt.s32.totalorder %s3976_s8, %s6319_s4 }
  0x1f   : > { %v305_v13 = vld [vmem:[%s4120_s10 + $0x28] sm:$0xff]  ;;  %v306_v14 = vld [vmem:[%s4120_s10 + $0x30] sm:$0xff]  ;;  %v339_v15 = vld [vmem:[%s4120_s10 + $0x138] sm:$0xff]  ;;  %p3983_p4 = scmp.lt.s32.totalorder %s3981_s12, %s3977_s9 }
  0x20   : > { %v340_v16 = vld [vmem:[%s4120_s10 + $0x140] sm:$0xff]  ;;  %v341_v17 = vld [vmem:[%s4120_s10 + $0x148] sm:$0xff]  ;;  %v307_v18 = vld [vmem:[%s4120_s10 + $0x38] sm:$0xff]  ;;  %1754 = vmatpush.msra.mxu1 %v1753_v39  ;;  %3871 = vmatpush.msra.mxu3 %v1753_v39  ;;  %p3979_p1 = pnand %p3978_p0, %p4097_p5 }
  0x21   : > { %v308_v19 = vld [vmem:[%s4120_s10 + $0x40] sm:$0xff]  ;;  %v309_v20 = vld [vmem:[%s4120_s10 + $0x48] sm:$0xff]  ;;  %v342_v21 = vld [vmem:[%s4120_s10 + $0x150] sm:$0xff]  ;;  %p3984_p7 = por %p3983_p4, %p3982_p3 }
  0x22   : > { %v343_v22 = vld [vmem:[%s4120_s10 + $0x158] sm:$0xff]  ;;  %v344_v23 = vld [vmem:[%s4120_s10 + $0x160] sm:$0xff]  ;;  %v310_v24 = vld [vmem:[%s4120_s10 + $0x50] sm:$0xff]  ;;  %2367 = vmatpush.msrb.mxu3 %v1219_v32  ;;  %3045 = vmatpush.msrb.mxu1 %v1219_v32  ;;  %p3980_p2 = pneg %p3979_p1 }
  0x23   : > { %v311_v25 = vld [vmem:[%s4120_s10 + $0x58] sm:$0xff]  ;;  %v312_v26 = vld [vmem:[%s4120_s10 + $0x60] sm:$0xff]  ;;  %v345_v27 = vld [vmem:[%s4120_s10 + $0x168] sm:$0xff] }
  0x24   : > { %466 = vperm.xlu0 %3926, %v333_v4   ;;  %472 = vperm.xlu2 %3928, %v335_v5   ;;  %v346_v28 = vld [vmem:[%s4120_s10 + $0x170] sm:$0xff]  ;;  %v347_v29 = vld [vmem:[%s4120_s10 + $0x178] sm:$0xff]  ;;  %v313_v30 = vld [vmem:[%s4120_s10 + $0x68] sm:$0xff]  ;;  %p3985_p8 = pnand %p3984_p7, %p3980_p2 }
  0x25   : > { %469 = vperm.xlu1 %3927, %v334_v6   ;;  %v314_v33 = vld [vmem:[%s4120_s10 + $0x70] sm:$0xff]  ;;  %v315_v34 = vld [vmem:[%s4120_s10 + $0x78] sm:$0xff]  ;;  %v348_v36 = vld [vmem:[%s4120_s10 + $0x180] sm:$0xff] }
  0x26   : > { %v349_v40 = vld [vmem:[%s4120_s10 + $0x188] sm:$0xff]  ;;  %v350_v41 = vld [vmem:[%s4120_s10 + $0x190] sm:$0xff]  ;;  %v316_v42 = vld [vmem:[%s4120_s10 + $0x80] sm:$0xff] }
  0x27   : > { %v317_v44 = vld [vmem:[%s4120_s10 + $0x88] sm:$0xff]  ;;  %v318_v45 = vld [vmem:[%s4120_s10 + $0x90] sm:$0xff]  ;;  %v351_v46 = vld [vmem:[%s4120_s10 + $0x198] sm:$0xff] }
  0x28   : > { %v352_v48 = vld [vmem:[%s4120_s10 + $0x1a0] sm:$0xff]  ;;  %v353_v49 = vld [vmem:[%s4120_s10 + $0x1a8] sm:$0xff]  ;;  %v319_v50 = vld [vmem:[%s4120_s10 + $0x98] sm:$0xff] }
  0x29   : > { %v320_v54 = vld [vmem:[%s4120_s10 + $0xa0] sm:$0xff]  ;;  %v321_v55 = vld [vmem:[%s4120_s10 + $0xa8] sm:$0xff]  ;;  %v354_v56 = vld [vmem:[%s4120_s10 + $0x1b0] sm:$0xff] }
  0x2a   : > { %v355_v1 = vld [vmem:[%s4120_s10 + $0x1b8] sm:$0xff]  ;;  %v356_v2 = vld [vmem:[%s4120_s10 + $0x1c0] sm:$0xff]  ;;  %v322_v4 = vld [vmem:[%s4120_s10 + $0xb0] sm:$0xff] }
  0x2c   : > { %373 = vperm.xlu0 %3926, %v302_v7   ;;  %376 = vperm.xlu2 %3928, %v303_v8  }
  0x2d   : > { %475 = vperm.xlu1 %3927, %v336_v9  }
  0x34   : > { %478 = vperm.xlu0 %3926, %v337_v10   ;;  %481 = vperm.xlu2 %3928, %v338_v11  }
  0x35   : > { %379 = vperm.xlu1 %3927, %v304_v12  }
  0x3c   : > { %382 = vperm.xlu0 %3926, %v305_v13   ;;  %385 = vperm.xlu2 %3928, %v306_v14  }
  0x3d   : > { %484 = vperm.xlu1 %3927, %v339_v15  }
  0x44   : > { %487 = vperm.xlu0 %3926, %v340_v16   ;;  %490 = vperm.xlu2 %3928, %v341_v17  }
  0x45   : > { %388 = vperm.xlu1 %3927, %v307_v18  }
  0x4c   : > { %391 = vperm.xlu0 %3926, %v308_v19   ;;  %394 = vperm.xlu2 %3928, %v309_v20  }
  0x4d   : > { %493 = vperm.xlu1 %3927, %v342_v21   ;;  %v323_v21 = vld [vmem:[%s4120_s10 + $0xb8] sm:$0xff] }
  0x54   : > { %496 = vperm.xlu0 %3926, %v343_v22   ;;  %499 = vperm.xlu2 %3928, %v344_v23   ;;  %v324_v22 = vld [vmem:[%s4120_s10 + $0xc0] sm:$0xff] }
  0x55   : > { %397 = vperm.xlu1 %3927, %v310_v24   ;;  %v357_v24 = vld [vmem:[%s4120_s10 + $0x1c8] sm:$0xff] }
  0x5c   : > { %400 = vperm.xlu0 %3926, %v311_v25   ;;  %403 = vperm.xlu2 %3928, %v312_v26  }
  0x5d   : > { %502 = vperm.xlu1 %3927, %v345_v27  }
  0x64   : > { %505 = vperm.xlu0 %3926, %v346_v28   ;;  %508 = vperm.xlu2 %3928, %v347_v29  }
  0x65   : > { %406 = vperm.xlu1 %3927, %v313_v30  }
  0x6c   : > { %409 = vperm.xlu0 %3926, %v314_v33   ;;  %412 = vperm.xlu2 %3928, %v315_v34  }
  0x6d   : > { %511 = vperm.xlu1 %3927, %v348_v36  }
  0x74   : > { %514 = vperm.xlu0 %3926, %v349_v40   ;;  %517 = vperm.xlu2 %3928, %v350_v41   ;;  %v358_v40 = vld [vmem:[%s4120_s10 + $0x1d0] sm:$0xff]  ;;  %v359_v41 = vld [vmem:[%s4120_s10 + $0x1d8] sm:$0xff] }
  0x75   : > { %415 = vperm.xlu1 %3927, %v316_v42  }
  0x76   : > { %v371_v43 = vpop.permute.xlu2 %370 }
  0x77   : > { %vm559_vm0 = vcmp.eq.s32.totalorder %v371_v43, %v4171_v53 }
  0x78   : > { %v4178_v58 = vsel %vm559_vm0, 1.0, %v6350_v57 }
  0x79   : > { %6556 = vst [vmem:[#allocation8_spill] sm:$0xff] %v4178_v58  ;;  %v1016_v63 = vsel %vm818_vm1, %v4178_v58, 0 }
  0x7a   : > { %v4207_v8 = vsub.f32 %v1016_v63, %v1016_v63 }
  0x7c   : > { %418 = vperm.xlu0 %3926, %v317_v44   ;;  %421 = vperm.xlu2 %3928, %v318_v45   ;;  %6559 = vst [vmem:[#allocation11_spill] sm:$0xff] %v4207_v8  ;;  %v6336_v16 = vand.u32 4294901760, %v4207_v8  ;;  %v325_v44 = vld [vmem:[%s4120_s10 + $0xc8] sm:$0xff] }
  0x7d   : > { %520 = vperm.xlu1 %3927, %v351_v46  }
  0x7e   : > { %v4164_v47 = vpop.permute.xlu2 %472  ;;  %v1232_v27 = vsub.f32 %v4207_v8, %v6336_v16 }
  0x7f   : > { %vm593_vm6 = vcmp.eq.s32.totalorder %v4164_v47, %v4171_v53 }
  0x80   : > { %v4252_v30 = vsel %vm593_vm6, 1.0, %v6350_v57  ;;  %v1233_v36 = vand.u32 4294901760, %v1232_v27 }
  0x81   : > { %6564 = vst [vmem:[#allocation16_spill] sm:$0xff] %v4252_v30  ;;  %v1118_v43 = vsel %vm818_vm1, %v4252_v30, 0 }
  0x84   : > { %523 = vperm.xlu0 %3926, %v352_v48   ;;  %526 = vperm.xlu2 %3928, %v353_v49   ;;  %v4287_v49 = vsub.f32 %v1118_v43, %v1118_v43 }
  0x85   : > { %424 = vperm.xlu1 %3927, %v319_v50  }
  0x86   : > { %v4169_v52 = vpop.permute.xlu2 %376  ;;  %6568 = vst [vmem:[#allocation20_spill] sm:$0xff] %v4287_v49  ;;  %v6323_v63 = vand.u32 4294901760, %v4287_v49 }
  0x87   : > { %vm561_vm7 = vcmp.eq.s32.totalorder %v4169_v52, %v4171_v53 }
  0x88   : > { %v4260_v34 = vsel %vm561_vm7, 1.0, %v6350_v57 }
  0x89   : > { %6565 = vst [vmem:[#allocation17_spill] sm:$0xff] %v4260_v34  ;;  %v1022_v46 = vsel %vm818_vm1, %v4260_v34, 0 }
  0x8a   : > { %v4289_v50 = vsub.f32 %v1022_v46, %v1022_v46 }
  0x8c   : > { %427 = vperm.xlu0 %3926, %v320_v54   ;;  %430 = vperm.xlu2 %3928, %v321_v55   ;;  %6569 = vst [vmem:[#allocation21_spill] sm:$0xff] %v4289_v50 }
  0x8d   : > { %529 = vperm.xlu1 %3927, %v354_v56  }
  0x8e   : > { %v464_v59 = vpop.permute.xlu0 %463  ;;  %v4180_v60 = vpop.permute.xlu2 %481 }
  0x8f   : > { %vm590_vm2 = vcmp.eq.s32.totalorder %v464_v59, %v4171_v53  ;;  %v368_v61 = vpop.permute.xlu1 %367  ;;  %vm596_vm13 = vcmp.eq.s32.totalorder %v4180_v60, %v4171_v53 }
  0x90   : > { %v4184_v62 = vsel %vm590_vm2, 1.0, %v6350_v57  ;;  %vm558_vm3 = vcmp.eq.s32.totalorder %v368_v61, %v4171_v53 }
  0x91   : > { %6557 = vst [vmem:[#allocation9_spill] sm:$0xff] %v4184_v62  ;;  %v4190_v0 = vsel %vm558_vm3, 1.0, %v6350_v57  ;;  %3704 = vmatmul.msk.f32.vlgmr.msra.gmra.mxu3 %vm818_vm1, %v4184_v62  ;;  %v1109_v3 = vsel %vm818_vm1, %v4184_v62, 0 }
  0x92   : > { %3672 = vmatmul.msk.f32.vlgmr.msra.gmra.mxu1 %vm818_vm1, %v4190_v0  ;;  %v1013_v5 = vsel %vm818_vm1, %v4190_v0, 0  ;;  %v4203_v6 = vsub.f32 %v1109_v3, %v1109_v3  ;;  %v327_v3 = vld [vmem:[%s4120_s10 + $0xd8] sm:$0xff] }
  0x93   : > { %v4205_v7 = vsub.f32 %v1013_v5, %v1013_v5 }
  0x94   : > { %6558 = vst [vmem:[#allocation10_spill] sm:$0xff] %v4203_v6  ;;  %532 = vperm.xlu0 %3926, %v355_v1   ;;  %535 = vperm.xlu2 %3928, %v356_v2   ;;  %v6327_v9 = vand.u32 4294901760, %v4203_v6  ;;  %v326_v2 = vld [vmem:[%s4120_s10 + $0xd0] sm:$0xff] }
  0x95   : > { %433 = vperm.xlu1 %3927, %v322_v4   ;;  %v6337_v10 = vand.u32 4294901760, %v4205_v7  ;;  %v6332_v4 = vand.u32 4294901760, %v4289_v50 }
  0x96   : > { %v467_v11 = vpop.permute.xlu0 %466  ;;  %v4211_v12 = vpop.permute.xlu2 %385  ;;  %v1480_v13 = vsub.f32 %v4203_v6, %v6327_v9 }
  0x97   : > { %vm591_vm4 = vcmp.eq.s32.totalorder %v467_v11, %v4171_v53  ;;  %v470_v14 = vpop.permute.xlu1 %469  ;;  %v1224_v15 = vsub.f32 %v4205_v7, %v6337_v10  ;;  %v360_v11 = vld [vmem:[%s4120_s10 + $0x1e0] sm:$0xff]  ;;  %vm564_vm14 = vcmp.eq.s32.totalorder %v4211_v12, %v4171_v53  ;;  %v4364_v12 = vsel %vm596_vm13, 1.0, %v6350_v57 }
  0x98   : > { %v4222_v17 = vsel %vm591_vm4, 1.0, %v6350_v57  ;;  %vm592_vm5 = vcmp.eq.s32.totalorder %v470_v14, %v4171_v53  ;;  %v1481_v18 = vand.u32 4294901760, %v1480_v13  ;;  %v1504_v14 = vsub.f32 %v4287_v49, %v6323_v63  ;;  %6578 = vst [vmem:[#allocation30_spill] sm:$0xff] %v4364_v12 }
  0x99   : > { %6560 = vst [vmem:[#allocation12_spill] sm:$0xff] %v4222_v17  ;;  %v4226_v19 = vsel %vm592_vm5, 1.0, %v6350_v57  ;;  %3705 = vmatmul.msk.f32.gmra.mxu3 %vm818_vm1, %v4222_v17  ;;  %v1225_v20 = vand.u32 4294901760, %v1224_v15  ;;  %v1112_v23 = vsel %vm818_vm1, %v4222_v17, 0 }
  0x9a   : > { %6561 = vst [vmem:[#allocation13_spill] sm:$0xff] %v4226_v19  ;;  %3673 = vmatmul.msk.f32.gmra.mxu1 %vm818_vm1, %v4178_v58  ;;  %1482 = vmatmul.f32.vlgmr.msra.gmra.mxu2 %v1481_v18  ;;  %v4237_v25 = vsub.f32 %v1112_v23, %v1112_v23  ;;  %v1115_v26 = vsel %vm818_vm1, %v4226_v19, 0  ;;  %v1248_v18 = vsub.f32 %v4289_v50, %v6332_v4  ;;  %v1505_v27 = vand.u32 4294901760, %v1504_v14  ;;  %v363_v14 = vld [vmem:[%s4120_s10 + $0x1f8] sm:$0xff] }
  0x9b   : > { %1226 = vmatmul.f32.vlgmr.msra.gmra.mxu0 %v1225_v20  ;;  %v4249_v29 = vsub.f32 %v1115_v26, %v1115_v26 }
  0x9c   : > { %6562 = vst [vmem:[#allocation14_spill] sm:$0xff] %v4237_v25  ;;  %436 = vperm.xlu0 %3926, %v323_v21   ;;  %439 = vperm.xlu2 %3928, %v324_v22   ;;  %v6325_v28 = vand.u32 4294901760, %v4237_v25 }
  0x9d   : > { %6563 = vst [vmem:[#allocation15_spill] sm:$0xff] %v4249_v29  ;;  %538 = vperm.xlu1 %3927, %v357_v24   ;;  %v6324_v39 = vand.u32 4294901760, %v4249_v29 }
  0x9e   : > { %v374_v31 = vpop.permute.xlu0 %373  ;;  %v4254_v32 = vpop.permute.xlu2 %490  ;;  %v1488_v33 = vsub.f32 %v4237_v25, %v6325_v28 }
  0x9f   : > { %vm560_vm8 = vcmp.eq.s32.totalorder %v374_v31, %v4171_v53  ;;  %v476_v35 = vpop.permute.xlu1 %475  ;;  %v1496_v48 = vsub.f32 %v4249_v29, %v6324_v39  ;;  %vm599_vm4 = vcmp.eq.s32.totalorder %v4254_v32, %v4171_v53 }
  0xa0   : > { %v4264_v37 = vsel %vm560_vm8, 1.0, %v6350_v57  ;;  %v1489_v38 = vand.u32 4294901760, %v1488_v33  ;;  %vm594_vm9 = vcmp.eq.s32.totalorder %v476_v35, %v4171_v53  ;;  %v1249_v33 = vand.u32 4294901760, %v1248_v18  ;;  %v361_v35 = vld [vmem:[%s4120_s10 + $0x1e8] sm:$0xff] }
  0xa1   : > { %6566 = vst [vmem:[#allocation18_spill] sm:$0xff] %v4264_v37  ;;  %3706 = vmatmul.msk.f32.gmra.mxu3 %vm818_vm1, %v4226_v19  ;;  %v1019_v42 = vsel %vm818_vm1, %v4264_v37, 0  ;;  %v4292_v51 = vsel %vm594_vm9, 1.0, %v6350_v57  ;;  %v1497_v61 = vand.u32 4294901760, %v1496_v48  ;;  %v4462_v39 = vsel %vm599_vm4, 1.0, %v6350_v57 }
  0xa2   : > { %3674 = vmatmul.msk.f32.gmra.mxu1 %vm818_vm1, %v4264_v37  ;;  %1490 = vmatmul.f32.gmra.mxu2 %v1489_v38  ;;  %v4278_v45 = vsub.f32 %v1019_v42, %v1019_v42  ;;  %6570 = vst [vmem:[#allocation22_spill] sm:$0xff] %v4292_v51  ;;  %v1121_v5 = vsel %vm818_vm1, %v4292_v51, 0 }
  0xa3   : > { %1234 = vmatmul.f32.gmra.mxu0 %v1233_v36  ;;  %v4320_v15 = vsub.f32 %v1121_v5, %v1121_v5  ;;  %v362_v36 = vld [vmem:[%s4120_s10 + $0x1f0] sm:$0xff]  ;;  %6590 = vst [vmem:[#allocation42_spill] sm:$0xff] %v4462_v39 }
  0xa4   : > { %6567 = vst [vmem:[#allocation19_spill] sm:$0xff] %v4278_v45  ;;  %541 = vperm.xlu0 %3926, %v358_v40   ;;  %544 = vperm.xlu2 %3928, %v359_v41   ;;  %v6335_v47 = vand.u32 4294901760, %v4278_v45  ;;  %v328_v41 = vld [vmem:[%s4120_s10 + $0xe0] sm:$0xff]  ;;  %v330_v5 = vld [vmem:[%s4120_s10 + $0xf0] sm:$0xff] }
  0xa5   : > { %442 = vperm.xlu1 %3927, %v325_v44   ;;  %6572 = vst [vmem:[#allocation24_spill] sm:$0xff] %v4320_v15  ;;  %v6322_v31 = vand.u32 4294901760, %v4320_v15 }
  0xa6   : > { %v479_v52 = vpop.permute.xlu0 %478  ;;  %v4294_v54 = vpop.permute.xlu2 %394  ;;  %v1240_v55 = vsub.f32 %v4278_v45, %v6335_v47 }
  0xa7   : > { %v380_v56 = vpop.permute.xlu1 %379  ;;  %vm595_vm11 = vcmp.eq.s32.totalorder %v479_v52, %v4171_v53  ;;  %v1512_v43 = vsub.f32 %v4320_v15, %v6322_v31  ;;  %vm567_vm5 = vcmp.eq.s32.totalorder %v4294_v54, %v4171_v53 }
  0xa8   : > { %vm562_vm10 = vcmp.eq.s32.totalorder %v380_v56, %v4171_v53  ;;  %v1241_v59 = vand.u32 4294901760, %v1240_v55  ;;  %v4328_v21 = vsel %vm595_vm11, 1.0, %v6350_v57  ;;  %v4369_v55 = vsel %vm564_vm14, 1.0, %v6350_v57 }
  0xa9   : > { %v4302_v1 = vsel %vm562_vm10, 1.0, %v6350_v57  ;;  %3707 = vmatmul.msk.f32.gmra.mxu3 %vm818_vm1, %v4252_v30  ;;  %6574 = vst [vmem:[#allocation26_spill] sm:$0xff] %v4328_v21  ;;  %v1124_v40 = vsel %vm818_vm1, %v4328_v21, 0  ;;  %v1031_v18 = vsel %vm818_vm1, %v4369_v55, 0  ;;  %v4467_v54 = vsel %vm567_vm5, 1.0, %v6350_v57 }
  0xaa   : > { %6571 = vst [vmem:[#allocation23_spill] sm:$0xff] %v4302_v1  ;;  %3675 = vmatmul.msk.f32.gmra.mxu1 %vm818_vm1, %v4260_v34  ;;  %1498 = vmatmul.f32.gmra.mxu2 %v1497_v61  ;;  %v1025_v13 = vsel %vm818_vm1, %v4302_v1, 0  ;;  %v4356_v44 = vsub.f32 %v1124_v40, %v1124_v40 }
  0xab   : > { %1242 = vmatmul.f32.gmra.mxu0 %v1241_v59  ;;  %v4325_v20 = vsub.f32 %v1025_v13, %v1025_v13  ;;  %6579 = vst [vmem:[#allocation31_spill] sm:$0xff] %v4369_v55  ;;  %v1513_v59 = vand.u32 4294901760, %v1512_v43  ;;  %v1127_v13 = vsel %vm818_vm1, %v4364_v12, 0 }
  0xac   : > { %445 = vperm.xlu0 %3926, %v326_v2   ;;  %448 = vperm.xlu2 %3928, %v327_v3   ;;  %6576 = vst [vmem:[#allocation28_spill] sm:$0xff] %v4356_v44  ;;  %v6321_v61 = vand.u32 4294901760, %v4356_v44  ;;  %v329_v3 = vld [vmem:[%s4120_s10 + $0xe8] sm:$0xff] }
  0xad   : > { %547 = vperm.xlu1 %3927, %v360_v11   ;;  %6573 = vst [vmem:[#allocation25_spill] sm:$0xff] %v4325_v20  ;;  %v6331_v38 = vand.u32 4294901760, %v4325_v20 }
  0xae   : > { %v383_v22 = vpop.permute.xlu0 %382  ;;  %v4330_v23 = vpop.permute.xlu2 %499  ;;  %6591 = vst [vmem:[#allocation43_spill] sm:$0xff] %v4467_v54 }
  0xaf   : > { %vm563_vm12 = vcmp.eq.s32.totalorder %v383_v22, %v4171_v53  ;;  %v485_v24 = vpop.permute.xlu1 %484  ;;  %v1256_v46 = vsub.f32 %v4325_v20, %v6331_v38  ;;  %v1520_v22 = vsub.f32 %v4356_v44, %v6321_v61  ;;  %vm602_vm10 = vcmp.eq.s32.totalorder %v4330_v23, %v4171_v53 }
  0xb0   : > { %v4334_v26 = vsel %vm563_vm12, 1.0, %v6350_v57  ;;  %vm597_vm15 = vcmp.eq.s32.totalorder %v485_v24, %v4171_v53  ;;  %v6603_v23 = vmov 0.0  }
  0xb1   : > { %6575 = vst [vmem:[#allocation27_spill] sm:$0xff] %v4334_v26  ;;  %3708 = vmatmul.msk.f32.gmra.mxu3 %vm818_vm1, %v4292_v51  ;;  %v1028_v42 = vsel %vm818_vm1, %v4334_v26, 0  ;;  %v1257_v2 = vand.u32 4294901760, %v1256_v46  ;;  %v4397_v24 = vsel %vm597_vm15, 1.0, %v6350_v57  ;;  %v1521_v43 = vand.u32 4294901760, %v1520_v22 }
  0xb2   : > { %3676 = vmatmul.msk.f32.gmra.mxu1 %vm818_vm1, %v4302_v1  ;;  %1506 = vmatmul.f32.gmra.mxu2 %v1505_v27  ;;  %v4361_v60 = vsub.f32 %v1028_v42, %v1028_v42  ;;  %v4389_v27 = vsub.f32 %v1127_v13, %v1127_v13  ;;  %6582 = vst [vmem:[#allocation34_spill] sm:$0xff] %v4397_v24 }
  0xb3   : > { %1250 = vmatmul.f32.gmra.mxu0 %v1249_v33 }
  0xb4   : > { %550 = vperm.xlu0 %3926, %v361_v35   ;;  %553 = vperm.xlu2 %3928, %v362_v36   ;;  %6577 = vst [vmem:[#allocation29_spill] sm:$0xff] %v4361_v60  ;;  %v6330_v11 = vand.u32 4294901760, %v4361_v60  ;;  %v4394_v35 = vsub.f32 %v1031_v18, %v1031_v18  ;;  %v6320_v46 = vand.u32 4294901760, %v4389_v27 }
  0xb5   : > { %451 = vperm.xlu1 %3927, %v328_v41   ;;  %6580 = vst [vmem:[#allocation32_spill] sm:$0xff] %v4389_v27 }
  0xb6   : > { %v488_v48 = vpop.permute.xlu0 %487  ;;  %v4366_v52 = vpop.permute.xlu2 %403  ;;  %v1264_v33 = vsub.f32 %v4361_v60, %v6330_v11  ;;  %6581 = vst [vmem:[#allocation33_spill] sm:$0xff] %v4394_v35  ;;  %v1528_v13 = vsub.f32 %v4389_v27, %v6320_v46 }
  0xb7   : > { %v389_v56 = vpop.permute.xlu1 %388  ;;  %vm598_vm2 = vcmp.eq.s32.totalorder %v488_v48, %v4171_v53  ;;  %vm570_vm11 = vcmp.eq.s32.totalorder %v4366_v52, %v4171_v53 }
  0xb8   : > { %vm565_vm0 = vcmp.eq.s32.totalorder %v389_v56, %v4171_v53  ;;  %v1265_v56 = vand.u32 4294901760, %v1264_v33  ;;  %v4428_v33 = vsel %vm598_vm2, 1.0, %v6350_v57 }
  0xb9   : > { %3709 = vmatmul.msk.f32.gmra.mxu3 %vm818_vm1, %v4328_v21  ;;  %v4402_v41 = vsel %vm565_vm0, 1.0, %v6350_v57  ;;  %6586 = vst [vmem:[#allocation38_spill] sm:$0xff] %v4428_v33  ;;  %v1133_v61 = vsel %vm818_vm1, %v4428_v33, 0 }
  0xba   : > { %3677 = vmatmul.msk.f32.gmra.mxu1 %vm818_vm1, %v4334_v26  ;;  %1514 = vmatmul.f32.gmra.mxu2 %v1513_v59  ;;  %6583 = vst [vmem:[#allocation35_spill] sm:$0xff] %v4402_v41  ;;  %v331_v59 = vld [vmem:[%s4120_s10 + $0xf8] sm:$0xff] }
  0xbb   : > { %1258 = vmatmul.f32.gmra.mxu0 %v1257_v2  ;;  %v6329_v2 = vand.u32 4294901760, %v4394_v35 }
  0xbc   : > { %454 = vperm.xlu0 %3926, %v329_v3   ;;  %457 = vperm.xlu2 %3928, %v330_v5   ;;  %v1130_v3 = vsel %vm818_vm1, %v4397_v24, 0  ;;  %v1034_v5 = vsel %vm818_vm1, %v4402_v41, 0 }
  0xbd   : > { %556 = vperm.xlu1 %3927, %v363_v14   ;;  %v4420_v14 = vsub.f32 %v1130_v3, %v1130_v3  ;;  %v1272_v18 = vsub.f32 %v4394_v35, %v6329_v2  ;;  %v4425_v22 = vsub.f32 %v1034_v5, %v1034_v5  ;;  %v1040_v2 = vsel %vm818_vm1, %v4467_v54, 0 }
  0xbe   : > { %v392_v36 = vpop.permute.xlu0 %391  ;;  %v4399_v40 = vpop.permute.xlu2 %508  ;;  %v4491_v38 = vsub.f32 %v1040_v2, %v1040_v2 }
  0xbf   : > { %v494_v42 = vpop.permute.xlu1 %493  ;;  %vm566_vm3 = vcmp.eq.s32.totalorder %v392_v36, %v4171_v53  ;;  %6584 = vst [vmem:[#allocation36_spill] sm:$0xff] %v4420_v14  ;;  %v6326_v3 = vand.u32 4294901760, %v4420_v14  ;;  %v1273_v46 = vand.u32 4294901760, %v1272_v18  ;;  %v6328_v5 = vand.u32 4294901760, %v4425_v22 }
  0xc0   : > { %6585 = vst [vmem:[#allocation37_spill] sm:$0xff] %v4425_v22  ;;  %v4435_v36 = vsel %vm566_vm3, 1.0, %v6350_v57  ;;  %v4454_v18 = vsub.f32 %v1133_v61, %v1133_v61  ;;  %vm600_vm6 = vcmp.eq.s32.totalorder %v494_v42, %v4171_v53  ;;  %vm605_vm0 = vcmp.eq.s32.totalorder %v4399_v40, %v4171_v53 }
  0xc1   : > { %3710 = vmatmul.msk.f32.gmra.mxu3 %vm818_vm1, %v4364_v12  ;;  %6587 = vst [vmem:[#allocation39_spill] sm:$0xff] %v4435_v36  ;;  %v1037_v31 = vsel %vm818_vm1, %v4435_v36, 0 }
  0xc2   : > { %3678 = vmatmul.msk.f32.gmra.mxu1 %vm818_vm1, %v4369_v55  ;;  %1522 = vmatmul.f32.gmra.mxu2 %v1521_v43  ;;  %6588 = vst [vmem:[#allocation40_spill] sm:$0xff] %v4454_v18  ;;  %v4459_v63 = vsub.f32 %v1037_v31, %v1037_v31  ;;  %v6333_v61 = vand.u32 4294901760, %v4454_v18 }
  0xc3   : > { %1266 = vmatmul.f32.gmra.mxu0 %v1265_v56  ;;  %6593 = vst [vmem:[#allocation45_spill] sm:$0xff] %v4491_v38 }
  0xc4   : > { %460 = vperm.xlu0 %3926, %v331_v59   ;;  %v1529_v59 = vand.u32 4294901760, %v1528_v13  ;;  %v1536_v13 = vsub.f32 %v4420_v14, %v6326_v3  ;;  %6589 = vst [vmem:[#allocation41_spill] sm:$0xff] %v4459_v63  ;;  %v6334_v31 = vand.u32 4294901760, %v4459_v63 }
  0xc6   : > { %v4430_v48 = vpop.permute.xlu0 %496  ;;  %v4432_v43 = vpop.permute.xlu2 %412  ;;  %v1537_v3 = vand.u32 4294901760, %v1536_v13  ;;  %v1544_v13 = vsub.f32 %v4454_v18, %v6333_v61  ;;  %v1288_v11 = vsub.f32 %v4459_v63, %v6334_v31  ;;  %v6343_v31 = vand.u32 4294901760, %v4491_v38 }
  0xc7   : > { %v398_v56 = vpop.permute.xlu1 %397  ;;  %vm601_vm8 = vcmp.eq.s32.totalorder %v4430_v48, %v4171_v53  ;;  %v4533_v48 = vld [vmem:[#allocation2] ss:$0 sm:$0xff]  ;;  %vm573_vm2 = vcmp.eq.s32.totalorder %v4432_v43, %v4171_v53 }
  0xc8   : > { %vm568_vm7 = vcmp.eq.s32.totalorder %v398_v56, %v4171_v53  ;;  %v1289_v2 = vand.u32 4294901760, %v1288_v11  ;;  %v1296_v10 = vsub.f32 %v4491_v38, %v6343_v31  ;;  %v4529_v18 = vsel %vm601_vm8, 1.0, %v6350_v57 }
  0xc9   : > { %3711 = vmatmul.msk.f32.gmra.mxu3 %vm818_vm1, %v4397_v24  ;;  %6598 = vst [vmem:[#allocation50_spill] sm:$0xff] %v4529_v18  ;;  %v1142_v27 = vsel %vm818_vm1, %v4529_v18, 0 }
  0xca   : > { %3679 = vmatmul.msk.f32.gmra.mxu1 %vm818_vm1, %v4402_v41  ;;  %1530 = vmatmul.f32.gmra.mxu2 %v1529_v59  ;;  %v1280_v59 = vsub.f32 %v4425_v22, %v6328_v5  ;;  %v1136_v5 = vsel %vm818_vm1, %v4462_v39, 0 }
  0xcb   : > { %1274 = vmatmul.f32.gmra.mxu0 %v1273_v46 }
  0xcc   : > { %v1281_v9 = vand.u32 4294901760, %v1280_v59  ;;  %v4486_v59 = vsub.f32 %v1136_v5, %v1136_v5  ;;  %v1545_v5 = vand.u32 4294901760, %v1544_v13 }
  0xce   : > { %v401_v32 = vpop.permute.xlu0 %400  ;;  %v4464_v46 = vpop.permute.xlu2 %517  ;;  %6592 = vst [vmem:[#allocation44_spill] sm:$0xff] %v4486_v59  ;;  %v6342_v61 = vand.u32 4294901760, %v4486_v59 }
  0xcf   : > { %v4469_v28 = vpop.permute.xlu1 %502  ;;  %vm569_vm9 = vcmp.eq.s32.totalorder %v401_v32, %v4171_v53 }
  0xd0   : > { %v1552_v11 = vsub.f32 %v4486_v59, %v6342_v61  ;;  %v4536_v32 = vsel %vm569_vm9, 1.0, %v6350_v57  ;;  %v755_v61 = vmul.f32 %v4533_v48, %v4178_v58  ;;  %vm603_vm12 = vcmp.eq.s32.totalorder %v4469_v28, %v4171_v53 }
  0xd1   : > { %3712 = vmatmul.msk.f32.gmra.mxu3 %vm818_vm1, %v4428_v33  ;;  %6599 = vst [vmem:[#allocation51_spill] sm:$0xff] %v4536_v32  ;;  %vm608_vm9 = vcmp.eq.s32.totalorder %v4464_v46, %v4171_v53 }
  0xd2   : > { %3680 = vmatmul.msk.f32.gmra.mxu1 %vm818_vm1, %v4435_v36  ;;  %1538 = vmatmul.f32.gmra.mxu2 %v1537_v3  ;;  %v4494_v3 = vsel %vm600_vm6, 1.0, %v6350_v57 }
  0xd3   : > { %1282 = vmatmul.f32.gmra.mxu0 %v1281_v9  ;;  %6594 = vst [vmem:[#allocation46_spill] sm:$0xff] %v4494_v3  ;;  %v4499_v9 = vsel %vm568_vm7, 1.0, %v6350_v57  ;;  %v1139_v47 = vsel %vm818_vm1, %v4494_v3, 0  ;;  %v1046_v57 = vsel %vm818_vm1, %v4536_v32, 0 }
  0xd4   : > { %6595 = vst [vmem:[#allocation47_spill] sm:$0xff] %v4499_v9  ;;  %v1043_v16 = vsel %vm818_vm1, %v4499_v9, 0  ;;  %v4521_v13 = vsub.f32 %v1139_v47, %v1139_v47  ;;  %v1553_v47 = vand.u32 4294901760, %v1552_v11  ;;  %v754_v11 = vmul.f32 %v4533_v48, %v4190_v0 }
  0xd5   : > { %v4569_v29 = vsub.f32 %v1046_v57, %v1046_v57 }
  0xd6   : > { %v4496_v4 = vpop.permute.xlu0 %505  ;;  %v4503_v56 = vpop.permute.xlu2 %421  ;;  %6596 = vst [vmem:[#allocation48_spill] sm:$0xff] %v4521_v13  ;;  %v6360_v31 = vand.u32 4294901760, %v4521_v13  ;;  %v819_v52 = vsel %vm818_vm1, %v754_v11, 0.0 }
  0xd7   : > { %v4501_v42 = vpop.permute.xlu1 %406  ;;  %6602 = vst [vmem:[#allocation53_spill] sm:$0xff] %v4569_v29  ;;  %v6608_v63 = vand.u32 4294901760, %v4569_v29  ;;  %vm604_vm14 = vcmp.eq.s32.totalorder %v4496_v4, %v4171_v53  ;;  %vm576_vm6 = vcmp.eq.s32.totalorder %v4503_v56, %v4171_v53 }
  0xd8   : > { %v1560_v59 = vsub.f32 %v4521_v13, %v6360_v31  ;;  %v757_v31 = vmul.f32 %v4533_v48, %v4260_v34  ;;  %v756_v13 = vmul.f32 %v4533_v48, %v4264_v37  ;;  %vm571_vm13 = vcmp.eq.s32.totalorder %v4501_v42, %v4171_v53 }
  0xd9   : > { %3713 = vmatmul.msk.f32.gmra.mxu3 %vm818_vm1, %v4462_v39  ;;  %v1312_v28 = vsub.f32 %v4569_v29, %v6608_v63  ;;  %v4617_v42 = vsel %vm603_vm12, 1.0, %v6603_v23  ;;  %v759_v63 = vmul.f32 %v4533_v48, %v4334_v26 }
  0xda   : > { %3681 = vmatmul.msk.f32.gmra.mxu1 %vm818_vm1, %v4467_v54  ;;  %1546 = vmatmul.f32.gmra.mxu2 %v1545_v5  ;;  %v4526_v5 = vsub.f32 %v1043_v16, %v1043_v16  ;;  %v1297_v16 = vand.u32 4294901760, %v1296_v10  ;;  %v822_v10 = vsel %vm818_vm1, %v755_v61, 0.0  ;;  %v4578_v61 = vsel %vm570_vm11, 1.0, %v6603_v23  ;;  %6610 = vst [vmem:[#allocation58_spill] sm:$0xff] %v4617_v42 }
  0xdb   : > { %1290 = vmatmul.f32.gmra.mxu0 %v1289_v2  ;;  %6605 = vst [vmem:[#allocation55_spill] sm:$0xff] %v4578_v61  ;;  %v1049_v57 = vsel %vm818_vm1, %v4578_v61, 0  ;;  %v828_v11 = vsel %vm818_vm1, %v757_v31, 0.0  ;;  %v825_v38 = vsel %vm818_vm1, %v756_v13, 0.0 }
  0xdc   : > { %6597 = vst [vmem:[#allocation49_spill] sm:$0xff] %v4526_v5  ;;  %v6601_v15 = vand.u32 4294901760, %v4526_v5 }
  0xde   : > { %v4531_v14 = vpop.permute.xlu0 %409  ;;  %v4548_v44 = vpop.permute.xlu2 %526  ;;  %v1304_v49 = vsub.f32 %v4526_v5, %v6601_v15 }
  0xdf   : > { %v4538_v2 = vpop.permute.xlu1 %511  ;;  %vm572_vm15 = vcmp.eq.s32.totalorder %v4531_v14, %v4171_v53 }
  0xe0   : > { %v1305_v15 = vand.u32 4294901760, %v1304_v49  ;;  %vm606_vm3 = vcmp.eq.s32.totalorder %v4538_v2, %v4171_v53 }
  0xe1   : > { %3714 = vmatmul.msk.f32.gmra.mxu3 %vm818_vm1, %v4494_v3 }
  0xe2   : > { %3682 = vmatmul.msk.f32.gmra.mxu1 %vm818_vm1, %v4499_v9  ;;  %1554 = vmatmul.f32.gmra.mxu2 %v1553_v47  ;;  %v4564_v47 = vsub.f32 %v1142_v27, %v1142_v27 }
  0xe3   : > { %1298 = vmatmul.f32.gmra.mxu0 %v1297_v16  ;;  %v4572_v16 = vsel %vm602_vm10, 1.0, %v6603_v23 }
  0xe4   : > { %6600 = vst [vmem:[#allocation52_spill] sm:$0xff] %v4564_v47  ;;  %v6606_v6 = vand.u32 4294901760, %v4564_v47 }
  0xe5   : > { %823 = vadd.xlane.f32.xlu2 %v822_v10  ;;  %6604 = vst [vmem:[#allocation54_spill] sm:$0xff] %v4572_v16  ;;  %v1561_v10 = vand.u32 4294901760, %v1560_v59  ;;  %v758_v59 = vmul.f32 %v4533_v48, %v4302_v1 }
  0xe6   : > { %v4574_v25 = vpop.permute.xlu0 %514  ;;  %v4602_v49 = vpop.permute.xlu2 %430 }
  0xe7   : > { %820 = vadd.xlane.f32.xlu1 %v819_v52  ;;  %v4580_v27 = vpop.permute.xlu1 %415  ;;  %v1145_v52 = vsel %vm818_vm1, %v4572_v16, 0  ;;  %v831_v22 = vsel %vm818_vm1, %v758_v59, 0.0  ;;  %vm607_vm7 = vcmp.eq.s32.totalorder %v4574_v25, %v4171_v53  ;;  %vm579_vm11 = vcmp.eq.s32.totalorder %v4602_v49, %v4171_v53 }
  0xe8   : > { %v4608_v5 = vsub.f32 %v1145_v52, %v1145_v52  ;;  %v760_v52 = vmul.f32 %v4533_v48, %v4369_v55  ;;  %vm574_vm4 = vcmp.eq.s32.totalorder %v4580_v27, %v4171_v53 }
  0xe9   : > { %3715 = vmatmul.msk.f32.gmra.mxu3 %vm818_vm1, %v4529_v18 }
  0xea   : > { %3683 = vmatmul.msk.f32.gmra.mxu1 %vm818_vm1, %v4536_v32  ;;  %1562 = vmatmul.f32.gmra.mxu2 %v1561_v10  ;;  %v1568_v10 = vsub.f32 %v4564_v47, %v6606_v6  ;;  %6607 = vst [vmem:[#allocation56_spill] sm:$0xff] %v4608_v5  ;;  %v4623_v6 = vsel %vm571_vm13, 1.0, %v6603_v23  ;;  %v6612_v59 = vand.u32 4294901760, %v4608_v5  ;;  %v837_v29 = vsel %vm818_vm1, %v760_v52, 0.0 }
  0xeb   : > { %1306 = vmatmul.f32.gmra.mxu0 %v1305_v15  ;;  %v4614_v15 = vsub.f32 %v1049_v57, %v1049_v57  ;;  %6611 = vst [vmem:[#allocation59_spill] sm:$0xff] %v4623_v6  ;;  %v1052_v57 = vsel %vm818_vm1, %v4623_v6, 0 }
  0xec   : > { %v1569_v13 = vand.u32 4294901760, %v1568_v10  ;;  %v761_v10 = vmul.f32 %v4533_v48, %v4402_v41  ;;  %v1576_v47 = vsub.f32 %v4608_v5, %v6612_v59  ;;  %v4657_v4 = vsub.f32 %v1052_v57, %v1052_v57 }
  0xed   : > { %829 = vadd.xlane.f32.xlu2 %v828_v11  ;;  %6609 = vst [vmem:[#allocation57_spill] sm:$0xff] %v4614_v15  ;;  %v6614_v41 = vand.u32 4294901760, %v4614_v15 }
  0xee   : > { %826 = vadd.xlane.f32.xlu0 %v825_v38  ;;  %v4619_v31 = vpop.permute.xlu0 %418  ;;  %v1313_v38 = vand.u32 4294901760, %v1312_v28  ;;  %v834_v28 = vsel %vm818_vm1, %v759_v63, 0.0  ;;  %6615 = vst [vmem:[#allocation61_spill] sm:$0xff] %v4657_v4  ;;  %v4662_v14 = vpop.permute.xlu2 %535  ;;  %v840_v59 = vsel %vm818_vm1, %v761_v10, 0.0 }
  0xef   : > { %832 = vadd.xlane.f32.xlu1 %v831_v22  ;;  %v4625_v11 = vpop.permute.xlu1 %520  ;;  %v1148_v22 = vsel %vm818_vm1, %v4617_v42, 0  ;;  %v1320_v55 = vsub.f32 %v4614_v15, %v6614_v41  ;;  %v762_v41 = vmul.f32 %v4533_v48, %v4435_v36  ;;  %vm575_vm5 = vcmp.eq.s32.totalorder %v4619_v31, %v4171_v53 }
  0xf1   : > { %3716 = vmatmul.msk.f32.gmra.mxu3 %vm818_vm1, %v4572_v16  ;;  %v1321_v5 = vand.u32 4294901760, %v1320_v55  ;;  %v843_v55 = vsel %vm818_vm1, %v762_v41, 0.0 }
  0xf2   : > { %3684 = vmatmul.msk.f32.gmra.mxu1 %vm818_vm1, %v4578_v61  ;;  %1570 = vmatmul.f32.gmra.mxu2 %v1569_v13  ;;  %v4651_v13 = vsub.f32 %v1148_v22, %v1148_v22  ;;  %v4668_v22 = vsel %vm572_vm15, 1.0, %v6603_v23 }
  0xf3   : > { %1314 = vmatmul.f32.gmra.mxu0 %v1313_v38  ;;  %v4660_v38 = vsel %vm604_vm14, 1.0, %v6603_v23  ;;  %6617 = vst [vmem:[#allocation63_spill] sm:$0xff] %v4668_v22  ;;  %v1055_v57 = vsel %vm818_vm1, %v4668_v22, 0  ;;  %vm609_vm14 = vcmp.eq.s32.totalorder %v4625_v11, %v4171_v53 }
  0xf4   : > { %6613 = vst [vmem:[#allocation60_spill] sm:$0xff] %v4651_v13  ;;  %v6618_v10 = vand.u32 4294901760, %v4651_v13  ;;  %v4702_v40 = vsub.f32 %v1055_v57, %v1055_v57  ;;  %v4913_v20 = vsel %vm609_vm14, 1.0, %v6603_v23 }
  0xf5   : > { %835 = vadd.xlane.f32.xlu2 %v834_v28  ;;  %6616 = vst [vmem:[#allocation62_spill] sm:$0xff] %v4660_v38  ;;  %v1577_v28 = vand.u32 4294901760, %v1576_v47  ;;  %v764_v47 = vmul.f32 %v4533_v48, %v4499_v9 }
  0xf6   : > { %v4664_v63 = vpop.permute.xlu0 %523  ;;  %838 = vadd.xlane.f32.xlu0 %v837_v29  ;;  %v763_v29 = vmul.f32 %v4533_v48, %v4467_v54  ;;  %v1584_v15 = vsub.f32 %v4651_v13, %v6618_v10  ;;  %v6620_v54 = vand.u32 4294901760, %v4657_v4  ;;  %6621 = vst [vmem:[#allocation65_spill] sm:$0xff] %v4702_v40  ;;  %v4711_v10 = vsel %vm573_vm2, 1.0, %v6603_v23 }
  0xf7   : > { %841 = vadd.xlane.f32.xlu1 %v840_v59  ;;  %v4670_v52 = vpop.permute.xlu1 %424  ;;  %v1151_v59 = vsel %vm818_vm1, %v4660_v38, 0  ;;  %v849_v41 = vsel %vm818_vm1, %v764_v47, 0.0  ;;  %6623 = vst [vmem:[#allocation67_spill] sm:$0xff] %v4711_v10  ;;  %v766_v47 = vmul.f32 %v4533_v48, %v4578_v61  ;;  %v1058_v57 = vsel %vm818_vm1, %v4711_v10, 0 }
  0xf8   : > { %v846_v9 = vsel %vm818_vm1, %v763_v29, 0.0  ;;  %v1328_v36 = vsub.f32 %v4657_v4, %v6620_v54  ;;  %v4715_v29 = vpop.permute.xlu2 %439  ;;  %v765_v54 = vmul.f32 %v4533_v48, %v4536_v32  ;;  %v6626_v61 = vand.u32 4294901760, %v4702_v40  ;;  %6650 = vst [vmem:[#allocation87_spill] sm:$0xff] %v4913_v20 }
  0xf9   : > { %3717 = vmatmul.msk.f32.gmra.mxu3 %vm818_vm1, %v4617_v42  ;;  %v4747_v2 = vsub.f32 %v1058_v57, %v1058_v57  ;;  %vm577_vm8 = vcmp.eq.s32.totalorder %v4670_v52, %v4171_v53  ;;  %v4802_v52 = vsel %vm576_vm6, 1.0, %v6603_v23  ;;  %vm582_vm15 = vcmp.eq.s32.totalorder %v4715_v29, %v4171_v53 }
  0xfa   : > { %3685 = vmatmul.msk.f32.gmra.mxu1 %vm818_vm1, %v4623_v6  ;;  %1578 = vmatmul.f32.gmra.mxu2 %v1577_v28  ;;  %v4696_v28 = vsub.f32 %v1151_v59, %v1151_v59  ;;  %v1336_v32 = vsub.f32 %v4702_v40, %v6626_v61  ;;  %v768_v61 = vmul.f32 %v4533_v48, %v4668_v22 }
  0xfb   : > { %1322 = vmatmul.f32.gmra.mxu0 %v1321_v5  ;;  %v4705_v5 = vsel %vm605_vm0, 1.0, %v6603_v23  ;;  %6627 = vst [vmem:[#allocation69_spill] sm:$0xff] %v4747_v2  ;;  %v6633_v25 = vand.u32 4294901760, %v4747_v2  ;;  %vm611_vm6 = vcmp.eq.s32.totalorder %v4548_v44, %v4171_v53 }
  0xfc   : > { %6619 = vst [vmem:[#allocation64_spill] sm:$0xff] %v4696_v28  ;;  %v6624_v13 = vand.u32 4294901760, %v4696_v28  ;;  %v861_v31 = vsel %vm818_vm1, %v768_v61, 0.0  ;;  %v4805_v61 = vsel %vm607_vm7, 1.0, %v6603_v23 }
  0xfd   : > { %844 = vadd.xlane.f32.xlu2 %v843_v55  ;;  %6622 = vst [vmem:[#allocation66_spill] sm:$0xff] %v4705_v5  ;;  %v1585_v55 = vand.u32 4294901760, %v1584_v15  ;;  %v767_v15 = vmul.f32 %v4533_v48, %v4623_v6  ;;  %v855_v6 = vsel %vm818_vm1, %v766_v47, 0.0 }
  0xfe   : > { %v4707_v43 = vpop.permute.xlu0 %427  ;;  %847 = vadd.xlane.f32.xlu0 %v846_v9  ;;  %v1329_v9 = vand.u32 4294901760, %v1328_v36  ;;  %v852_v36 = vsel %vm818_vm1, %v765_v54, 0.0  ;;  %v1592_v4 = vsub.f32 %v4696_v28, %v6624_v13  ;;  %v4756_v13 = vsel %vm574_vm4, 1.0, %v6603_v23  ;;  %6635 = vst [vmem:[#allocation75_spill] sm:$0xff] %v4802_v52 }
  0xff   : > { %850 = vadd.xlane.f32.xlu1 %v849_v41  ;;  %v4713_v59 = vpop.permute.xlu1 %529  ;;  %v1154_v41 = vsel %vm818_vm1, %v4705_v5, 0  ;;  %v858_v54 = vsel %vm818_vm1, %v767_v15, 0.0  ;;  %6629 = vst [vmem:[#allocation71_spill] sm:$0xff] %v4756_v13  ;;  %v1061_v57 = vsel %vm818_vm1, %v4756_v13, 0  ;;  %vm578_vm10 = vcmp.eq.s32.totalorder %v4707_v43, %v4171_v53 }
 0x100   : > { %v1593_v47 = vand.u32 4294901760, %v1592_v4  ;;  %v4772_v4 = vpop.permute.xlu2 %544  ;;  %6636 = vst [vmem:[#allocation76_spill] sm:$0xff] %v4805_v61  ;;  %v4853_v35 = vsel %vm578_vm10, 1.0, %v6603_v23 }
 0x101   : > { %3718 = vmatmul.msk.f32.gmra.mxu3 %vm818_vm1, %v4660_v38  ;;  %6641 = vst [vmem:[#allocation81_spill] sm:$0xff] %v4853_v35 }
 0x102   : > { %3686 = vmatmul.msk.f32.gmra.mxu1 %vm818_vm1, %v4668_v22  ;;  %1586 = vmatmul.f32.gmra.mxu2 %v1585_v55  ;;  %v4741_v55 = vsub.f32 %v1154_v41, %v1154_v41  ;;  %v4799_v22 = vsub.f32 %v1061_v57, %v1061_v57 }
 0x103   : > { %1330 = vmatmul.f32.gmra.mxu0 %v1329_v9  ;;  %v4750_v9 = vsel %vm606_vm3, 1.0, %v6603_v23  ;;  %vm610_vm3 = vcmp.eq.s32.totalorder %v4664_v63, %v4171_v53 }
 0x104   : > { %6625 = vst [vmem:[#allocation68_spill] sm:$0xff] %v4741_v55 }
 0x105   : > { %853 = vadd.xlane.f32.xlu2 %v852_v36  ;;  %6628 = vst [vmem:[#allocation70_spill] sm:$0xff] %v4750_v9  ;;  %v1337_v36 = vand.u32 4294901760, %v1336_v32  ;;  %v770_v32 = vmul.f32 %v4533_v48, %v4756_v13 }
 0x106   : > { %v4752_v27 = vpop.permute.xlu0 %532  ;;  %856 = vadd.xlane.f32.xlu0 %v855_v6  ;;  %v769_v6 = vmul.f32 %v4533_v48, %v4711_v10  ;;  %6634 = vst [vmem:[#allocation74_spill] sm:$0xff] %v4799_v22 }
 0x107   : > { %859 = vadd.xlane.f32.xlu1 %v858_v54  ;;  %v4758_v41 = vpop.permute.xlu1 %433  ;;  %v1157_v54 = vsel %vm818_vm1, %v4750_v9, 0 }
 0x108   : > { %v4790_v28 = vsub.f32 %v1157_v54, %v1157_v54  ;;  %v864_v56 = vsel %vm818_vm1, %v769_v6, 0.0  ;;  %vm580_vm12 = vcmp.eq.s32.totalorder %v4758_v41, %v4171_v53 }
 0x109   : > { %3719 = vmatmul.msk.f32.gmra.mxu3 %vm818_vm1, %v4705_v5 }
 0x10a   : > { %3687 = vmatmul.msk.f32.gmra.mxu1 %vm818_vm1, %v4711_v10  ;;  %1594 = vmatmul.f32.gmra.mxu2 %v1593_v47  ;;  %v6630_v47 = vand.u32 4294901760, %v4741_v55  ;;  %6631 = vst [vmem:[#allocation72_spill] sm:$0xff] %v4790_v28  ;;  %v4793_v10 = vsel %vm575_vm5, 1.0, %v6603_v23 }
 0x10b   : > { %1338 = vmatmul.f32.gmra.mxu0 %v1337_v36  ;;  %6632 = vst [vmem:[#allocation73_spill] sm:$0xff] %v4793_v10  ;;  %v1344_v36 = vsub.f32 %v4747_v2, %v6633_v25  ;;  %v6421_v2 = vand.u32 4294901760, %v4790_v28 }
 0x10c   : > { %v1600_v15 = vsub.f32 %v4741_v55, %v6630_v47  ;;  %v867_v47 = vsel %vm818_vm1, %v770_v32, 0.0  ;;  %v771_v55 = vmul.f32 %v4533_v48, %v4793_v10 }
 0x10d   : > { %862 = vadd.xlane.f32.xlu2 %v861_v31  ;;  %v4811_v31 = vsel %vm577_vm8, 1.0, %v6603_v23  ;;  %v1345_v32 = vand.u32 4294901760, %v1344_v36  ;;  %v4838_v36 = vsel %vm608_vm9, 1.0, %v6603_v23  ;;  %vm612_vm9 = vcmp.eq.s32.totalorder %v4713_v59, %v4171_v53 }
 0x10e   : > { %v4807_v54 = vpop.permute.xlu0 %436  ;;  %865 = vadd.xlane.f32.xlu0 %v864_v56  ;;  %6637 = vst [vmem:[#allocation77_spill] sm:$0xff] %v4811_v31  ;;  %v1601_v57 = vand.u32 4294901760, %v1600_v15  ;;  %v772_v56 = vmul.f32 %v4533_v48, %v4802_v52  ;;  %v773_v46 = vmul.f32 %v4533_v48, %v4811_v31  ;;  %v1064_v15 = vsel %vm818_vm1, %v4793_v10, 0 }
 0x10f   : > { %v4813_v6 = vpop.f32.mrf.mxu1  ;;  %868 = vadd.xlane.f32.xlu1 %v867_v47  ;;  %v4815_v25 = vpop.permute.xlu1 %538  ;;  %6639 = vst [vmem:[#allocation79_spill] sm:$0xff] %v4838_v36  ;;  %v4859_v41 = vsub.f32 %v1064_v15, %v1064_v15  ;;  %v774_v15 = vmul.f32 %v4533_v48, %v4853_v35  ;;  %vm581_vm13 = vcmp.eq.s32.totalorder %v4807_v54, %v4171_v53  ;;  %v5066_v59 = vsel %vm612_vm9, 1.0, %v6603_v23 }
 0x110   : > { %6638 = vst [vmem:[#allocation78_spill] sm:$0xff] %v4813_v6  ;;  %v1160_v6 = vsel %vm818_vm1, %v4805_v61, 0  ;;  %v4842_v47 = vpop.permute.xlu2 %448  ;;  %v873_v49 = vsel %vm818_vm1, %v772_v56, 0.0  ;;  %v4906_v1 = vsel %vm581_vm13, 1.0, %v6603_v23  ;;  %vm615_vm13 = vcmp.eq.s32.totalorder %v4815_v25, %v4171_v53 }
 0x111   : > { %3720 = vmatmul.msk.f32.gmra.mxu3 %vm818_vm1, %v4750_v9  ;;  %v4850_v40 = vsub.f32 %v1160_v6, %v1160_v6  ;;  %6643 = vst [vmem:[#allocation82_spill] sm:$0xff] %v4859_v41  ;;  %v876_v6 = vsel %vm818_vm1, %v773_v46, 0.0  ;;  %v879_v54 = vsel %vm818_vm1, %v774_v15, 0.0  ;;  %v4916_v15 = vsel %vm582_vm15, 1.0, %v6603_v23 }
 0x112   : > { %3688 = vmatmul.msk.f32.gmra.mxu1 %vm818_vm1, %v4756_v13  ;;  %1602 = vmatmul.f32.gmra.mxu2 %v1601_v57  ;;  %v870_v57 = vsel %vm818_vm1, %v771_v55, 0.0  ;;  %v1608_v13 = vsub.f32 %v4790_v28, %v6421_v2  ;;  %v4862_v55 = vsel %vm579_vm11, 1.0, %v6603_v23  ;;  %v4868_v2 = vsel %vm580_vm12, 1.0, %v6603_v23  ;;  %6670 = vst [vmem:[#allocation103_spill] sm:$0xff] %v5066_v59 }
 0x113   : > { %1346 = vmatmul.f32.gmra.mxu0 %v1345_v32  ;;  %6640 = vst [vmem:[#allocation80_spill] sm:$0xff] %v4850_v40  ;;  %v6642_v32 = vand.u32 4294901760, %v4799_v22  ;;  %vm585_vm4 = vcmp.eq.s32.totalorder %v4842_v47, %v4171_v53  ;;  %vm613_vm11 = vcmp.eq.s32.totalorder %v4752_v27, %v4171_v53  ;;  %vm614_vm12 = vcmp.eq.s32.totalorder %v4662_v14, %v4171_v53 }
 0x114   : > { %v1885_v43 = vpop.f32.mrf.mxu3  ;;  %vm617_vm15 = vcmp.eq.s32.totalorder %v4772_v4, %v4171_v53 }
 0x115   : > { %871 = vadd.xlane.f32.xlu2 %v870_v57  ;;  %v1352_v26 = vsub.f32 %v4799_v22, %v6642_v32  ;;  %v1609_v32 = vand.u32 4294901760, %v1608_v13  ;;  %v1067_v13 = vsel %vm818_vm1, %v4802_v52, 0  ;;  %v776_v22 = vmul.f32 %v4533_v48, %v4868_v2 }
 0x116   : > { %v4864_v60 = vpop.permute.xlu0 %541  ;;  %874 = vadd.xlane.f32.xlu0 %v873_v49  ;;  %v1163_v49 = vsel %vm818_vm1, %v4838_v36, 0 }
 0x117   : > { %v4870_v57 = vpop.f32.mrf.mxu1  ;;  %877 = vadd.xlane.f32.xlu1 %v876_v6  ;;  %v443_v56 = vpop.permute.xlu1 %442  ;;  %v1353_v46 = vand.u32 4294901760, %v1352_v26  ;;  %v4896_v26 = vsub.f32 %v1163_v49, %v1163_v49  ;;  %v6649_v49 = vand.u32 4294901760, %v4859_v41  ;;  %vm616_vm14 = vcmp.eq.s32.totalorder %v4864_v60, %v4171_v53 }
 0x118   : > { %6644 = vst [vmem:[#allocation83_spill] sm:$0xff] %v4870_v57  ;;  %v4872_v28 = vpop.f32.mrf.mxu0  ;;  %v775_v57 = vmul.f32 %v4533_v48, %v4862_v55  ;;  %vm583_vm0 = vcmp.eq.s32.totalorder %v443_v56, %v4171_v53 }
 0x119   : > { %6645 = vst [vmem:[#allocation84_spill] sm:$0xff] %v4872_v28  ;;  %3721 = vmatmul.msk.f32.gmra.mxu3 %vm818_vm1, %v4805_v61  ;;  %v6647_v28 = vand.u32 4294901760, %v4850_v40  ;;  %v6442_v34 = vand.u32 4294901760, %v4896_v26 }
 0x11a   : > { %3689 = vmatmul.msk.f32.gmra.mxu1 %vm818_vm1, %v4793_v10  ;;  %1610 = vmatmul.f32.gmra.mxu2 %v1609_v32  ;;  %6646 = vst [vmem:[#allocation85_spill] sm:$0xff] %v4896_v26  ;;  %v4903_v10 = vsub.f32 %v1067_v13, %v1067_v13  ;;  %v882_v29 = vsel %vm818_vm1, %v775_v57, 0.0  ;;  %v4926_v57 = vsel %vm583_vm0, 1.0, %v6603_v23 }
 0x11b   : > { %1354 = vmatmul.f32.gmra.mxu0 %v1353_v46  ;;  %v1616_v32 = vsub.f32 %v4850_v40, %v6647_v28  ;;  %v1360_v46 = vsub.f32 %v4859_v41, %v6649_v49  ;;  %v4918_v28 = vpop.permute.xlu2 %553 }
 0x11c   : > { %v1889_v6 = vpop.f32.mrf.mxu3  ;;  %6648 = vst [vmem:[#allocation86_spill] sm:$0xff] %v4903_v10 }
 0x11d   : > { %v1483_v11 = vpop.f32.mrf.mxu2  ;;  %880 = vadd.xlane.f32.xlu2 %v879_v54  ;;  %v885_v54 = vsel %vm818_vm1, %v776_v22, 0.0  ;;  %v1361_v56 = vand.u32 4294901760, %v1360_v46  ;;  %v1070_v22 = vsel %vm818_vm1, %v4811_v31, 0 }
 0x11e   : > { %v4920_v13 = vadd.f32 %v1885_v43, %v1483_v11  ;;  %v446_v40 = vpop.permute.xlu0 %445  ;;  %883 = vadd.xlane.f32.xlu0 %v882_v29  ;;  %v1617_v43 = vand.u32 4294901760, %v1616_v32  ;;  %v777_v11 = vmul.f32 %v4533_v48, %v4906_v1  ;;  %v778_v29 = vmul.f32 %v4533_v48, %v4916_v15 }
 0x11f   : > { %v4928_v49 = vpop.f32.mrf.mxu1  ;;  %886 = vadd.xlane.f32.xlu1 %v885_v54  ;;  %v4930_v41 = vpop.permute.xlu1 %547  ;;  %v1166_v54 = vsel %vm818_vm1, %v4913_v20, 0  ;;  %vm584_vm2 = vcmp.eq.s32.totalorder %v446_v40, %v4171_v53  ;;  %v779_v32 = vmul.f32 %v4533_v48, %v4926_v57  ;;  %v1624_v40 = vsub.f32 %v4896_v26, %v6442_v34 }
 0x120   : > { %6651 = vst [vmem:[#allocation88_spill] sm:$0xff] %v4920_v13  ;;  %v4933_v50 = vpop.f32.mrf.mxu0  ;;  %v6654_v13 = vand.u32 4294901760, %v4903_v10  ;;  %v891_v47 = vsel %vm818_vm1, %v778_v29, 0.0  ;;  %v4971_v34 = vsel %vm610_vm3, 1.0, %v6603_v23  ;;  %vm618_vm0 = vcmp.eq.s32.totalorder %v4930_v41, %v4171_v53 }
 0x121   : > { %6652 = vst [vmem:[#allocation89_spill] sm:$0xff] %v4928_v49  ;;  %3722 = vmatmul.msk.f32.gmra.mxu3 %vm818_vm1, %v4838_v36  ;;  %v1625_v29 = vand.u32 4294901760, %v1624_v40  ;;  %vm620_vm3 = vcmp.eq.s32.totalorder %v4918_v28, %v4171_v53 }
 0x122   : > { %6653 = vst [vmem:[#allocation90_spill] sm:$0xff] %v4933_v50  ;;  %3690 = vmatmul.msk.f32.gmra.mxu1 %vm818_vm1, %v4802_v52  ;;  %1618 = vmatmul.f32.gmra.mxu2 %v1617_v43  ;;  %v888_v43 = vsel %vm818_vm1, %v777_v11, 0.0  ;;  %v1368_v49 = vsub.f32 %v4903_v10, %v6654_v13  ;;  %v4962_v50 = vsub.f32 %v1166_v54, %v1166_v54  ;;  %v4965_v52 = vsel %vm584_vm2, 1.0, %v6603_v23 }
 0x123   : > { %1362 = vmatmul.f32.gmra.mxu0 %v1361_v56  ;;  %v4968_v56 = vsub.f32 %v1070_v22, %v1070_v22  ;;  %6657 = vst [vmem:[#allocation93_spill] sm:$0xff] %v4971_v34  ;;  %v4974_v11 = vsel %vm585_vm4, 1.0, %v6603_v23  ;;  %v894_v54 = vsel %vm818_vm1, %v779_v32, 0.0  ;;  %v458_v22 = vpop.permute.xlu2 %457 }
 0x124   : > { %v1893_v46 = vpop.f32.mrf.mxu3  ;;  %6655 = vst [vmem:[#allocation91_spill] sm:$0xff] %v4962_v50  ;;  %v1369_v45 = vand.u32 4294901760, %v1368_v49  ;;  %v781_v32 = vmul.f32 %v4533_v48, %v4974_v11  ;;  %vm588_vm7 = vcmp.eq.s32.totalorder %v458_v22, %v4171_v53 }
 0x125   : > { %v1491_v63 = vpop.f32.mrf.mxu2  ;;  %889 = vadd.xlane.f32.xlu2 %v888_v43  ;;  %6656 = vst [vmem:[#allocation92_spill] sm:$0xff] %v4968_v56  ;;  %v6664_v58 = vand.u32 4294901760, %v4968_v56 }
 0x126   : > { %v4976_v26 = vadd.f32 %v1889_v6, %v1491_v63  ;;  %v4978_v13 = vpop.permute.xlu0 %550  ;;  %892 = vadd.xlane.f32.xlu0 %v891_v47  ;;  %v780_v6 = vmul.f32 %v4533_v48, %v4965_v52 }
 0x127   : > { %v4981_v10 = vpop.f32.mrf.mxu1  ;;  %895 = vadd.xlane.f32.xlu1 %v894_v54  ;;  %v452_v43 = vpop.permute.xlu1 %451  ;;  %v1169_v54 = vsel %vm818_vm1, %v4971_v34, 0  ;;  %vm619_vm2 = vcmp.eq.s32.totalorder %v4978_v13, %v4171_v53 }
 0x128   : > { %6658 = vst [vmem:[#allocation94_spill] sm:$0xff] %v4976_v26  ;;  %vm586_vm5 = vcmp.eq.s32.totalorder %v452_v43, %v4171_v53  ;;  %v4984_v37 = vpop.f32.mrf.mxu0  ;;  %v1073_v43 = vsel %vm818_vm1, %v4853_v35, 0  ;;  %v897_v63 = vsel %vm818_vm1, %v780_v6, 0.0  ;;  %v6661_v26 = vand.u32 4294901760, %v4962_v50 }
 0x129   : > { %6659 = vst [vmem:[#allocation95_spill] sm:$0xff] %v4981_v10  ;;  %v4990_v47 = vsel %vm586_vm5, 1.0, %v6603_v23  ;;  %3723 = vmatmul.msk.f32.gmra.mxu3 %vm818_vm1, %v4913_v20  ;;  %v5012_v10 = vsub.f32 %v1169_v54, %v1169_v54  ;;  %v5021_v22 = vsub.f32 %v1073_v43, %v1073_v43  ;;  %v5024_v6 = vsel %vm588_vm7, 1.0, %v6603_v23 }
 0x12a   : > { %6660 = vst [vmem:[#allocation96_spill] sm:$0xff] %v4984_v37  ;;  %3691 = vmatmul.msk.f32.gmra.mxu1 %vm818_vm1, %v4811_v31  ;;  %1626 = vmatmul.f32.gmra.mxu2 %v1625_v29  ;;  %v782_v49 = vmul.f32 %v4533_v48, %v4990_v47  ;;  %v1632_v44 = vsub.f32 %v4962_v50, %v6661_v26  ;;  %v5015_v29 = vsel %vm611_vm6, 1.0, %v6603_v23  ;;  %v900_v31 = vsel %vm818_vm1, %v781_v32, 0.0 }
 0x12b   : > { %1370 = vmatmul.f32.gmra.mxu0 %v1369_v45  ;;  %6662 = vst [vmem:[#allocation97_spill] sm:$0xff] %v5012_v10  ;;  %v1376_v45 = vsub.f32 %v4968_v56, %v6664_v58  ;;  %v6463_v50 = vand.u32 4294901760, %v5012_v10 }
 0x12c   : > { %v1897_v40 = vpop.f32.mrf.mxu3  ;;  %6663 = vst [vmem:[#allocation98_spill] sm:$0xff] %v5015_v29  ;;  %v903_v54 = vsel %vm818_vm1, %v782_v49, 0.0  ;;  %v1633_v43 = vand.u32 4294901760, %v1632_v44  ;;  %v784_v49 = vmul.f32 %v4533_v48, %v5024_v6  ;;  %v1076_v44 = vsel %vm818_vm1, %v4862_v55, 0 }
 0x12d   : > { %898 = vadd.xlane.f32.xlu2 %v897_v63  ;;  %v1499_v37 = vpop.f32.mrf.mxu2  ;;  %v5063_v56 = vsub.f32 %v1076_v44, %v1076_v44 }
 0x12e   : > { %v5026_v8 = vadd.f32 %v1893_v46, %v1499_v37  ;;  %v455_v26 = vpop.permute.xlu0 %454  ;;  %901 = vadd.xlane.f32.xlu0 %v900_v31  ;;  %v1172_v37 = vsel %vm818_vm1, %v5015_v29, 0  ;;  %v1377_v31 = vand.u32 4294901760, %v1376_v45 }
 0x12f   : > { %vm587_vm8 = vcmp.eq.s32.totalorder %v455_v26, %v4171_v53  ;;  %v5030_v63 = vpop.f32.mrf.mxu1  ;;  %904 = vadd.xlane.f32.xlu1 %v903_v54 }
 0x130   : > { %6665 = vst [vmem:[#allocation99_spill] sm:$0xff] %v5026_v8  ;;  %v5033_v32 = vsel %vm587_vm8, 1.0, %v6603_v23  ;;  %v5035_v58 = vpop.f32.mrf.mxu0  ;;  %v1640_v8 = vsub.f32 %v5012_v10, %v6463_v50  ;;  %v787_v50 = vmul.f32 %v4533_v48, %v4222_v17 }
 0x131   : > { %6666 = vst [vmem:[#allocation100_spill] sm:$0xff] %v5030_v63  ;;  %3724 = vmatmul.msk.f32.gmra.mxu3 %vm818_vm1, %v4971_v34  ;;  %v783_v46 = vmul.f32 %v4533_v48, %v5033_v32  ;;  %v5057_v63 = vsub.f32 %v1172_v37, %v1172_v37 }
 0x132   : > { %6667 = vst [vmem:[#allocation101_spill] sm:$0xff] %v5035_v58  ;;  %3692 = vmatmul.msk.f32.gmra.mxu1 %vm818_vm1, %v4853_v35  ;;  %1634 = vmatmul.f32.gmra.mxu2 %v1633_v43  ;;  %v909_v43 = vsel %vm818_vm1, %v784_v49, 0.0  ;;  %v6669_v58 = vand.u32 4294901760, %v5021_v22  ;;  %v786_v49 = vmul.f32 %v4533_v48, %v4184_v62  ;;  %v1641_v44 = vand.u32 4294901760, %v1640_v8 }
 0x133   : > { %1378 = vmatmul.f32.gmra.mxu0 %v1377_v31  ;;  %v906_v45 = vsel %vm818_vm1, %v783_v46, 0.0  ;;  %6668 = vst [vmem:[#allocation102_spill] sm:$0xff] %v5057_v63  ;;  %v1079_v8 = vsel %vm818_vm1, %v4868_v2, 0  ;;  %v6674_v10 = vand.u32 4294901760, %v5057_v63 }
 0x134   : > { %v1901_v54 = vpop.f32.mrf.mxu3  ;;  %v1384_v35 = vsub.f32 %v5021_v22, %v6669_v58 }
 0x135   : > { %907 = vadd.xlane.f32.xlu2 %v906_v45  ;;  %v1507_v26 = vpop.f32.mrf.mxu2  ;;  %v1648_v17 = vsub.f32 %v5057_v63, %v6674_v10  ;;  %v788_v10 = vmul.f32 %v4533_v48, %v4226_v19 }
 0x136   : > { %v5068_v31 = vadd.f32 %v1897_v40, %v1507_v26  ;;  %v461_v46 = vpop.permute.xlu0 %460  ;;  %910 = vadd.xlane.f32.xlu0 %v909_v43  ;;  %v1385_v26 = vand.u32 4294901760, %v1384_v35 }
 0x137   : > { %vm589_vm10 = vcmp.eq.s32.totalorder %v461_v46, %v4171_v53  ;;  %v5071_v37 = vpop.f32.mrf.mxu1  ;;  %v915_v46 = vsel %vm818_vm1, %v786_v49, 0.0 }
 0x138   : > { %6671 = vst [vmem:[#allocation104_spill] sm:$0xff] %v5068_v31  ;;  %v5076_v45 = vsel %vm589_vm10, 1.0, %v6603_v23  ;;  %v5078_v58 = vpop.f32.mrf.mxu0  ;;  %v1175_v31 = vsel %vm818_vm1, %v5066_v59, 0 }
 0x139   : > { %6672 = vst [vmem:[#allocation105_spill] sm:$0xff] %v5071_v37  ;;  %3725 = vmatmul.msk.f32.gmra.mxu3 %vm818_vm1, %v5015_v29  ;;  %v785_v43 = vmul.f32 %v4533_v48, %v5076_v45  ;;  %v5101_v62 = vsub.f32 %v1175_v31, %v1175_v31  ;;  %v918_v37 = vsel %vm818_vm1, %v787_v50, 0.0  ;;  %v1649_v50 = vand.u32 4294901760, %v1648_v17 }
 0x13a   : > { %6673 = vst [vmem:[#allocation106_spill] sm:$0xff] %v5078_v58  ;;  %3693 = vmatmul.msk.f32.gmra.mxu1 %vm818_vm1, %v4862_v55  ;;  %1642 = vmatmul.f32.gmra.mxu2 %v1641_v44  ;;  %v6676_v58 = vand.u32 4294901760, %v5063_v56  ;;  %v1082_v17 = vsel %vm818_vm1, %v4906_v1, 0 }
 0x13b   : > { %1386 = vmatmul.f32.gmra.mxu0 %v1385_v26  ;;  %v912_v35 = vsel %vm818_vm1, %v785_v43, 0.0  ;;  %6675 = vst [vmem:[#allocation107_spill] sm:$0xff] %v5101_v62  ;;  %v5107_v26 = vsub.f32 %v1079_v8, %v1079_v8  ;;  %v5110_v43 = vsel %vm613_vm11, 1.0, %v6603_v23 }
 0x13c   : > { %v1905_v40 = vpop.f32.mrf.mxu3  ;;  %913 = vadd.xlane.f32.xlu1 %v912_v35  ;;  %v1392_v27 = vsub.f32 %v5063_v56, %v6676_v58  ;;  %6677 = vst [vmem:[#allocation108_spill] sm:$0xff] %v5110_v43 }
 0x13d   : > { %916 = vadd.xlane.f32.xlu2 %v915_v46  ;;  %v1515_v44 = vpop.f32.mrf.mxu2  ;;  %v789_v46 = vmul.f32 %v4533_v48, %v4252_v30  ;;  %v6681_v19 = vand.u32 4294901760, %v5107_v26 }
 0x13e   : > { %v5112_v49 = vadd.f32 %v1901_v54, %v1515_v44  ;;  %919 = vadd.xlane.f32.xlu0 %v918_v37  ;;  %v1393_v8 = vand.u32 4294901760, %v1392_v27  ;;  %v790_v54 = vmul.f32 %v4533_v48, %v4292_v51  ;;  %v1178_v44 = vsel %vm818_vm1, %v5110_v43, 0 }
 0x13f   : > { %v5114_v35 = vpop.f32.mrf.mxu1  ;;  %v921_v27 = vsel %vm818_vm1, %v788_v10, 0.0  ;;  %v924_v37 = vsel %vm818_vm1, %v789_v46, 0.0  ;;  %v5141_v51 = vsub.f32 %v1178_v44, %v1178_v44  ;;  %v1400_v14 = vsub.f32 %v5107_v26, %v6681_v19 }
 0x140   : > { %6678 = vst [vmem:[#allocation109_spill] sm:$0xff] %v5112_v49  ;;  %v5118_v31 = vpop.f32.mrf.mxu0  ;;  %v6679_v49 = vand.u32 4294901760, %v5101_v62  ;;  %v927_v30 = vsel %vm818_vm1, %v790_v54, 0.0  ;;  %v5150_v10 = vsel %vm614_vm12, 1.0, %v6603_v23  ;;  %v792_v44 = vmul.f32 %v4533_v48, %v4364_v12 }
 0x141   : > { %3726 = vmatmul.msk.f32.gmra.mxu3 %vm818_vm1, %v5066_v59  ;;  %6680 = vst [vmem:[#allocation110_spill] sm:$0xff] %v5141_v51 }
 0x142   : > { %3694 = vmatmul.msk.f32.gmra.mxu1 %vm818_vm1, %v4868_v2  ;;  %1650 = vmatmul.f32.gmra.mxu2 %v1649_v50  ;;  %v1656_v63 = vsub.f32 %v5101_v62, %v6679_v49  ;;  %6682 = vst [vmem:[#allocation111_spill] sm:$0xff] %v5150_v10  ;;  %v791_v49 = vmul.f32 %v4533_v48, %v4328_v21  ;;  %v933_v62 = vsel %vm818_vm1, %v792_v44, 0.0 }
 0x143   : > { %1394 = vmatmul.f32.gmra.mxu0 %v1393_v8  ;;  %v5147_v8 = vsub.f32 %v1082_v17, %v1082_v17  ;;  %v1181_v17 = vsel %vm818_vm1, %v5150_v10, 0 }
 0x144   : > { %v1909_v58 = vpop.f32.mrf.mxu3  ;;  %922 = vadd.xlane.f32.xlu1 %v921_v27  ;;  %v1657_v54 = vand.u32 4294901760, %v1656_v63  ;;  %v1085_v63 = vsel %vm818_vm1, %v4916_v15, 0  ;;  %v930_v19 = vsel %vm818_vm1, %v791_v49, 0.0 }
 0x145   : > { %925 = vadd.xlane.f32.xlu2 %v924_v37  ;;  %v1523_v50 = vpop.f32.mrf.mxu2  ;;  %v5183_v12 = vsub.f32 %v1085_v63, %v1085_v63  ;;  %v6686_v25 = vand.u32 4294901760, %v5147_v8 }
 0x146   : > { %v5152_v46 = vadd.f32 %v1905_v40, %v1523_v50  ;;  %928 = vadd.xlane.f32.xlu0 %v927_v30  ;;  %v1401_v30 = vand.u32 4294901760, %v1400_v14  ;;  %v793_v40 = vmul.f32 %v4533_v48, %v4397_v24  ;;  %v6685_v50 = vand.u32 4294901760, %v5141_v51 }
 0x147   : > { %v5154_v27 = vpop.f32.mrf.mxu1  ;;  %v1408_v49 = vsub.f32 %v5147_v8, %v6686_v25  ;;  %v6691_v60 = vand.u32 4294901760, %v5183_v12 }
 0x148   : > { %6683 = vst [vmem:[#allocation112_spill] sm:$0xff] %v5152_v46  ;;  %v5158_v37 = vpop.f32.mrf.mxu0  ;;  %v5177_v46 = vsub.f32 %v1181_v17, %v1181_v17  ;;  %v1664_v24 = vsub.f32 %v5141_v51, %v6685_v50  ;;  %v936_v21 = vsel %vm818_vm1, %v793_v40, 0.0  ;;  %v5190_v17 = vsel %vm615_vm13, 1.0, %v6603_v23 }
 0x149   : > { %3727 = vmatmul.msk.f32.gmra.mxu3 %vm818_vm1, %v5110_v43  ;;  %6687 = vst [vmem:[#allocation114_spill] sm:$0xff] %v5190_v17  ;;  %v795_v40 = vmul.f32 %v4533_v48, %v4462_v39  ;;  %v1184_v25 = vsel %vm818_vm1, %v5190_v17, 0 }
 0x14a   : > { %3695 = vmatmul.msk.f32.gmra.mxu1 %vm818_vm1, %v4906_v1  ;;  %1658 = vmatmul.f32.gmra.mxu2 %v1657_v54  ;;  %6684 = vst [vmem:[#allocation113_spill] sm:$0xff] %v5177_v46 }
 0x14b   : > { %1402 = vmatmul.f32.gmra.mxu0 %v1401_v30  ;;  %v794_v30 = vmul.f32 %v4533_v48, %v4428_v33  ;;  %v942_v51 = vsel %vm818_vm1, %v795_v40, 0.0 }
 0x14c   : > { %v1913_v14 = vpop.f32.mrf.mxu3  ;;  %931 = vadd.xlane.f32.xlu1 %v930_v19 }
 0x14d   : > { %934 = vadd.xlane.f32.xlu2 %v933_v62  ;;  %v1531_v54 = vpop.f32.mrf.mxu2  ;;  %v1665_v62 = vand.u32 4294901760, %v1664_v24  ;;  %v1088_v24 = vsel %vm818_vm1, %v4926_v57, 0  ;;  %v939_v63 = vsel %vm818_vm1, %v794_v30, 0.0  ;;  %v1416_v30 = vsub.f32 %v5183_v12, %v6691_v60 }
 0x14e   : > { %v5192_v19 = vadd.f32 %v1909_v58, %v1531_v54  ;;  %937 = vadd.xlane.f32.xlu0 %v936_v21  ;;  %v1409_v21 = vand.u32 4294901760, %v1408_v49  ;;  %v796_v58 = vmul.f32 %v4533_v48, %v4494_v3  ;;  %v6690_v54 = vand.u32 4294901760, %v5177_v46 }
 0x14f   : > { %v5194_v44 = vpop.f32.mrf.mxu1  ;;  %v5223_v39 = vsub.f32 %v1088_v24, %v1088_v24 }
 0x150   : > { %6688 = vst [vmem:[#allocation115_spill] sm:$0xff] %v5192_v19  ;;  %v5198_v50 = vpop.f32.mrf.mxu0  ;;  %v5217_v19 = vsub.f32 %v1184_v25, %v1184_v25  ;;  %v1672_v3 = vsub.f32 %v5177_v46, %v6690_v54  ;;  %v945_v33 = vsel %vm818_vm1, %v796_v58, 0.0  ;;  %v5230_v25 = vsel %vm616_vm14, 1.0, %v6603_v23 }
 0x151   : > { %3728 = vmatmul.msk.f32.gmra.mxu3 %vm818_vm1, %v5150_v10  ;;  %6692 = vst [vmem:[#allocation117_spill] sm:$0xff] %v5230_v25  ;;  %v798_v58 = vmul.f32 %v4533_v48, %v4572_v16  ;;  %v1187_v60 = vsel %vm818_vm1, %v5230_v25, 0  ;;  %v6696_v4 = vand.u32 4294901760, %v5223_v39 }
 0x152   : > { %3696 = vmatmul.msk.f32.gmra.mxu1 %vm818_vm1, %v4916_v15  ;;  %1666 = vmatmul.f32.gmra.mxu2 %v1665_v62  ;;  %6689 = vst [vmem:[#allocation116_spill] sm:$0xff] %v5217_v19 }
 0x153   : > { %1410 = vmatmul.f32.gmra.mxu0 %v1409_v21  ;;  %v797_v21 = vmul.f32 %v4533_v48, %v4529_v18 }
 0x154   : > { %v1917_v49 = vpop.f32.mrf.mxu3  ;;  %940 = vadd.xlane.f32.xlu1 %v939_v63 }
 0x155   : > { %943 = vadd.xlane.f32.xlu2 %v942_v51  ;;  %v1539_v62 = vpop.f32.mrf.mxu2  ;;  %v1673_v51 = vand.u32 4294901760, %v1672_v3  ;;  %v1091_v3 = vsel %vm818_vm1, %v4965_v52, 0  ;;  %v948_v24 = vsel %vm818_vm1, %v797_v21, 0.0  ;;  %v1424_v21 = vsub.f32 %v5223_v39, %v6696_v4 }
 0x156   : > { %v5232_v63 = vadd.f32 %v1913_v14, %v1539_v62  ;;  %946 = vadd.xlane.f32.xlu0 %v945_v33  ;;  %v1417_v33 = vand.u32 4294901760, %v1416_v30  ;;  %v799_v14 = vmul.f32 %v4533_v48, %v4617_v42  ;;  %v951_v48 = vsel %vm818_vm1, %v798_v58, 0.0 }
 0x157   : > { %v5234_v40 = vpop.f32.mrf.mxu1  ;;  %v6695_v62 = vand.u32 4294901760, %v5217_v19  ;;  %v5263_v42 = vsub.f32 %v1091_v3, %v1091_v3 }
 0x158   : > { %6693 = vst [vmem:[#allocation118_spill] sm:$0xff] %v5232_v63  ;;  %v5238_v54 = vpop.f32.mrf.mxu0  ;;  %v5257_v63 = vsub.f32 %v1187_v60, %v1187_v60  ;;  %v954_v16 = vsel %vm818_vm1, %v799_v14, 0.0  ;;  %v5270_v60 = vsel %vm617_vm15, 1.0, %v6603_v23 }
 0x159   : > { %3729 = vmatmul.msk.f32.gmra.mxu3 %vm818_vm1, %v5190_v17  ;;  %v1680_v46 = vsub.f32 %v5217_v19, %v6695_v62  ;;  %6697 = vst [vmem:[#allocation120_spill] sm:$0xff] %v5270_v60  ;;  %v6701_v41 = vand.u32 4294901760, %v5263_v42 }
 0x15a   : > { %3697 = vmatmul.msk.f32.gmra.mxu1 %vm818_vm1, %v4926_v57  ;;  %1674 = vmatmul.f32.gmra.mxu2 %v1673_v51  ;;  %6694 = vst [vmem:[#allocation119_spill] sm:$0xff] %v5257_v63 }
 0x15b   : > { %1418 = vmatmul.f32.gmra.mxu0 %v1417_v33  ;;  %v5276_v33 = vld [vmem:[#allocation2] ss:$0 sm:$0xff]  ;;  %v1681_v14 = vand.u32 4294901760, %v1680_v46  ;;  %v1094_v46 = vsel %vm818_vm1, %v4974_v11, 0 }
 0x15c   : > { %v1921_v30 = vpop.f32.mrf.mxu3  ;;  %949 = vadd.xlane.f32.xlu1 %v948_v24  ;;  %v800_v62 = vmul.f32 %v5276_v33, %v4660_v38  ;;  %v5305_v38 = vsub.f32 %v1094_v46, %v1094_v46 }
 0x15d   : > { %952 = vadd.xlane.f32.xlu2 %v951_v48  ;;  %v1547_v51 = vpop.f32.mrf.mxu2  ;;  %v801_v48 = vmul.f32 %v5276_v33, %v4705_v5 }
 0x15e   : > { %v5272_v24 = vadd.f32 %v1917_v49, %v1547_v51  ;;  %955 = vadd.xlane.f32.xlu0 %v954_v16  ;;  %v1190_v49 = vsel %vm818_vm1, %v5270_v60, 0  ;;  %v1425_v16 = vand.u32 4294901760, %v1424_v21  ;;  %v802_v51 = vmul.f32 %v5276_v33, %v4750_v9 }
 0x15f   : > { %v5274_v58 = vpop.f32.mrf.mxu1  ;;  %v957_v4 = vsel %vm818_vm1, %v800_v62, 0.0  ;;  %v5299_v19 = vsub.f32 %v1190_v49, %v1190_v49  ;;  %v960_v9 = vsel %vm818_vm1, %v801_v48, 0.0  ;;  %v1432_v62 = vsub.f32 %v5263_v42, %v6701_v41 }
 0x160   : > { %6698 = vst [vmem:[#allocation121_spill] sm:$0xff] %v5272_v24  ;;  %v5280_v3 = vpop.f32.mrf.mxu0  ;;  %v6700_v24 = vand.u32 4294901760, %v5257_v63  ;;  %v963_v18 = vsel %vm818_vm1, %v802_v51, 0.0  ;;  %v5312_v49 = vsel %vm618_vm0, 1.0, %v6603_v23  ;;  %v804_v51 = vmul.f32 %v5276_v33, %v4838_v36 }
 0x161   : > { %3730 = vmatmul.msk.f32.gmra.mxu3 %vm818_vm1, %v5230_v25  ;;  %6699 = vst [vmem:[#allocation122_spill] sm:$0xff] %v5299_v19  ;;  %v1193_v41 = vsel %vm818_vm1, %v5312_v49, 0  ;;  %v6706_v13 = vand.u32 4294901760, %v5305_v38 }
 0x162   : > { %3698 = vmatmul.msk.f32.gmra.mxu1 %vm818_vm1, %v4965_v52  ;;  %1682 = vmatmul.f32.gmra.mxu2 %v1681_v14  ;;  %v1688_v5 = vsub.f32 %v5257_v63, %v6700_v24  ;;  %6702 = vst [vmem:[#allocation123_spill] sm:$0xff] %v5312_v49  ;;  %v803_v24 = vmul.f32 %v5276_v33, %v4805_v61  ;;  %v969_v63 = vsel %vm818_vm1, %v804_v51, 0.0 }
 0x163   : > { %1426 = vmatmul.f32.gmra.mxu0 %v1425_v16 }
 0x164   : > { %v1925_v21 = vpop.f32.mrf.mxu3  ;;  %958 = vadd.xlane.f32.xlu1 %v957_v4  ;;  %v966_v46 = vsel %vm818_vm1, %v803_v24, 0.0  ;;  %v1440_v24 = vsub.f32 %v5305_v38, %v6706_v13 }
 0x165   : > { %961 = vadd.xlane.f32.xlu2 %v960_v9  ;;  %v1555_v14 = vpop.f32.mrf.mxu2  ;;  %v1689_v9 = vand.u32 4294901760, %v1688_v5  ;;  %v1097_v5 = vsel %vm818_vm1, %v4990_v47, 0 }
 0x166   : > { %v5314_v4 = vadd.f32 %v1921_v30, %v1555_v14  ;;  %964 = vadd.xlane.f32.xlu0 %v963_v18  ;;  %v1433_v18 = vand.u32 4294901760, %v1432_v62  ;;  %v805_v30 = vmul.f32 %v5276_v33, %v4913_v20  ;;  %v6705_v14 = vand.u32 4294901760, %v5299_v19 }
 0x167   : > { %v5316_v48 = vpop.f32.mrf.mxu1  ;;  %v5345_v36 = vsub.f32 %v1097_v5, %v1097_v5 }
 0x168   : > { %6703 = vst [vmem:[#allocation124_spill] sm:$0xff] %v5314_v4  ;;  %v5320_v16 = vpop.f32.mrf.mxu0  ;;  %v5339_v4 = vsub.f32 %v1193_v41, %v1193_v41  ;;  %v1696_v20 = vsub.f32 %v5299_v19, %v6705_v14  ;;  %v972_v61 = vsel %vm818_vm1, %v805_v30, 0.0  ;;  %v5352_v41 = vsel %vm619_vm2, 1.0, %v6603_v23 }
 0x169   : > { %3731 = vmatmul.msk.f32.gmra.mxu3 %vm818_vm1, %v5270_v60  ;;  %6707 = vst [vmem:[#allocation126_spill] sm:$0xff] %v5352_v41  ;;  %v807_v30 = vmul.f32 %v5276_v33, %v5015_v29  ;;  %v1196_v13 = vsel %vm818_vm1, %v5352_v41, 0  ;;  %v6711_v28 = vand.u32 4294901760, %v5345_v36 }
 0x16a   : > { %3699 = vmatmul.msk.f32.gmra.mxu1 %vm818_vm1, %v4974_v11  ;;  %1690 = vmatmul.f32.gmra.mxu2 %v1689_v9  ;;  %6704 = vst [vmem:[#allocation125_spill] sm:$0xff] %v5339_v4 }
 0x16b   : > { %1434 = vmatmul.f32.gmra.mxu0 %v1433_v18  ;;  %v806_v18 = vmul.f32 %v5276_v33, %v4971_v34  ;;  %v978_v19 = vsel %vm818_vm1, %v807_v30, 0.0 }
 0x16c   : > { %v1929_v62 = vpop.f32.mrf.mxu3  ;;  %967 = vadd.xlane.f32.xlu1 %v966_v46 }
 0x16d   : > { %970 = vadd.xlane.f32.xlu2 %v969_v63  ;;  %v1563_v9 = vpop.f32.mrf.mxu2  ;;  %v1697_v63 = vand.u32 4294901760, %v1696_v20  ;;  %v1100_v20 = vsel %vm818_vm1, %v5033_v32, 0  ;;  %v975_v5 = vsel %vm818_vm1, %v806_v18, 0.0  ;;  %v1448_v18 = vsub.f32 %v5345_v36, %v6711_v28 }
 0x16e   : > { %v5354_v46 = vadd.f32 %v1925_v21, %v1563_v9  ;;  %973 = vadd.xlane.f32.xlu0 %v972_v61  ;;  %v1441_v61 = vand.u32 4294901760, %v1440_v24  ;;  %v808_v21 = vmul.f32 %v5276_v33, %v5066_v59  ;;  %v6710_v9 = vand.u32 4294901760, %v5339_v4 }
 0x16f   : > { %v5356_v51 = vpop.f32.mrf.mxu1  ;;  %v5385_v29 = vsub.f32 %v1100_v20, %v1100_v20 }
 0x170   : > { %6708 = vst [vmem:[#allocation127_spill] sm:$0xff] %v5354_v46  ;;  %v5360_v14 = vpop.f32.mrf.mxu0  ;;  %v5379_v46 = vsub.f32 %v1196_v13, %v1196_v13  ;;  %v1704_v59 = vsub.f32 %v5339_v4, %v6710_v9  ;;  %v981_v34 = vsel %vm818_vm1, %v808_v21, 0.0  ;;  %v5392_v13 = vsel %vm620_vm3, 1.0, %v6603_v23  ;;  %v557_v9 = vpop.permute.xlu1 %556 }
 0x171   : > { %3732 = vmatmul.msk.f32.gmra.mxu3 %vm818_vm1, %v5312_v49  ;;  %6712 = vst [vmem:[#allocation129_spill] sm:$0xff] %v5392_v13  ;;  %v810_v21 = vmul.f32 %v5276_v33, %v5150_v10  ;;  %v1199_v4 = vsel %vm818_vm1, %v5392_v13, 0  ;;  %vm621_vm4 = vcmp.eq.s32.totalorder %v557_v9, %v4171_v53  ;;  %v6717_v53 = vand.u32 4294901760, %v5385_v29 }
 0x172   : > { %3700 = vmatmul.msk.f32.gmra.mxu1 %vm818_vm1, %v4990_v47  ;;  %1698 = vmatmul.f32.gmra.mxu2 %v1697_v63  ;;  %6709 = vst [vmem:[#allocation128_spill] sm:$0xff] %v5379_v46  ;;  %v1705_v20 = vand.u32 4294901760, %v1704_v59  ;;  %v1103_v59 = vsel %vm818_vm1, %v5024_v6, 0 }
 0x173   : > { %1442 = vmatmul.f32.gmra.mxu0 %v1441_v61  ;;  %v809_v61 = vmul.f32 %v5276_v33, %v5110_v43  ;;  %v5424_v43 = vsub.f32 %v1103_v59, %v1103_v59 }
 0x174   : > { %v1933_v24 = vpop.f32.mrf.mxu3  ;;  %976 = vadd.xlane.f32.xlu1 %v975_v5 }
 0x175   : > { %979 = vadd.xlane.f32.xlu2 %v978_v19  ;;  %v1571_v63 = vpop.f32.mrf.mxu2  ;;  %v984_v28 = vsel %vm818_vm1, %v809_v61, 0.0  ;;  %v1456_v61 = vsub.f32 %v5385_v29, %v6717_v53 }
 0x176   : > { %v5394_v5 = vadd.f32 %v1929_v62, %v1571_v63  ;;  %982 = vadd.xlane.f32.xlu0 %v981_v34  ;;  %v1449_v34 = vand.u32 4294901760, %v1448_v18  ;;  %v811_v62 = vmul.f32 %v5276_v33, %v5190_v17  ;;  %v987_v17 = vsel %vm818_vm1, %v810_v21, 0.0 }
 0x177   : > { %v5396_v30 = vpop.f32.mrf.mxu1  ;;  %v6716_v63 = vand.u32 4294901760, %v5379_v46 }
 0x178   : > { %6713 = vst [vmem:[#allocation130_spill] sm:$0xff] %v5394_v5  ;;  %v5400_v19 = vpop.f32.mrf.mxu0  ;;  %v5418_v5 = vsub.f32 %v1199_v4, %v1199_v4  ;;  %v5431_v4 = vsel %vm621_vm4, 1.0, %v6603_v23 }
 0x179   : > { %6714 = vst [vmem:[#allocation131_spill] sm:$0xff] %v5396_v30  ;;  %3733 = vmatmul.msk.f32.gmra.mxu3 %vm818_vm1, %v5352_v41  ;;  %v1712_v10 = vsub.f32 %v5379_v46, %v6716_v63  ;;  %v1202_v23 = vsel %vm818_vm1, %v5431_v4, 0 }
 0x17a   : > { %3701 = vmatmul.msk.f32.gmra.mxu1 %vm818_vm1, %v5033_v32  ;;  %1706 = vmatmul.f32.gmra.mxu2 %v1705_v20  ;;  %6715 = vst [vmem:[#allocation132_spill] sm:$0xff] %v5418_v5  ;;  %v990_v20 = vsel %vm818_vm1, %v811_v62, 0.0  ;;  %v813_v62 = vmul.f32 %v5276_v33, %v5270_v60  ;;  %v5456_v53 = vsub.f32 %v1202_v23, %v1202_v23 }
 0x17b   : > { %1450 = vmatmul.f32.gmra.mxu0 %v1449_v34  ;;  %6718 = vst [vmem:[#allocation133_spill] sm:$0xff] %v5431_v4 }
 0x17c   : > { %v1937_v18 = vpop.f32.mrf.mxu3  ;;  %985 = vadd.xlane.f32.xlu1 %v984_v28  ;;  %v812_v28 = vmul.f32 %v5276_v33, %v5230_v25  ;;  %6721 = vst [vmem:[#allocation136_spill] sm:$0xff] %v5456_v53 }
 0x17d   : > { %988 = vadd.xlane.f32.xlu2 %v987_v17  ;;  %v1579_v30 = vpop.f32.mrf.mxu2  ;;  %v1713_v17 = vand.u32 4294901760, %v1712_v10  ;;  %v1106_v10 = vsel %vm818_vm1, %v5076_v45, 0 }
 0x17e   : > { %v5433_v9 = vadd.f32 %v1933_v24, %v1579_v30  ;;  %991 = vadd.xlane.f32.xlu0 %v990_v20  ;;  %v1457_v24 = vand.u32 4294901760, %v1456_v61  ;;  %v814_v30 = vmul.f32 %v5276_v33, %v5312_v49  ;;  %v993_v20 = vsel %vm818_vm1, %v812_v28, 0.0 }
 0x17f   : > { %v5435_v21 = vpop.f32.mrf.mxu1  ;;  %v996_v61 = vsel %vm818_vm1, %v813_v62, 0.0  ;;  %v5462_v46 = vsub.f32 %v1106_v10, %v1106_v10  ;;  %v815_v62 = vmul.f32 %v5276_v33, %v5352_v41  ;;  %v816_v10 = vmul.f32 %v5276_v33, %v5392_v13 }
 0x180   : > { %6719 = vst [vmem:[#allocation134_spill] sm:$0xff] %v5433_v9  ;;  %v5439_v34 = vpop.f32.mrf.mxu0  ;;  %v6722_v9 = vand.u32 4294901760, %v5418_v5  ;;  %v999_v60 = vsel %vm818_vm1, %v814_v30, 0.0  ;;  %v6542_v30 = vand.u32 4294901760, %v5456_v53 }
 0x181   : > { %6720 = vst [vmem:[#allocation135_spill] sm:$0xff] %v5435_v21  ;;  %3734 = vmatmul.msk.f32.gmra.mxu3 %vm818_vm1, %v5392_v13  ;;  %v6837_v21 = vld [vmem:[#allocation92_spill] sm:$0xff] }
 0x182   : > { %3702 = vmatmul.msk.f32.gmra.mxu1 %vm818_vm1, %v5024_v6  ;;  %1714 = vmatmul.f32.gmra.mxu2 %v1713_v17  ;;  %v1720_v59 = vsub.f32 %v5418_v5, %v6722_v9  ;;  %v6723_v17 = vand.u32 4294901760, %v5424_v43 }
 0x183   : > { %1458 = vmatmul.f32.gmra.mxu0 %v1457_v24 }
 0x184   : > { %v1941_v63 = vpop.f32.mrf.mxu3  ;;  %994 = vadd.xlane.f32.xlu1 %v993_v20  ;;  %v1464_v28 = vsub.f32 %v5424_v43, %v6723_v17  ;;  %v1721_v9 = vand.u32 4294901760, %v1720_v59  ;;  %v1005_v17 = vsel %vm818_vm1, %v816_v10, 0.0 }
 0x185   : > { %997 = vadd.xlane.f32.xlu2 %v996_v61  ;;  %v1587_v49 = vpop.f32.mrf.mxu2 }
 0x186   : > { %v5468_v23 = vadd.f32 %v1937_v18, %v1587_v49  ;;  %1000 = vadd.xlane.f32.xlu0 %v999_v60  ;;  %v1465_v61 = vand.u32 4294901760, %v1464_v28  ;;  %v817_v60 = vmul.f32 %v5276_v33, %v5431_v4  ;;  %v6543_v49 = vand.u32 4294901760, %v5462_v46 }
 0x187   : > { %v5470_v24 = vpop.f32.mrf.mxu1  ;;  %v1002_v18 = vsel %vm818_vm1, %v815_v62, 0.0  ;;  %v1728_v28 = vsub.f32 %v5456_v53, %v6542_v30 }
 0x188   : > { %6724 = vst [vmem:[#allocation137_spill] sm:$0xff] %v5468_v23  ;;  %v5474_v20 = vpop.f32.mrf.mxu0  ;;  %v1008_v33 = vsel %vm818_vm1, %v817_v60, 0.0 }
 0x189   : > { %6725 = vst [vmem:[#allocation138_spill] sm:$0xff] %v5470_v24  ;;  %3735 = vmatmul.msk.f32.gmra.mxu3 %vm818_vm1, %v5431_v4  ;;  %v1472_v4 = vsub.f32 %v5462_v46, %v6543_v49  ;;  %v1729_v10 = vand.u32 4294901760, %v1728_v28  ;;  %v6736_v28 = vld [vmem:[#allocation8_spill] sm:$0xff] }
 0x18a   : > { %6726 = vst [vmem:[#allocation139_spill] sm:$0xff] %v5474_v20  ;;  %3703 = vmatmul.msk.f32.gmra.mxu1 %vm818_vm1, %v5076_v45  ;;  %1722 = vmatmul.f32.gmra.mxu2 %v1721_v9  ;;  %v6838_v20 = vand.u32 4294901760, %v6837_v21 }
 0x18b   : > { %1466 = vmatmul.f32.gmra.mxu0 %v1465_v61  ;;  %v1473_v30 = vand.u32 4294901760, %v1472_v4 }
 0x18c   : > { %v1945_v59 = vpop.f32.mrf.mxu3  ;;  %1003 = vadd.xlane.f32.xlu1 %v1002_v18  ;;  %v6730_v18 = vand.u32 4294901760, %v4205_v7 }
 0x18d   : > { %1006 = vadd.xlane.f32.xlu2 %v1005_v17  ;;  %v1595_v23 = vpop.f32.mrf.mxu2 }
 0x18e   : > { %v5495_v9 = vadd.f32 %v1941_v63, %v1595_v23  ;;  %1009 = vadd.xlane.f32.xlu0 %v1008_v33  ;;  %v6734_v33 = vld [vmem:[#allocation11_spill] sm:$0xff] }
 0x18f   : > { %v5497_v62 = vpop.f32.mrf.mxu1 }
 0x190   : > { %6727 = vst [vmem:[#allocation140_spill] sm:$0xff] %v5495_v9  ;;  %v5499_v61 = vpop.f32.mrf.mxu0  ;;  %v6735_v9 = vand.u32 4294901760, %v6734_v33 }
 0x191   : > { %6728 = vst [vmem:[#allocation141_spill] sm:$0xff] %v5497_v62  ;;  %2371 = vmatmul.f32.vlgmr.msrb.gmra.mxu3 %v6730_v18 }
 0x192   : > { %6729 = vst [vmem:[#allocation142_spill] sm:$0xff] %v5499_v61  ;;  %3800 = vmatmul.msk.f32.vlgmr.msrb.gmra.mxu1 %vm818_vm1, %v4190_v0  ;;  %1730 = vmatmul.f32.gmra.mxu2 %v1729_v10 }
 0x193   : > { %1474 = vmatmul.f32.gmra.mxu0 %v1473_v30 }
 0x194   : > { %v1949_v60 = vpop.f32.mrf.mxu3 }
 0x195   : > { %v1603_v17 = vpop.f32.mrf.mxu2 }
 0x196   : > { %v5505_v49 = vadd.f32 %v1945_v59, %v1603_v17  ;;  %v6740_v17 = vld [vmem:[#allocation19_spill] sm:$0xff] }
 0x197   : > { %v5507_v63 = vpop.f32.mrf.mxu1 }
 0x198   : > { %6731 = vst [vmem:[#allocation143_spill] sm:$0xff] %v5505_v49  ;;  %v5509_v23 = vpop.f32.mrf.mxu0  ;;  %v6741_v49 = vand.u32 4294901760, %v6740_v17 }
 0x199   : > { %6732 = vst [vmem:[#allocation144_spill] sm:$0xff] %v5507_v63  ;;  %2377 = vmatmul.f32.gmra.mxu3 %v6735_v9  ;;  %v6742_v9 = vld [vmem:[#allocation18_spill] sm:$0xff] }
 0x19a   : > { %6733 = vst [vmem:[#allocation145_spill] sm:$0xff] %v5509_v23  ;;  %3801 = vmatmul.msk.f32.gmra.mxu1 %vm818_vm1, %v6736_v28  ;;  %2032 = vmatmul.f32.vlgmr.msrb.gmra.mxu2 %v4205_v7 }
 0x19b   : > { %3736 = vmatmul.msk.f32.vlgmr.msrb.gmra.mxu0 %vm818_vm1, %v4190_v0 }
 0x19c   : > { %v1953_v4 = vpop.f32.mrf.mxu3 }
 0x19d   : > { %v1611_v30 = vpop.f32.mrf.mxu2 }
 0x19e   : > { %v5518_v10 = vadd.f32 %v1949_v60, %v1611_v30 }
 0x19f   : > { %v5520_v59 = vpop.f32.mrf.mxu1 }
 0x1a0   : > { %6737 = vst [vmem:[#allocation11_spill] sm:$0xff] %v5518_v10  ;;  %v5522_v18 = vpop.f32.mrf.mxu0  ;;  %v6746_v10 = vld [vmem:[#allocation21_spill] sm:$0xff] }
 0x1a1   : > { %6738 = vst [vmem:[#allocation8_spill] sm:$0xff] %v5520_v59  ;;  %2383 = vmatmul.f32.gmra.mxu3 %v6741_v49  ;;  %v6747_v13 = vand.u32 4294901760, %v6746_v10  ;;  %v6748_v49 = vld [vmem:[#allocation17_spill] sm:$0xff] }
 0x1a2   : > { %6739 = vst [vmem:[#allocation146_spill] sm:$0xff] %v5522_v18  ;;  %3802 = vmatmul.msk.f32.gmra.mxu1 %vm818_vm1, %v6742_v9  ;;  %2037 = vmatmul.f32.gmra.mxu2 %v6734_v33 }
 0x1a3   : > { %3737 = vmatmul.msk.f32.gmra.mxu0 %vm818_vm1, %v6736_v28 }
 0x1a4   : > { %v1957_v0 = vpop.f32.mrf.mxu3 }
 0x1a5   : > { %v1619_v7 = vpop.f32.mrf.mxu2 }
 0x1a6   : > { %v5531_v53 = vadd.f32 %v1953_v4, %v1619_v7 }
 0x1a7   : > { %v5533_v60 = vpop.f32.mrf.mxu1 }
 0x1a8   : > { %6743 = vst [vmem:[#allocation19_spill] sm:$0xff] %v5531_v53  ;;  %v5535_v30 = vpop.f32.mrf.mxu0  ;;  %v6752_v53 = vld [vmem:[#allocation25_spill] sm:$0xff] }
 0x1a9   : > { %6744 = vst [vmem:[#allocation18_spill] sm:$0xff] %v5533_v60  ;;  %2389 = vmatmul.f32.gmra.mxu3 %v6747_v13  ;;  %v6753_v41 = vand.u32 4294901760, %v6752_v53  ;;  %v6754_v13 = vld [vmem:[#allocation23_spill] sm:$0xff] }
 0x1aa   : > { %6745 = vst [vmem:[#allocation147_spill] sm:$0xff] %v5535_v30  ;;  %3803 = vmatmul.msk.f32.gmra.mxu1 %vm818_vm1, %v6748_v49  ;;  %2042 = vmatmul.f32.gmra.mxu2 %v6740_v17  ;;  %v6832_v30 = vld [vmem:[#allocation86_spill] sm:$0xff] }
 0x1ab   : > { %3738 = vmatmul.msk.f32.gmra.mxu0 %vm818_vm1, %v6742_v9 }
 0x1ac   : > { %v1961_v33 = vpop.f32.mrf.mxu3 }
 0x1ad   : > { %v1627_v28 = vpop.f32.mrf.mxu2 }
 0x1ae   : > { %v5544_v5 = vadd.f32 %v1957_v0, %v1627_v28 }
 0x1af   : > { %v5546_v4 = vpop.f32.mrf.mxu1 }
 0x1b0   : > { %6749 = vst [vmem:[#allocation21_spill] sm:$0xff] %v5544_v5  ;;  %v5548_v7 = vpop.f32.mrf.mxu0  ;;  %v6758_v5 = vld [vmem:[#allocation29_spill] sm:$0xff] }
 0x1b1   : > { %6750 = vst [vmem:[#allocation17_spill] sm:$0xff] %v5546_v4  ;;  %2395 = vmatmul.f32.gmra.mxu3 %v6753_v41  ;;  %v6759_v4 = vand.u32 4294901760, %v6758_v5  ;;  %v6760_v41 = vld [vmem:[#allocation27_spill] sm:$0xff] }
 0x1b2   : > { %6751 = vst [vmem:[#allocation148_spill] sm:$0xff] %v5548_v7  ;;  %3804 = vmatmul.msk.f32.gmra.mxu1 %vm818_vm1, %v6754_v13  ;;  %2047 = vmatmul.f32.gmra.mxu2 %v6746_v10 }
 0x1b3   : > { %3739 = vmatmul.msk.f32.gmra.mxu0 %vm818_vm1, %v6748_v49 }
 0x1b4   : > { %v1965_v17 = vpop.f32.mrf.mxu3 }
 0x1b5   : > { %v1635_v9 = vpop.f32.mrf.mxu2 }
 0x1b6   : > { %v5557_v25 = vadd.f32 %v1961_v33, %v1635_v9 }
 0x1b7   : > { %v5559_v0 = vpop.f32.mrf.mxu1 }
 0x1b8   : > { %6755 = vst [vmem:[#allocation25_spill] sm:$0xff] %v5557_v25  ;;  %v5561_v28 = vpop.f32.mrf.mxu0  ;;  %v6764_v25 = vld [vmem:[#allocation33_spill] sm:$0xff] }
 0x1b9   : > { %6756 = vst [vmem:[#allocation23_spill] sm:$0xff] %v5559_v0  ;;  %2401 = vmatmul.f32.gmra.mxu3 %v6759_v4  ;;  %v6765_v0 = vand.u32 4294901760, %v6764_v25  ;;  %v6766_v4 = vld [vmem:[#allocation31_spill] sm:$0xff] }
 0x1ba   : > { %6757 = vst [vmem:[#allocation149_spill] sm:$0xff] %v5561_v28  ;;  %3805 = vmatmul.msk.f32.gmra.mxu1 %vm818_vm1, %v6760_v41  ;;  %2052 = vmatmul.f32.gmra.mxu2 %v6752_v53 }
 0x1bb   : > { %3740 = vmatmul.msk.f32.gmra.mxu0 %vm818_vm1, %v6754_v13 }
 0x1bc   : > { %v1969_v10 = vpop.f32.mrf.mxu3 }
 0x1bd   : > { %v1643_v49 = vpop.f32.mrf.mxu2 }
 0x1be   : > { %v5570_v60 = vadd.f32 %v1965_v17, %v1643_v49 }
 0x1bf   : > { %v5572_v33 = vpop.f32.mrf.mxu1 }
 0x1c0   : > { %6761 = vst [vmem:[#allocation29_spill] sm:$0xff] %v5570_v60  ;;  %v5574_v9 = vpop.f32.mrf.mxu0  ;;  %v6770_v60 = vld [vmem:[#allocation37_spill] sm:$0xff] }
 0x1c1   : > { %6762 = vst [vmem:[#allocation27_spill] sm:$0xff] %v5572_v33  ;;  %2407 = vmatmul.f32.gmra.mxu3 %v6765_v0  ;;  %v6771_v33 = vand.u32 4294901760, %v6770_v60  ;;  %v6772_v0 = vld [vmem:[#allocation35_spill] sm:$0xff] }
 0x1c2   : > { %6763 = vst [vmem:[#allocation150_spill] sm:$0xff] %v5574_v9  ;;  %3806 = vmatmul.msk.f32.gmra.mxu1 %vm818_vm1, %v6766_v4  ;;  %2057 = vmatmul.f32.gmra.mxu2 %v6758_v5 }
 0x1c3   : > { %3741 = vmatmul.msk.f32.gmra.mxu0 %vm818_vm1, %v6760_v41 }
 0x1c4   : > { %v1973_v53 = vpop.f32.mrf.mxu3 }
 0x1c5   : > { %v1651_v13 = vpop.f32.mrf.mxu2 }
 0x1c6   : > { %v5583_v28 = vadd.f32 %v1969_v10, %v1651_v13 }
 0x1c7   : > { %v5585_v17 = vpop.f32.mrf.mxu1 }
 0x1c8   : > { %6767 = vst [vmem:[#allocation33_spill] sm:$0xff] %v5583_v28  ;;  %v5587_v49 = vpop.f32.mrf.mxu0  ;;  %v6776_v28 = vld [vmem:[#allocation41_spill] sm:$0xff] }
 0x1c9   : > { %6768 = vst [vmem:[#allocation31_spill] sm:$0xff] %v5585_v17  ;;  %2413 = vmatmul.f32.gmra.mxu3 %v6771_v33  ;;  %v6777_v17 = vand.u32 4294901760, %v6776_v28  ;;  %v6778_v33 = vld [vmem:[#allocation39_spill] sm:$0xff] }
 0x1ca   : > { %6769 = vst [vmem:[#allocation151_spill] sm:$0xff] %v5587_v49  ;;  %3807 = vmatmul.msk.f32.gmra.mxu1 %vm818_vm1, %v6772_v0  ;;  %2062 = vmatmul.f32.gmra.mxu2 %v6764_v25 }
 0x1cb   : > { %3742 = vmatmul.msk.f32.gmra.mxu0 %vm818_vm1, %v6766_v4 }
 0x1cc   : > { %v1977_v5 = vpop.f32.mrf.mxu3 }
 0x1cd   : > { %v1659_v41 = vpop.f32.mrf.mxu2 }
 0x1ce   : > { %v5596_v9 = vadd.f32 %v1973_v53, %v1659_v41 }
 0x1cf   : > { %v5598_v10 = vpop.f32.mrf.mxu1 }
 0x1d0   : > { %6773 = vst [vmem:[#allocation37_spill] sm:$0xff] %v5596_v9  ;;  %v5600_v13 = vpop.f32.mrf.mxu0  ;;  %v6782_v9 = vld [vmem:[#allocation45_spill] sm:$0xff] }
 0x1d1   : > { %6774 = vst [vmem:[#allocation35_spill] sm:$0xff] %v5598_v10  ;;  %2419 = vmatmul.f32.gmra.mxu3 %v6777_v17  ;;  %v6783_v10 = vand.u32 4294901760, %v6782_v9  ;;  %v6784_v17 = vld [vmem:[#allocation43_spill] sm:$0xff] }
 0x1d2   : > { %6775 = vst [vmem:[#allocation152_spill] sm:$0xff] %v5600_v13  ;;  %3808 = vmatmul.msk.f32.gmra.mxu1 %vm818_vm1, %v6778_v33  ;;  %2067 = vmatmul.f32.gmra.mxu2 %v6770_v60 }
 0x1d3   : > { %3743 = vmatmul.msk.f32.gmra.mxu0 %vm818_vm1, %v6772_v0 }
 0x1d4   : > { %v1981_v25 = vpop.f32.mrf.mxu3 }
 0x1d5   : > { %v1667_v4 = vpop.f32.mrf.mxu2 }
 0x1d6   : > { %v5609_v49 = vadd.f32 %v1977_v5, %v1667_v4 }
 0x1d7   : > { %v5611_v53 = vpop.f32.mrf.mxu1 }
 0x1d8   : > { %6779 = vst [vmem:[#allocation41_spill] sm:$0xff] %v5609_v49  ;;  %v5613_v41 = vpop.f32.mrf.mxu0  ;;  %v6788_v49 = vld [vmem:[#allocation49_spill] sm:$0xff] }
 0x1d9   : > { %6780 = vst [vmem:[#allocation39_spill] sm:$0xff] %v5611_v53  ;;  %2425 = vmatmul.f32.gmra.mxu3 %v6783_v10  ;;  %v6789_v53 = vand.u32 4294901760, %v6788_v49  ;;  %v6790_v10 = vld [vmem:[#allocation47_spill] sm:$0xff] }
 0x1da   : > { %6781 = vst [vmem:[#allocation153_spill] sm:$0xff] %v5613_v41  ;;  %3809 = vmatmul.msk.f32.gmra.mxu1 %vm818_vm1, %v6784_v17  ;;  %2072 = vmatmul.f32.gmra.mxu2 %v6776_v28 }
 0x1db   : > { %3744 = vmatmul.msk.f32.gmra.mxu0 %vm818_vm1, %v6778_v33 }
 0x1dc   : > { %v1985_v60 = vpop.f32.mrf.mxu3 }
 0x1dd   : > { %v1675_v0 = vpop.f32.mrf.mxu2 }
 0x1de   : > { %v5622_v13 = vadd.f32 %v1981_v25, %v1675_v0 }
 0x1df   : > { %v5624_v5 = vpop.f32.mrf.mxu1 }
 0x1e0   : > { %6785 = vst [vmem:[#allocation45_spill] sm:$0xff] %v5622_v13  ;;  %v5626_v4 = vpop.f32.mrf.mxu0  ;;  %v6794_v13 = vld [vmem:[#allocation53_spill] sm:$0xff] }
 0x1e1   : > { %6786 = vst [vmem:[#allocation43_spill] sm:$0xff] %v5624_v5  ;;  %2431 = vmatmul.f32.gmra.mxu3 %v6789_v53  ;;  %v6795_v5 = vand.u32 4294901760, %v6794_v13  ;;  %v6796_v53 = vld [vmem:[#allocation51_spill] sm:$0xff] }
 0x1e2   : > { %6787 = vst [vmem:[#allocation154_spill] sm:$0xff] %v5626_v4  ;;  %3810 = vmatmul.msk.f32.gmra.mxu1 %vm818_vm1, %v6790_v10  ;;  %2077 = vmatmul.f32.gmra.mxu2 %v6782_v9 }
 0x1e3   : > { %3745 = vmatmul.msk.f32.gmra.mxu0 %vm818_vm1, %v6784_v17 }
 0x1e4   : > { %v1989_v28 = vpop.f32.mrf.mxu3 }
 0x1e5   : > { %v1683_v33 = vpop.f32.mrf.mxu2 }
 0x1e6   : > { %v5635_v41 = vadd.f32 %v1985_v60, %v1683_v33 }
 0x1e7   : > { %v5637_v25 = vpop.f32.mrf.mxu1 }
 0x1e8   : > { %6791 = vst [vmem:[#allocation49_spill] sm:$0xff] %v5635_v41  ;;  %v5639_v0 = vpop.f32.mrf.mxu0  ;;  %v6800_v41 = vld [vmem:[#allocation57_spill] sm:$0xff] }
 0x1e9   : > { %6792 = vst [vmem:[#allocation47_spill] sm:$0xff] %v5637_v25  ;;  %2437 = vmatmul.f32.gmra.mxu3 %v6795_v5  ;;  %v6801_v25 = vand.u32 4294901760, %v6800_v41  ;;  %v6802_v5 = vld [vmem:[#allocation55_spill] sm:$0xff] }
 0x1ea   : > { %6793 = vst [vmem:[#allocation155_spill] sm:$0xff] %v5639_v0  ;;  %3811 = vmatmul.msk.f32.gmra.mxu1 %vm818_vm1, %v6796_v53  ;;  %2082 = vmatmul.f32.gmra.mxu2 %v6788_v49 }
 0x1eb   : > { %3746 = vmatmul.msk.f32.gmra.mxu0 %vm818_vm1, %v6790_v10 }
 0x1ec   : > { %v1993_v9 = vpop.f32.mrf.mxu3 }
 0x1ed   : > { %v1691_v17 = vpop.f32.mrf.mxu2 }
 0x1ee   : > { %v5648_v4 = vadd.f32 %v1989_v28, %v1691_v17 }
 0x1ef   : > { %v5650_v60 = vpop.f32.mrf.mxu1 }
 0x1f0   : > { %6797 = vst [vmem:[#allocation53_spill] sm:$0xff] %v5648_v4  ;;  %v5652_v33 = vpop.f32.mrf.mxu0  ;;  %v6806_v4 = vld [vmem:[#allocation61_spill] sm:$0xff] }
 0x1f1   : > { %6798 = vst [vmem:[#allocation51_spill] sm:$0xff] %v5650_v60  ;;  %2443 = vmatmul.f32.gmra.mxu3 %v6801_v25  ;;  %v6807_v60 = vand.u32 4294901760, %v6806_v4  ;;  %v6808_v25 = vld [vmem:[#allocation59_spill] sm:$0xff] }
 0x1f2   : > { %6799 = vst [vmem:[#allocation156_spill] sm:$0xff] %v5652_v33  ;;  %3812 = vmatmul.msk.f32.gmra.mxu1 %vm818_vm1, %v6802_v5  ;;  %2087 = vmatmul.f32.gmra.mxu2 %v6794_v13 }
 0x1f3   : > { %3747 = vmatmul.msk.f32.gmra.mxu0 %vm818_vm1, %v6796_v53 }
 0x1f4   : > { %v1997_v49 = vpop.f32.mrf.mxu3 }
 0x1f5   : > { %v1699_v10 = vpop.f32.mrf.mxu2 }
 0x1f6   : > { %v5661_v0 = vadd.f32 %v1993_v9, %v1699_v10 }
 0x1f7   : > { %v5663_v28 = vpop.f32.mrf.mxu1 }
 0x1f8   : > { %6803 = vst [vmem:[#allocation57_spill] sm:$0xff] %v5661_v0  ;;  %v5665_v17 = vpop.f32.mrf.mxu0  ;;  %v6812_v0 = vld [vmem:[#allocation65_spill] sm:$0xff] }
 0x1f9   : > { %6804 = vst [vmem:[#allocation55_spill] sm:$0xff] %v5663_v28  ;;  %2449 = vmatmul.f32.gmra.mxu3 %v6807_v60  ;;  %v6813_v28 = vand.u32 4294901760, %v6812_v0  ;;  %v6814_v60 = vld [vmem:[#allocation63_spill] sm:$0xff] }
 0x1fa   : > { %6805 = vst [vmem:[#allocation157_spill] sm:$0xff] %v5665_v17  ;;  %3813 = vmatmul.msk.f32.gmra.mxu1 %vm818_vm1, %v6808_v25  ;;  %2092 = vmatmul.f32.gmra.mxu2 %v6800_v41 }
 0x1fb   : > { %3748 = vmatmul.msk.f32.gmra.mxu0 %vm818_vm1, %v6802_v5 }
 0x1fc   : > { %v2001_v13 = vpop.f32.mrf.mxu3 }
 0x1fd   : > { %v1707_v53 = vpop.f32.mrf.mxu2 }
 0x1fe   : > { %v5674_v33 = vadd.f32 %v1997_v49, %v1707_v53 }
 0x1ff   : > { %v5676_v9 = vpop.f32.mrf.mxu1 }
 0x200   : > { %6809 = vst [vmem:[#allocation61_spill] sm:$0xff] %v5674_v33  ;;  %v5678_v10 = vpop.f32.mrf.mxu0  ;;  %v6818_v33 = vld [vmem:[#allocation69_spill] sm:$0xff] }
 0x201   : > { %6810 = vst [vmem:[#allocation59_spill] sm:$0xff] %v5676_v9  ;;  %2455 = vmatmul.f32.gmra.mxu3 %v6813_v28  ;;  %v6819_v9 = vand.u32 4294901760, %v6818_v33  ;;  %v6820_v28 = vld [vmem:[#allocation67_spill] sm:$0xff] }
 0x202   : > { %6811 = vst [vmem:[#allocation158_spill] sm:$0xff] %v5678_v10  ;;  %3814 = vmatmul.msk.f32.gmra.mxu1 %vm818_vm1, %v6814_v60  ;;  %2097 = vmatmul.f32.gmra.mxu2 %v6806_v4 }
 0x203   : > { %3749 = vmatmul.msk.f32.gmra.mxu0 %vm818_vm1, %v6808_v25 }
 0x204   : > { %v2005_v41 = vpop.f32.mrf.mxu3 }
 0x205   : > { %v1715_v5 = vpop.f32.mrf.mxu2 }
 0x206   : > { %v5687_v17 = vadd.f32 %v2001_v13, %v1715_v5 }
 0x207   : > { %v5689_v49 = vpop.f32.mrf.mxu1 }
 0x208   : > { %6815 = vst [vmem:[#allocation65_spill] sm:$0xff] %v5687_v17  ;;  %v5691_v53 = vpop.f32.mrf.mxu0  ;;  %v6823_v17 = vld [vmem:[#allocation74_spill] sm:$0xff] }
 0x209   : > { %6816 = vst [vmem:[#allocation63_spill] sm:$0xff] %v5689_v49  ;;  %2461 = vmatmul.f32.gmra.mxu3 %v6819_v9  ;;  %v6824_v49 = vand.u32 4294901760, %v6823_v17 }
 0x20a   : > { %6817 = vst [vmem:[#allocation159_spill] sm:$0xff] %v5691_v53  ;;  %3815 = vmatmul.msk.f32.gmra.mxu1 %vm818_vm1, %v6820_v28  ;;  %2102 = vmatmul.f32.gmra.mxu2 %v6812_v0  ;;  %v6825_v53 = vld [vmem:[#allocation71_spill] sm:$0xff] }
 0x20b   : > { %3750 = vmatmul.msk.f32.gmra.mxu0 %vm818_vm1, %v6814_v60 }
 0x20c   : > { %v2009_v4 = vpop.f32.mrf.mxu3 }
 0x20d   : > { %v1723_v25 = vpop.f32.mrf.mxu2 }
 0x20e   : > { %v5700_v10 = vadd.f32 %v2005_v41, %v1723_v25 }
 0x20f   : > { %v3048_v13 = vpop.f32.mrf.mxu1 }
 0x210   : > { %6821 = vst [vmem:[#allocation69_spill] sm:$0xff] %v5700_v10  ;;  %v5702_v5 = vpop.f32.mrf.mxu0  ;;  %v6827_v10 = vld [vmem:[#allocation82_spill] sm:$0xff] }
 0x211   : > { %6822 = vst [vmem:[#allocation67_spill] sm:$0xff] %v5702_v5  ;;  %2467 = vmatmul.f32.gmra.mxu3 %v6824_v49  ;;  %v6828_v5 = vand.u32 4294901760, %v6827_v10  ;;  %v6829_v49 = vld [vmem:[#allocation73_spill] sm:$0xff] }
 0x212   : > { %3816 = vmatmul.msk.f32.gmra.mxu1 %vm818_vm1, %v6825_v53  ;;  %2107 = vmatmul.f32.gmra.mxu2 %v6818_v33  ;;  %v6830_v33 = vld [vmem:[#allocation84_spill] sm:$0xff] }
 0x213   : > { %3751 = vmatmul.msk.f32.gmra.mxu0 %vm818_vm1, %v6820_v28  ;;  %v6831_v28 = vld [vmem:[#allocation78_spill] sm:$0xff] }
 0x214   : > { %v2372_v0 = vpop.f32.mrf.mxu3  ;;  %v1758_v7 = vadd.f32 %v6831_v28, %v6830_v33  ;;  %v6834_v33 = vld [vmem:[#allocation75_spill] sm:$0xff]  ;;  %v6835_v28 = vld [vmem:[#allocation90_spill] sm:$0xff] }
 0x215   : > { %v1731_v9 = vpop.f32.mrf.mxu2 }
 0x216   : > { %v5711_v60 = vadd.f32 %v2009_v4, %v1731_v9 }
 0x217   : > { %v3052_v41 = vpop.f32.mrf.mxu1 }
 0x218   : > { %6826 = vst [vmem:[#allocation74_spill] sm:$0xff] %v5711_v60  ;;  %v2774_v25 = vpop.f32.mrf.mxu0 }
 0x219   : > { %2473 = vmatmul.f32.gmra.mxu3 %v6828_v5 }
 0x21a   : > { %3817 = vmatmul.msk.f32.gmra.mxu1 %vm818_vm1, %v6829_v49  ;;  %2112 = vmatmul.f32.gmra.mxu2 %v6823_v17 }
 0x21b   : > { %3752 = vmatmul.msk.f32.gmra.mxu0 %vm818_vm1, %v6825_v53  ;;  %v6833_v53 = vand.u32 4294901760, %v6832_v30 }
 0x21c   : > { %v2378_v59 = vpop.f32.mrf.mxu3 }
 0x21d   : > { %v2033_v4 = vpop.f32.mrf.mxu2 }
 0x21e   : > { %v2034_v9 = vadd.f32 %v2033_v4, %v1758_v7  ;;  %v236_v7 = vld [vmem:[%s5727_s20] sm:$0xff] }
 0x21f   : > { %v3056_v60 = vpop.f32.mrf.mxu1  ;;  %v6836_v4 = vld [vmem:[#allocation83_spill] sm:$0xff] }
 0x220   : > { %v2373_v5 = vadd.f32 %v2372_v0, %v2034_v9  ;;  %v2778_v17 = vpop.f32.mrf.mxu0  ;;  %v1762_v18 = vadd.f32 %v6836_v4, %v6835_v28  ;;  %v6839_v28 = vld [vmem:[#allocation77_spill] sm:$0xff] }
 0x221   : > { %2479 = vmatmul.f32.gmra.mxu3 %v6833_v53 }
 0x222   : > { %v2775_v63 = vadd.f32 %v2774_v25, %v2373_v5  ;;  %3818 = vmatmul.msk.f32.gmra.mxu1 %vm818_vm1, %v6834_v33  ;;  %2117 = vmatmul.f32.gmra.mxu2 %v6827_v10  ;;  %v821_v5 = vpop.xlane.xlu1 %820 }
 0x223   : > { %3753 = vmatmul.msk.f32.gmra.mxu0 %vm818_vm1, %v6829_v49 }
 0x224   : > { %v3049_v0 = vadd.f32 %v3048_v13, %v2775_v63  ;;  %v2384_v9 = vpop.f32.mrf.mxu3  ;;  %v6840_v63 = vld [vmem:[#allocation96_spill] sm:$0xff] }
 0x225   : > { %v2038_v62 = vpop.f32.mrf.mxu2 }
 0x226   : > { %v3303_v53 = vadd.f32 %v3049_v0, %v236_v7  ;;  %v2039_v25 = vadd.f32 %v2038_v62, %v1762_v18  ;;  %v237_v62 = vld [vmem:[%s5727_s20 + $0x8] sm:$0xff] }
 0x227   : > { %v3060_v23 = vpop.f32.mrf.mxu1 }
 0x228   : > { %v3367_v24 = vmul.f32 %v3303_v53, %v821_v5  ;;  %v2379_v61 = vadd.f32 %v2378_v59, %v2039_v25  ;;  %v2782_v10 = vpop.f32.mrf.mxu0  ;;  %v6841_v59 = vld [vmem:[#allocation89_spill] sm:$0xff] }
 0x229   : > { %2485 = vmatmul.f32.gmra.mxu3 %v6838_v20  ;;  %v1766_v18 = vadd.f32 %v6841_v59, %v6840_v63 }
 0x22a   : > { %3431 = vst [vmem:[%s5744_s27] sm:$0xff] %v3367_v24  ;;  %v2779_v49 = vadd.f32 %v2778_v17, %v2379_v61  ;;  %3819 = vmatmul.msk.f32.gmra.mxu1 %vm818_vm1, %v6839_v28  ;;  %2122 = vmatmul.f32.gmra.mxu2 %v6832_v30  ;;  %v824_v61 = vpop.xlane.xlu2 %823  ;;  %v6842_v30 = vand.u32 4294901760, %v5021_v22 }
 0x22b   : > { %3754 = vmatmul.msk.f32.gmra.mxu0 %vm818_vm1, %v6834_v33  ;;  %v6843_v33 = vld [vmem:[#allocation81_spill] sm:$0xff] }
 0x22c   : > { %v3053_v20 = vadd.f32 %v3052_v41, %v2779_v49  ;;  %v2390_v13 = vpop.f32.mrf.mxu3  ;;  %v238_v41 = vld [vmem:[%s5727_s20 + $0x10] sm:$0xff] }
 0x22d   : > { %v2043_v7 = vpop.f32.mrf.mxu2  ;;  %v6844_v49 = vld [vmem:[#allocation101_spill] sm:$0xff] }
 0x22e   : > { %v3304_v4 = vadd.f32 %v3053_v20, %v237_v62  ;;  %v2044_v24 = vadd.f32 %v2043_v7, %v1766_v18  ;;  %v6845_v62 = vld [vmem:[#allocation95_spill] sm:$0xff] }
 0x22f   : > { %v3064_v17 = vpop.f32.mrf.mxu1  ;;  %v1770_v63 = vadd.f32 %v6845_v62, %v6844_v49 }
 0x230   : > { %v3368_v0 = vmul.f32 %v3304_v4, %v824_v61  ;;  %v2385_v53 = vadd.f32 %v2384_v9, %v2044_v24  ;;  %v2786_v25 = vpop.f32.mrf.mxu0 }
 0x231   : > { %2491 = vmatmul.f32.gmra.mxu3 %v6842_v30  ;;  %v6848_v30 = vld [vmem:[#allocation100_spill] sm:$0xff] }
 0x232   : > { %3432 = vst [vmem:[%s5744_s27 + $0x8] sm:$0xff] %v3368_v0  ;;  %v2783_v5 = vadd.f32 %v2782_v10, %v2385_v53  ;;  %3820 = vmatmul.msk.f32.gmra.mxu1 %vm818_vm1, %v6843_v33  ;;  %2127 = vmatmul.f32.gmra.mxu2 %v6837_v21  ;;  %v827_v10 = vpop.xlane.xlu0 %826  ;;  %v6846_v21 = vand.u32 4294901760, %v5063_v56 }
 0x233   : > { %3755 = vmatmul.msk.f32.gmra.mxu0 %vm818_vm1, %v6839_v28  ;;  %v6847_v28 = vld [vmem:[#allocation106_spill] sm:$0xff] }
 0x234   : > { %v3057_v9 = vadd.f32 %v3056_v60, %v2783_v5  ;;  %v2396_v59 = vpop.f32.mrf.mxu3  ;;  %v239_v60 = vld [vmem:[%s5727_s20 + $0x18] sm:$0xff]  ;;  %v1774_v5 = vadd.f32 %v6848_v30, %v6847_v28 }
 0x235   : > { %v2048_v18 = vpop.f32.mrf.mxu2 }
 0x236   : > { %v3305_v20 = vadd.f32 %v3057_v9, %v238_v41  ;;  %v2049_v7 = vadd.f32 %v2048_v18, %v1770_v63 }
 0x237   : > { %v3068_v4 = vpop.f32.mrf.mxu1 }
 0x238   : > { %v3369_v24 = vmul.f32 %v3305_v20, %v827_v10  ;;  %v2391_v61 = vadd.f32 %v2390_v13, %v2049_v7  ;;  %v2790_v0 = vpop.f32.mrf.mxu0 }
 0x239   : > { %2497 = vmatmul.f32.gmra.mxu3 %v6846_v21 }
 0x23a   : > { %3433 = vst [vmem:[%s5744_s27 + $0x10] sm:$0xff] %v3369_v24  ;;  %v2787_v53 = vadd.f32 %v2786_v25, %v2391_v61  ;;  %3821 = vmatmul.msk.f32.gmra.mxu1 %vm818_vm1, %v4862_v55  ;;  %2132 = vmatmul.f32.gmra.mxu2 %v5021_v22  ;;  %v830_v25 = vpop.xlane.xlu2 %829  ;;  %v6849_v22 = vand.u32 4294901760, %v5107_v26 }
 0x23b   : > { %3756 = vmatmul.msk.f32.gmra.mxu0 %vm818_vm1, %v6843_v33  ;;  %v6850_v33 = vld [vmem:[#allocation105_spill] sm:$0xff] }
 0x23c   : > { %v3061_v13 = vadd.f32 %v3060_v23, %v2787_v53  ;;  %v2402_v41 = vpop.f32.mrf.mxu3  ;;  %v240_v23 = vld [vmem:[%s5727_s20 + $0x20] sm:$0xff]  ;;  %v1778_v24 = vadd.f32 %v6850_v33, %v5118_v31  ;;  %v1782_v31 = vadd.f32 %v5114_v35, %v5158_v37  ;;  %v1786_v35 = vadd.f32 %v5154_v27, %v5198_v50 }
 0x23d   : > { %v2053_v49 = vpop.f32.mrf.mxu2  ;;  %v1790_v27 = vadd.f32 %v5194_v44, %v5238_v54  ;;  %v1794_v44 = vadd.f32 %v5234_v40, %v5280_v3  ;;  %v1798_v40 = vadd.f32 %v5274_v58, %v5320_v16  ;;  %v1802_v58 = vadd.f32 %v5316_v48, %v5360_v14 }
 0x23e   : > { %v3306_v62 = vadd.f32 %v3061_v13, %v239_v60  ;;  %v2054_v63 = vadd.f32 %v2053_v49, %v1774_v5  ;;  %v1806_v48 = vadd.f32 %v5356_v51, %v5400_v19  ;;  %v6859_v51 = vld [vmem:[#allocation131_spill] sm:$0xff] }
 0x23f   : > { %v3072_v9 = vpop.f32.mrf.mxu1  ;;  %v1810_v19 = vadd.f32 %v6859_v51, %v5439_v34  ;;  %v6861_v34 = vld [vmem:[#allocation139_spill] sm:$0xff] }
 0x240   : > { %v3370_v18 = vmul.f32 %v3306_v62, %v830_v25  ;;  %v2397_v20 = vadd.f32 %v2396_v59, %v2054_v63  ;;  %v2794_v7 = vpop.f32.mrf.mxu0  ;;  %v6873_v51 = vld [vmem:[#allocation15_spill] sm:$0xff] }
 0x241   : > { %2503 = vmatmul.f32.gmra.mxu3 %v6849_v22 }
 0x242   : > { %3434 = vst [vmem:[%s5744_s27 + $0x18] sm:$0xff] %v3370_v18  ;;  %v2791_v10 = vadd.f32 %v2790_v0, %v2397_v20  ;;  %3822 = vmatmul.msk.f32.gmra.mxu1 %vm818_vm1, %v4868_v2  ;;  %2137 = vmatmul.f32.gmra.mxu2 %v5063_v56  ;;  %v833_v0 = vpop.xlane.xlu1 %832  ;;  %v6851_v56 = vand.u32 4294901760, %v5147_v8  ;;  %v836_v18 = vpop.xlane.xlu2 %835 }
 0x243   : > { %3757 = vmatmul.msk.f32.gmra.mxu0 %vm818_vm1, %v4862_v55  ;;  %v241_v55 = vld [vmem:[%s5727_s20 + $0x28] sm:$0xff] }
 0x244   : > { %v3065_v59 = vadd.f32 %v3064_v17, %v2791_v10  ;;  %v2408_v61 = vpop.f32.mrf.mxu3 }
 0x245   : > { %v2058_v21 = vpop.f32.mrf.mxu2 }
 0x246   : > { %v3307_v53 = vadd.f32 %v3065_v59, %v240_v23  ;;  %v2059_v60 = vadd.f32 %v2058_v21, %v1778_v24 }
 0x247   : > { %v3076_v28 = vpop.f32.mrf.mxu1 }
 0x248   : > { %v3371_v30 = vmul.f32 %v3307_v53, %v833_v0  ;;  %v2403_v5 = vadd.f32 %v2402_v41, %v2059_v60  ;;  %v2798_v13 = vpop.f32.mrf.mxu0 }
 0x249   : > { %2509 = vmatmul.f32.gmra.mxu3 %v6851_v56 }
 0x24a   : > { %3435 = vst [vmem:[%s5744_s27 + $0x20] sm:$0xff] %v3371_v30  ;;  %v2795_v49 = vadd.f32 %v2794_v7, %v2403_v5  ;;  %3823 = vmatmul.msk.f32.gmra.mxu1 %vm818_vm1, %v4906_v1  ;;  %2142 = vmatmul.f32.gmra.mxu2 %v5107_v26  ;;  %v6852_v26 = vand.u32 4294901760, %v5183_v12 }
 0x24b   : > { %3758 = vmatmul.msk.f32.gmra.mxu0 %vm818_vm1, %v4868_v2  ;;  %v242_v2 = vld [vmem:[%s5727_s20 + $0x30] sm:$0xff] }
 0x24c   : > { %v3069_v17 = vadd.f32 %v3068_v4, %v2795_v49  ;;  %v2414_v41 = vpop.f32.mrf.mxu3  ;;  %v842_v49 = vpop.xlane.xlu1 %841 }
 0x24d   : > { %v2063_v62 = vpop.f32.mrf.mxu2 }
 0x24e   : > { %v3308_v63 = vadd.f32 %v3069_v17, %v241_v55  ;;  %v2064_v25 = vadd.f32 %v2063_v62, %v1782_v31 }
 0x24f   : > { %v3080_v20 = vpop.f32.mrf.mxu1 }
 0x250   : > { %v3372_v7 = vmul.f32 %v3308_v63, %v836_v18  ;;  %v2409_v22 = vadd.f32 %v2408_v61, %v2064_v25  ;;  %v2802_v10 = vpop.f32.mrf.mxu0  ;;  %v839_v61 = vpop.xlane.xlu0 %838 }
 0x251   : > { %2515 = vmatmul.f32.gmra.mxu3 %v6852_v26 }
 0x252   : > { %3436 = vst [vmem:[%s5744_s27 + $0x28] sm:$0xff] %v3372_v7  ;;  %v2799_v23 = vadd.f32 %v2798_v13, %v2409_v22  ;;  %3824 = vmatmul.msk.f32.gmra.mxu1 %vm818_vm1, %v4916_v15  ;;  %2147 = vmatmul.f32.gmra.mxu2 %v5147_v8  ;;  %v6853_v8 = vand.u32 4294901760, %v5223_v39  ;;  %v845_v7 = vpop.xlane.xlu2 %844 }
 0x253   : > { %3759 = vmatmul.msk.f32.gmra.mxu0 %vm818_vm1, %v4906_v1  ;;  %v243_v1 = vld [vmem:[%s5727_s20 + $0x38] sm:$0xff] }
 0x254   : > { %v3073_v37 = vadd.f32 %v3072_v9, %v2799_v23  ;;  %v2420_v4 = vpop.f32.mrf.mxu3 }
 0x255   : > { %v2068_v33 = vpop.f32.mrf.mxu2 }
 0x256   : > { %v3309_v24 = vadd.f32 %v3073_v37, %v242_v2  ;;  %v2069_v59 = vadd.f32 %v2068_v33, %v1786_v35 }
 0x257   : > { %v3084_v21 = vpop.f32.mrf.mxu1 }
 0x258   : > { %v3373_v53 = vmul.f32 %v3309_v24, %v839_v61  ;;  %v2415_v60 = vadd.f32 %v2414_v41, %v2069_v59  ;;  %v2806_v0 = vpop.f32.mrf.mxu0  ;;  %v848_v33 = vpop.xlane.xlu0 %847 }
 0x259   : > { %2521 = vmatmul.f32.gmra.mxu3 %v6853_v8 }
 0x25a   : > { %3437 = vst [vmem:[%s5744_s27 + $0x30] sm:$0xff] %v3373_v53  ;;  %v2803_v30 = vadd.f32 %v2802_v10, %v2415_v60  ;;  %3825 = vmatmul.msk.f32.gmra.mxu1 %vm818_vm1, %v4926_v57  ;;  %2152 = vmatmul.f32.gmra.mxu2 %v5183_v12  ;;  %v6854_v12 = vand.u32 4294901760, %v5263_v42 }
 0x25b   : > { %3760 = vmatmul.msk.f32.gmra.mxu0 %vm818_vm1, %v4916_v15  ;;  %v244_v15 = vld [vmem:[%s5727_s20 + $0x40] sm:$0xff] }
 0x25c   : > { %v3077_v50 = vadd.f32 %v3076_v28, %v2803_v30  ;;  %v2426_v9 = vpop.f32.mrf.mxu3 }
 0x25d   : > { %v2073_v5 = vpop.f32.mrf.mxu2 }
 0x25e   : > { %v3310_v13 = vadd.f32 %v3077_v50, %v243_v1  ;;  %v2074_v56 = vadd.f32 %v2073_v5, %v1790_v27  ;;  %v851_v1 = vpop.xlane.xlu1 %850 }
 0x25f   : > { %v3088_v55 = vpop.f32.mrf.mxu1 }
 0x260   : > { %v3374_v31 = vmul.f32 %v3310_v13, %v842_v49  ;;  %v2421_v17 = vadd.f32 %v2420_v4, %v2074_v56  ;;  %v2810_v41 = vpop.f32.mrf.mxu0 }
 0x261   : > { %2527 = vmatmul.f32.gmra.mxu3 %v6854_v12 }
 0x262   : > { %3438 = vst [vmem:[%s5744_s27 + $0x38] sm:$0xff] %v3374_v31  ;;  %v2807_v62 = vadd.f32 %v2806_v0, %v2421_v17  ;;  %3826 = vmatmul.msk.f32.gmra.mxu1 %vm818_vm1, %v4965_v52  ;;  %2157 = vmatmul.f32.gmra.mxu2 %v5223_v39  ;;  %v6855_v39 = vand.u32 4294901760, %v5305_v38  ;;  %v854_v17 = vpop.xlane.xlu2 %853 }
 0x263   : > { %3761 = vmatmul.msk.f32.gmra.mxu0 %vm818_vm1, %v4926_v57  ;;  %v245_v57 = vld [vmem:[%s5727_s20 + $0x48] sm:$0xff] }
 0x264   : > { %v3081_v54 = vadd.f32 %v3080_v20, %v2807_v62  ;;  %v2432_v28 = vpop.f32.mrf.mxu3 }
 0x265   : > { %v2078_v63 = vpop.f32.mrf.mxu2 }
 0x266   : > { %v3311_v25 = vadd.f32 %v3081_v54, %v244_v15  ;;  %v2079_v18 = vadd.f32 %v2078_v63, %v1794_v44 }
 0x267   : > { %v3092_v22 = vpop.f32.mrf.mxu1 }
 0x268   : > { %v3375_v10 = vmul.f32 %v3311_v25, %v845_v7  ;;  %v2427_v26 = vadd.f32 %v2426_v9, %v2079_v18  ;;  %v2814_v23 = vpop.f32.mrf.mxu0  ;;  %v857_v7 = vpop.xlane.xlu0 %856 }
 0x269   : > { %2533 = vmatmul.f32.gmra.mxu3 %v6855_v39 }
 0x26a   : > { %3439 = vst [vmem:[%s5744_s27 + $0x40] sm:$0xff] %v3375_v10  ;;  %v2811_v2 = vadd.f32 %v2810_v41, %v2427_v26  ;;  %3827 = vmatmul.msk.f32.gmra.mxu1 %vm818_vm1, %v4974_v11  ;;  %2162 = vmatmul.f32.gmra.mxu2 %v5263_v42  ;;  %v6856_v42 = vand.u32 4294901760, %v5345_v36 }
 0x26b   : > { %3762 = vmatmul.msk.f32.gmra.mxu0 %vm818_vm1, %v4965_v52  ;;  %v246_v52 = vld [vmem:[%s5727_s20 + $0x50] sm:$0xff] }
 0x26c   : > { %v3085_v3 = vadd.f32 %v3084_v21, %v2811_v2  ;;  %v2438_v20 = vpop.f32.mrf.mxu3  ;;  %v6862_v2 = vld [vmem:[#allocation135_spill] sm:$0xff] }
 0x26d   : > { %v2083_v35 = vpop.f32.mrf.mxu2 }
 0x26e   : > { %v3312_v37 = vadd.f32 %v3085_v3, %v245_v57  ;;  %v2084_v4 = vadd.f32 %v2083_v35, %v1798_v40  ;;  %v1814_v57 = vadd.f32 %v6862_v2, %v6861_v34 }
 0x26f   : > { %v3096_v24 = vpop.f32.mrf.mxu1 }
 0x270   : > { %v3376_v59 = vmul.f32 %v3312_v37, %v848_v33  ;;  %v2433_v61 = vadd.f32 %v2432_v28, %v2084_v4  ;;  %v2818_v53 = vpop.f32.mrf.mxu0  ;;  %v860_v4 = vpop.xlane.xlu1 %859 }
 0x271   : > { %2539 = vmatmul.f32.gmra.mxu3 %v6856_v42 }
 0x272   : > { %3440 = vst [vmem:[%s5744_s27 + $0x48] sm:$0xff] %v3376_v59  ;;  %v2815_v60 = vadd.f32 %v2814_v23, %v2433_v61  ;;  %3828 = vmatmul.msk.f32.gmra.mxu1 %vm818_vm1, %v4990_v47  ;;  %2167 = vmatmul.f32.gmra.mxu2 %v5305_v38  ;;  %v6857_v38 = vand.u32 4294901760, %v5385_v29 }
 0x273   : > { %3763 = vmatmul.msk.f32.gmra.mxu0 %vm818_vm1, %v4974_v11  ;;  %v247_v11 = vld [vmem:[%s5727_s20 + $0x58] sm:$0xff] }
 0x274   : > { %v3089_v16 = vadd.f32 %v3088_v55, %v2815_v60  ;;  %v2444_v21 = vpop.f32.mrf.mxu3  ;;  %v250_v60 = vld [vmem:[%s5727_s20 + $0x70] sm:$0xff] }
 0x275   : > { %v2088_v0 = vpop.f32.mrf.mxu2 }
 0x276   : > { %v3313_v8 = vadd.f32 %v3089_v16, %v246_v52  ;;  %v2089_v30 = vadd.f32 %v2088_v0, %v1802_v58  ;;  %v6866_v52 = vld [vmem:[#allocation142_spill] sm:$0xff] }
 0x277   : > { %v3100_v27 = vpop.f32.mrf.mxu1  ;;  %v6867_v58 = vld [vmem:[#allocation138_spill] sm:$0xff] }
 0x278   : > { %v3377_v50 = vmul.f32 %v3313_v8, %v851_v1  ;;  %v2439_v9 = vadd.f32 %v2438_v20, %v2089_v30  ;;  %v2822_v5 = vpop.f32.mrf.mxu0  ;;  %v1818_v16 = vadd.f32 %v6867_v58, %v6866_v52 }
 0x279   : > { %2545 = vmatmul.f32.gmra.mxu3 %v6857_v38 }
 0x27a   : > { %3441 = vst [vmem:[%s5744_s27 + $0x50] sm:$0xff] %v3377_v50  ;;  %v2819_v13 = vadd.f32 %v2818_v53, %v2439_v9  ;;  %3829 = vmatmul.msk.f32.gmra.mxu1 %vm818_vm1, %v5033_v32  ;;  %2172 = vmatmul.f32.gmra.mxu2 %v5345_v36  ;;  %v6858_v36 = vand.u32 4294901760, %v5424_v43  ;;  %v6863_v53 = vld [vmem:[#allocation10_spill] sm:$0xff] }
 0x27b   : > { %3764 = vmatmul.msk.f32.gmra.mxu0 %vm818_vm1, %v4990_v47  ;;  %v248_v47 = vld [vmem:[%s5727_s20 + $0x60] sm:$0xff] }
 0x27c   : > { %v3093_v14 = vadd.f32 %v3092_v22, %v2819_v13  ;;  %v2450_v56 = vpop.f32.mrf.mxu3  ;;  %v6868_v13 = vld [vmem:[#allocation14_spill] sm:$0xff] }
 0x27d   : > { %v2093_v49 = vpop.f32.mrf.mxu2 }
 0x27e   : > { %v3314_v55 = vadd.f32 %v3093_v14, %v247_v11  ;;  %v2094_v31 = vadd.f32 %v2093_v49, %v1806_v48  ;;  %v251_v48 = vld [vmem:[%s5727_s20 + $0x78] sm:$0xff]  ;;  %v6871_v14 = vld [vmem:[#allocation145_spill] sm:$0xff] }
 0x27f   : > { %v3104_v41 = vpop.f32.mrf.mxu1 }
 0x280   : > { %v3378_v12 = vmul.f32 %v3314_v55, %v854_v17  ;;  %v2445_v62 = vadd.f32 %v2444_v21, %v2094_v31  ;;  %v2826_v15 = vpop.f32.mrf.mxu0 }
 0x281   : > { %2551 = vmatmul.f32.gmra.mxu3 %v6858_v36 }
 0x282   : > { %3442 = vst [vmem:[%s5744_s27 + $0x58] sm:$0xff] %v3378_v12  ;;  %v2823_v44 = vadd.f32 %v2822_v5, %v2445_v62  ;;  %3830 = vmatmul.msk.f32.gmra.mxu1 %vm818_vm1, %v5024_v6  ;;  %2177 = vmatmul.f32.gmra.mxu2 %v5385_v29  ;;  %v6860_v29 = vand.u32 4294901760, %v5462_v46  ;;  %v866_v62 = vpop.xlane.xlu0 %865 }
 0x283   : > { %3765 = vmatmul.msk.f32.gmra.mxu0 %vm818_vm1, %v5033_v32  ;;  %v249_v32 = vld [vmem:[%s5727_s20 + $0x68] sm:$0xff] }
 0x284   : > { %v3097_v54 = vadd.f32 %v3096_v24, %v2823_v44  ;;  %v2456_v28 = vpop.f32.mrf.mxu3 }
 0x285   : > { %v2098_v63 = vpop.f32.mrf.mxu2 }
 0x286   : > { %v3315_v25 = vadd.f32 %v3097_v54, %v248_v47  ;;  %v2099_v18 = vadd.f32 %v2098_v63, %v1810_v19  ;;  %v6874_v19 = vand.u32 4294901760, %v6873_v51  ;;  %v252_v63 = vld [vmem:[%s5727_s20 + $0x80] sm:$0xff] }
 0x287   : > { %v3108_v22 = vpop.f32.mrf.mxu1 }
 0x288   : > { %v3379_v10 = vmul.f32 %v3315_v25, %v857_v7  ;;  %v2451_v26 = vadd.f32 %v2450_v56, %v2099_v18  ;;  %v2830_v23 = vpop.f32.mrf.mxu0  ;;  %v6872_v56 = vld [vmem:[#allocation141_spill] sm:$0xff]  ;;  %v6876_v25 = vld [vmem:[#allocation146_spill] sm:$0xff]  ;;  %v6877_v18 = vld [vmem:[#allocation144_spill] sm:$0xff] }
 0x289   : > { %2557 = vmatmul.f32.gmra.mxu3 %v6860_v29  ;;  %v1822_v49 = vadd.f32 %v6872_v56, %v6871_v14  ;;  %v1826_v7 = vadd.f32 %v6877_v18, %v6876_v25 }
 0x28a   : > { %3443 = vst [vmem:[%s5744_s27 + $0x60] sm:$0xff] %v3379_v10  ;;  %v2827_v39 = vadd.f32 %v2826_v15, %v2451_v26  ;;  %3831 = vmatmul.msk.f32.gmra.mxu1 %vm818_vm1, %v5076_v45  ;;  %2182 = vmatmul.f32.gmra.mxu2 %v5424_v43  ;;  %v6864_v43 = vand.u32 4294901760, %v6863_v53 }
 0x28b   : > { %3766 = vmatmul.msk.f32.gmra.mxu0 %vm818_vm1, %v5024_v6  ;;  %v6865_v6 = vld [vmem:[#allocation9_spill] sm:$0xff] }
 0x28c   : > { %v3101_v40 = vadd.f32 %v3100_v27, %v2827_v39  ;;  %v2462_v3 = vpop.f32.mrf.mxu3  ;;  %v863_v27 = vpop.xlane.xlu2 %862 }
 0x28d   : > { %v2103_v20 = vpop.f32.mrf.mxu2  ;;  %v869_v39 = vpop.xlane.xlu1 %868 }
 0x28e   : > { %v3316_v35 = vadd.f32 %v3101_v40, %v249_v32  ;;  %v2104_v37 = vadd.f32 %v2103_v20, %v1814_v57  ;;  %v6878_v40 = vld [vmem:[#allocation20_spill] sm:$0xff] }
 0x28f   : > { %v3112_v33 = vpop.f32.mrf.mxu1 }
 0x290   : > { %v3380_v24 = vmul.f32 %v3316_v35, %v860_v4  ;;  %v2457_v59 = vadd.f32 %v2456_v28, %v2104_v37  ;;  %v2834_v61 = vpop.f32.mrf.mxu0  ;;  %v6875_v28 = vld [vmem:[#allocation13_spill] sm:$0xff]  ;;  %v6880_v35 = vld [vmem:[#allocation16_spill] sm:$0xff]  ;;  %v6881_v4 = vld [vmem:[#allocation147_spill] sm:$0xff] }
 0x291   : > { %2563 = vmatmul.f32.gmra.mxu3 %v6864_v43  ;;  %v253_v37 = vld [vmem:[%s5727_s20 + $0x88] sm:$0xff] }
 0x292   : > { %3444 = vst [vmem:[%s5744_s27 + $0x68] sm:$0xff] %v3380_v24  ;;  %v2831_v42 = vadd.f32 %v2830_v23, %v2457_v59  ;;  %3832 = vmatmul.msk.f32.gmra.mxu1 %vm818_vm1, %v6865_v6  ;;  %2187 = vmatmul.f32.gmra.mxu2 %v5462_v46  ;;  %v6869_v46 = vand.u32 4294901760, %v6868_v13 }
 0x293   : > { %3767 = vmatmul.msk.f32.gmra.mxu0 %vm818_vm1, %v5076_v45  ;;  %v6870_v45 = vld [vmem:[#allocation12_spill] sm:$0xff] }
 0x294   : > { %v3105_v21 = vadd.f32 %v3104_v41, %v2831_v42  ;;  %v2468_v0 = vpop.f32.mrf.mxu3 }
 0x295   : > { %v2108_v8 = vpop.f32.mrf.mxu2 }
 0x296   : > { %v3317_v30 = vadd.f32 %v3105_v21, %v250_v60  ;;  %v2109_v1 = vadd.f32 %v2108_v8, %v1818_v16  ;;  %v6883_v21 = vld [vmem:[#allocation24_spill] sm:$0xff] }
 0x297   : > { %v3116_v50 = vpop.f32.mrf.mxu1 }
 0x298   : > { %v3381_v9 = vmul.f32 %v3317_v30, %v863_v27  ;;  %v2463_v5 = vadd.f32 %v2462_v3, %v2109_v1  ;;  %v2838_v38 = vpop.f32.mrf.mxu0  ;;  %v6879_v3 = vand.u32 4294901760, %v6878_v40  ;;  %v6885_v30 = vld [vmem:[#allocation22_spill] sm:$0xff]  ;;  %v6886_v27 = vld [vmem:[#allocation148_spill] sm:$0xff] }
 0x299   : > { %2569 = vmatmul.f32.gmra.mxu3 %v6869_v46  ;;  %v254_v1 = vld [vmem:[%s5727_s20 + $0x90] sm:$0xff] }
 0x29a   : > { %3445 = vst [vmem:[%s5744_s27 + $0x70] sm:$0xff] %v3381_v9  ;;  %v2835_v11 = vadd.f32 %v2834_v61, %v2463_v5  ;;  %3833 = vmatmul.msk.f32.gmra.mxu1 %vm818_vm1, %v6870_v45  ;;  %2192 = vmatmul.f32.gmra.mxu2 %v6863_v53 }
 0x29b   : > { %3768 = vmatmul.msk.f32.gmra.mxu0 %vm818_vm1, %v6865_v6  ;;  %v872_v6 = vpop.xlane.xlu2 %871 }
 0x29c   : > { %v3109_v55 = vadd.f32 %v3108_v22, %v2835_v11  ;;  %v2474_v31 = vpop.f32.mrf.mxu3 }
 0x29d   : > { %v2113_v17 = vpop.f32.mrf.mxu2 }
 0x29e   : > { %v3318_v41 = vadd.f32 %v3109_v55, %v251_v48  ;;  %v2114_v12 = vadd.f32 %v2113_v17, %v1822_v49  ;;  %v6888_v55 = vld [vmem:[#allocation28_spill] sm:$0xff] }
 0x29f   : > { %v3120_v15 = vpop.f32.mrf.mxu1 }
 0x2a0   : > { %v3382_v36 = vmul.f32 %v3318_v41, %v866_v62  ;;  %v2469_v44 = vadd.f32 %v2468_v0, %v2114_v12  ;;  %v2842_v47 = vpop.f32.mrf.mxu0  ;;  %v6884_v0 = vand.u32 4294901760, %v6883_v21  ;;  %v6890_v41 = vld [vmem:[#allocation26_spill] sm:$0xff]  ;;  %v6891_v62 = vld [vmem:[#allocation149_spill] sm:$0xff] }
 0x2a1   : > { %2575 = vmatmul.f32.gmra.mxu3 %v6874_v19  ;;  %v255_v12 = vld [vmem:[%s5727_s20 + $0x98] sm:$0xff] }
 0x2a2   : > { %3446 = vst [vmem:[%s5744_s27 + $0x78] sm:$0xff] %v3382_v36  ;;  %v2839_v54 = vadd.f32 %v2838_v38, %v2469_v44  ;;  %3834 = vmatmul.msk.f32.gmra.mxu1 %vm818_vm1, %v6875_v28  ;;  %2197 = vmatmul.f32.gmra.mxu2 %v6868_v13 }
 0x2a3   : > { %3769 = vmatmul.msk.f32.gmra.mxu0 %vm818_vm1, %v6870_v45  ;;  %v875_v45 = vpop.xlane.xlu0 %874 }
 0x2a4   : > { %v3113_v22 = vadd.f32 %v3112_v33, %v2839_v54  ;;  %v2480_v10 = vpop.f32.mrf.mxu3  ;;  %v6882_v33 = vld [vmem:[#allocation8_spill] sm:$0xff] }
 0x2a5   : > { %v2118_v26 = vpop.f32.mrf.mxu2  ;;  %v1830_v24 = vadd.f32 %v6882_v33, %v6881_v4 }
 0x2a6   : > { %v3319_v23 = vadd.f32 %v3113_v22, %v252_v63  ;;  %v2119_v29 = vadd.f32 %v2118_v26, %v1826_v7  ;;  %v6893_v22 = vld [vmem:[#allocation32_spill] sm:$0xff] }
 0x2a7   : > { %v3124_v32 = vpop.f32.mrf.mxu1 }
 0x2a8   : > { %v3383_v34 = vmul.f32 %v3319_v23, %v869_v39  ;;  %v2475_v2 = vadd.f32 %v2474_v31, %v2119_v29  ;;  %v2846_v57 = vpop.f32.mrf.mxu0  ;;  %v6889_v31 = vand.u32 4294901760, %v6888_v55  ;;  %v6895_v23 = vld [vmem:[#allocation30_spill] sm:$0xff]  ;;  %v256_v29 = vld [vmem:[%s5727_s20 + $0xa0] sm:$0xff] }
 0x2a9   : > { %2581 = vmatmul.f32.gmra.mxu3 %v6879_v3  ;;  %v6896_v39 = vld [vmem:[#allocation150_spill] sm:$0xff] }
 0x2aa   : > { %3447 = vst [vmem:[%s5744_s27 + $0x80] sm:$0xff] %v3383_v34  ;;  %v2843_v20 = vadd.f32 %v2842_v47, %v2475_v2  ;;  %3835 = vmatmul.msk.f32.gmra.mxu1 %vm818_vm1, %v6880_v35  ;;  %2202 = vmatmul.f32.gmra.mxu2 %v6873_v51 }
 0x2ab   : > { %3770 = vmatmul.msk.f32.gmra.mxu0 %vm818_vm1, %v6875_v28  ;;  %v878_v28 = vpop.xlane.xlu1 %877 }
 0x2ac   : > { %v3117_v59 = vadd.f32 %v3116_v50, %v2843_v20  ;;  %v2486_v61 = vpop.f32.mrf.mxu3  ;;  %v6887_v50 = vld [vmem:[#allocation18_spill] sm:$0xff] }
 0x2ad   : > { %v2123_v53 = vpop.f32.mrf.mxu2  ;;  %v1834_v9 = vadd.f32 %v6887_v50, %v6886_v27 }
 0x2ae   : > { %v3320_v43 = vadd.f32 %v3117_v59, %v253_v37  ;;  %v2124_v42 = vadd.f32 %v2123_v53, %v1830_v24  ;;  %v6898_v59 = vld [vmem:[#allocation36_spill] sm:$0xff] }
 0x2af   : > { %v3128_v60 = vpop.f32.mrf.mxu1 }
 0x2b0   : > { %v3384_v52 = vmul.f32 %v3320_v43, %v872_v6  ;;  %v2481_v58 = vadd.f32 %v2480_v10, %v2124_v42  ;;  %v2850_v16 = vpop.f32.mrf.mxu0  ;;  %v6894_v10 = vand.u32 4294901760, %v6893_v22  ;;  %v6900_v43 = vld [vmem:[#allocation34_spill] sm:$0xff]  ;;  %v257_v42 = vld [vmem:[%s5727_s20 + $0xa8] sm:$0xff]  ;;  %v6901_v6 = vld [vmem:[#allocation151_spill] sm:$0xff] }
 0x2b1   : > { %2587 = vmatmul.f32.gmra.mxu3 %v6884_v0 }
 0x2b2   : > { %3448 = vst [vmem:[%s5744_s27 + $0x88] sm:$0xff] %v3384_v52  ;;  %v2847_v8 = vadd.f32 %v2846_v57, %v2481_v58  ;;  %3836 = vmatmul.msk.f32.gmra.mxu1 %vm818_vm1, %v6885_v30  ;;  %2207 = vmatmul.f32.gmra.mxu2 %v6878_v40 }
 0x2b3   : > { %3771 = vmatmul.msk.f32.gmra.mxu0 %vm818_vm1, %v6880_v35  ;;  %v881_v35 = vpop.xlane.xlu2 %880 }
 0x2b4   : > { %v3121_v5 = vadd.f32 %v3120_v15, %v2847_v8  ;;  %v2492_v38 = vpop.f32.mrf.mxu3  ;;  %v6892_v15 = vld [vmem:[#allocation17_spill] sm:$0xff] }
 0x2b5   : > { %v2128_v13 = vpop.f32.mrf.mxu2  ;;  %v1838_v36 = vadd.f32 %v6892_v15, %v6891_v62 }
 0x2b6   : > { %v3321_v46 = vadd.f32 %v3121_v5, %v254_v1  ;;  %v2129_v11 = vadd.f32 %v2128_v13, %v1834_v9  ;;  %v6903_v5 = vld [vmem:[#allocation40_spill] sm:$0xff] }
 0x2b7   : > { %v3132_v48 = vpop.f32.mrf.mxu1 }
 0x2b8   : > { %v3385_v14 = vmul.f32 %v3321_v46, %v875_v45  ;;  %v2487_v56 = vadd.f32 %v2486_v61, %v2129_v11  ;;  %v2854_v49 = vpop.f32.mrf.mxu0  ;;  %v6899_v61 = vand.u32 4294901760, %v6898_v59  ;;  %v6905_v46 = vld [vmem:[#allocation38_spill] sm:$0xff]  ;;  %v6906_v45 = vld [vmem:[#allocation152_spill] sm:$0xff] }
 0x2b9   : > { %2593 = vmatmul.f32.gmra.mxu3 %v6889_v31  ;;  %v258_v11 = vld [vmem:[%s5727_s20 + $0xb0] sm:$0xff] }
 0x2ba   : > { %3449 = vst [vmem:[%s5744_s27 + $0x90] sm:$0xff] %v3385_v14  ;;  %v2851_v17 = vadd.f32 %v2850_v16, %v2487_v56  ;;  %3837 = vmatmul.msk.f32.gmra.mxu1 %vm818_vm1, %v6890_v41  ;;  %2212 = vmatmul.f32.gmra.mxu2 %v6883_v21 }
 0x2bb   : > { %3772 = vmatmul.msk.f32.gmra.mxu0 %vm818_vm1, %v6885_v30  ;;  %v884_v30 = vpop.xlane.xlu0 %883 }
 0x2bc   : > { %v3125_v44 = vadd.f32 %v3124_v32, %v2851_v17  ;;  %v2498_v47 = vpop.f32.mrf.mxu3  ;;  %v6897_v32 = vld [vmem:[#allocation23_spill] sm:$0xff] }
 0x2bd   : > { %v2133_v51 = vpop.f32.mrf.mxu2  ;;  %v1842_v34 = vadd.f32 %v6897_v32, %v6896_v39 }
 0x2be   : > { %v3322_v19 = vadd.f32 %v3125_v44, %v255_v12  ;;  %v2134_v54 = vadd.f32 %v2133_v51, %v1838_v36  ;;  %v6908_v44 = vld [vmem:[#allocation44_spill] sm:$0xff] }
 0x2bf   : > { %v3136_v63 = vpop.f32.mrf.mxu1 }
 0x2c0   : > { %v3386_v25 = vmul.f32 %v3322_v19, %v878_v28  ;;  %v2493_v18 = vadd.f32 %v2492_v38, %v2134_v54  ;;  %v2858_v7 = vpop.f32.mrf.mxu0  ;;  %v6904_v38 = vand.u32 4294901760, %v6903_v5  ;;  %v6910_v19 = vld [vmem:[#allocation42_spill] sm:$0xff]  ;;  %v6911_v28 = vld [vmem:[#allocation153_spill] sm:$0xff] }
 0x2c1   : > { %2599 = vmatmul.f32.gmra.mxu3 %v6894_v10  ;;  %v259_v54 = vld [vmem:[%s5727_s20 + $0xb8] sm:$0xff] }
 0x2c2   : > { %3450 = vst [vmem:[%s5744_s27 + $0x98] sm:$0xff] %v3386_v25  ;;  %v2855_v26 = vadd.f32 %v2854_v49, %v2493_v18  ;;  %3838 = vmatmul.msk.f32.gmra.mxu1 %vm818_vm1, %v6895_v23  ;;  %2217 = vmatmul.f32.gmra.mxu2 %v6888_v55 }
 0x2c3   : > { %3773 = vmatmul.msk.f32.gmra.mxu0 %vm818_vm1, %v6890_v41  ;;  %v887_v41 = vpop.xlane.xlu1 %886 }
 0x2c4   : > { %v3129_v2 = vadd.f32 %v3128_v60, %v2855_v26  ;;  %v2504_v57 = vpop.f32.mrf.mxu3  ;;  %v6902_v60 = vld [vmem:[#allocation27_spill] sm:$0xff] }
 0x2c5   : > { %v2138_v40 = vpop.f32.mrf.mxu2  ;;  %v1846_v52 = vadd.f32 %v6902_v60, %v6901_v6 }
 0x2c6   : > { %v3323_v3 = vadd.f32 %v3129_v2, %v256_v29  ;;  %v2139_v20 = vadd.f32 %v2138_v40, %v1842_v34  ;;  %v6913_v2 = vld [vmem:[#allocation48_spill] sm:$0xff] }
 0x2c7   : > { %v3140_v37 = vpop.f32.mrf.mxu1 }
 0x2c8   : > { %v3387_v4 = vmul.f32 %v3323_v3, %v881_v35  ;;  %v2499_v33 = vadd.f32 %v2498_v47, %v2139_v20  ;;  %v2862_v24 = vpop.f32.mrf.mxu0  ;;  %v6909_v47 = vand.u32 4294901760, %v6908_v44  ;;  %v6915_v3 = vld [vmem:[#allocation46_spill] sm:$0xff]  ;;  %v260_v20 = vld [vmem:[%s5727_s20 + $0xc0] sm:$0xff] }
 0x2c9   : > { %2605 = vmatmul.f32.gmra.mxu3 %v6899_v61  ;;  %v6916_v35 = vld [vmem:[#allocation154_spill] sm:$0xff] }
 0x2ca   : > { %3451 = vst [vmem:[%s5744_s27 + $0xa0] sm:$0xff] %v3387_v4  ;;  %v2859_v53 = vadd.f32 %v2858_v7, %v2499_v33  ;;  %3839 = vmatmul.msk.f32.gmra.mxu1 %vm818_vm1, %v6900_v43  ;;  %2222 = vmatmul.f32.gmra.mxu2 %v6893_v22 }
 0x2cb   : > { %3774 = vmatmul.msk.f32.gmra.mxu0 %vm818_vm1, %v6895_v23  ;;  %v890_v23 = vpop.xlane.xlu2 %889 }
 0x2cc   : > { %v3133_v58 = vadd.f32 %v3132_v48, %v2859_v53  ;;  %v2510_v16 = vpop.f32.mrf.mxu3  ;;  %v6907_v48 = vld [vmem:[#allocation31_spill] sm:$0xff] }
 0x2cd   : > { %v2143_v21 = vpop.f32.mrf.mxu2  ;;  %v1850_v14 = vadd.f32 %v6907_v48, %v6906_v45 }
 0x2ce   : > { %v3324_v0 = vadd.f32 %v3133_v58, %v257_v42  ;;  %v2144_v8 = vadd.f32 %v2143_v21, %v1846_v52  ;;  %v6918_v58 = vld [vmem:[#allocation52_spill] sm:$0xff] }
 0x2cf   : > { %v3144_v1 = vpop.f32.mrf.mxu1 }
 0x2d0   : > { %v3388_v27 = vmul.f32 %v3324_v0, %v884_v30  ;;  %v2505_v50 = vadd.f32 %v2504_v57, %v2144_v8  ;;  %v2866_v9 = vpop.f32.mrf.mxu0  ;;  %v6914_v57 = vand.u32 4294901760, %v6913_v2  ;;  %v6920_v0 = vld [vmem:[#allocation50_spill] sm:$0xff]  ;;  %v261_v8 = vld [vmem:[%s5727_s20 + $0xc8] sm:$0xff]  ;;  %v6921_v30 = vld [vmem:[#allocation155_spill] sm:$0xff] }
 0x2d1   : > { %2611 = vmatmul.f32.gmra.mxu3 %v6904_v38 }
 0x2d2   : > { %3452 = vst [vmem:[%s5744_s27 + $0xa8] sm:$0xff] %v3388_v27  ;;  %v2863_v13 = vadd.f32 %v2862_v24, %v2505_v50  ;;  %3840 = vmatmul.msk.f32.gmra.mxu1 %vm818_vm1, %v6905_v46  ;;  %2227 = vmatmul.f32.gmra.mxu2 %v6898_v59 }
 0x2d3   : > { %3775 = vmatmul.msk.f32.gmra.mxu0 %vm818_vm1, %v6900_v43  ;;  %v893_v43 = vpop.xlane.xlu0 %892 }
 0x2d4   : > { %v3137_v56 = vadd.f32 %v3136_v63, %v2863_v13  ;;  %v2516_v49 = vpop.f32.mrf.mxu3  ;;  %v6912_v63 = vld [vmem:[#allocation35_spill] sm:$0xff] }
 0x2d5   : > { %v2148_v55 = vpop.f32.mrf.mxu2  ;;  %v1854_v25 = vadd.f32 %v6912_v63, %v6911_v28 }
 0x2d6   : > { %v3325_v31 = vadd.f32 %v3137_v56, %v258_v11  ;;  %v2149_v17 = vadd.f32 %v2148_v55, %v1850_v14  ;;  %v6923_v56 = vld [vmem:[#allocation56_spill] sm:$0xff] }
 0x2d7   : > { %v3148_v12 = vpop.f32.mrf.mxu1 }
 0x2d8   : > { %v3389_v62 = vmul.f32 %v3325_v31, %v887_v41  ;;  %v2511_v15 = vadd.f32 %v2510_v16, %v2149_v17  ;;  %v2870_v36 = vpop.f32.mrf.mxu0  ;;  %v6919_v16 = vand.u32 4294901760, %v6918_v58  ;;  %v6925_v31 = vld [vmem:[#allocation54_spill] sm:$0xff]  ;;  %v6926_v41 = vld [vmem:[#allocation156_spill] sm:$0xff] }
 0x2d9   : > { %2617 = vmatmul.f32.gmra.mxu3 %v6909_v47  ;;  %v262_v17 = vld [vmem:[%s5727_s20 + $0xd0] sm:$0xff] }
 0x2da   : > { %3453 = vst [vmem:[%s5744_s27 + $0xb0] sm:$0xff] %v3389_v62  ;;  %v2867_v51 = vadd.f32 %v2866_v9, %v2511_v15  ;;  %3841 = vmatmul.msk.f32.gmra.mxu1 %vm818_vm1, %v6910_v19  ;;  %2232 = vmatmul.f32.gmra.mxu2 %v6903_v5 }
 0x2db   : > { %3776 = vmatmul.msk.f32.gmra.mxu0 %vm818_vm1, %v6905_v46  ;;  %v896_v46 = vpop.xlane.xlu1 %895 }
 0x2dc   : > { %v3141_v18 = vadd.f32 %v3140_v37, %v2867_v51  ;;  %v2522_v7 = vpop.f32.mrf.mxu3  ;;  %v6917_v37 = vld [vmem:[#allocation39_spill] sm:$0xff] }
 0x2dd   : > { %v2153_v22 = vpop.f32.mrf.mxu2  ;;  %v1858_v4 = vadd.f32 %v6917_v37, %v6916_v35 }
 0x2de   : > { %v3326_v10 = vadd.f32 %v3141_v18, %v259_v54  ;;  %v2154_v26 = vadd.f32 %v2153_v22, %v1854_v25  ;;  %v6928_v18 = vld [vmem:[#allocation60_spill] sm:$0xff] }
 0x2df   : > { %v3152_v29 = vpop.f32.mrf.mxu1 }
 0x2e0   : > { %v3390_v39 = vmul.f32 %v3326_v10, %v890_v23  ;;  %v2517_v32 = vadd.f32 %v2516_v49, %v2154_v26  ;;  %v2874_v34 = vpop.f32.mrf.mxu0  ;;  %v6924_v49 = vand.u32 4294901760, %v6923_v56  ;;  %v6930_v10 = vld [vmem:[#allocation58_spill] sm:$0xff]  ;;  %v6931_v23 = vld [vmem:[#allocation157_spill] sm:$0xff] }
 0x2e1   : > { %2623 = vmatmul.f32.gmra.mxu3 %v6914_v57  ;;  %v263_v26 = vld [vmem:[%s5727_s20 + $0xd8] sm:$0xff] }
 0x2e2   : > { %3454 = vst [vmem:[%s5744_s27 + $0xb8] sm:$0xff] %v3390_v39  ;;  %v2871_v40 = vadd.f32 %v2870_v36, %v2517_v32  ;;  %3842 = vmatmul.msk.f32.gmra.mxu1 %vm818_vm1, %v6915_v3  ;;  %2237 = vmatmul.f32.gmra.mxu2 %v6908_v44 }
 0x2e3   : > { %3777 = vmatmul.msk.f32.gmra.mxu0 %vm818_vm1, %v6910_v19  ;;  %v899_v19 = vpop.xlane.xlu2 %898 }
 0x2e4   : > { %v3145_v33 = vadd.f32 %v3144_v1, %v2871_v40  ;;  %v2528_v24 = vpop.f32.mrf.mxu3  ;;  %v6922_v1 = vld [vmem:[#allocation43_spill] sm:$0xff] }
 0x2e5   : > { %v2158_v59 = vpop.f32.mrf.mxu2  ;;  %v1862_v27 = vadd.f32 %v6922_v1, %v6921_v30 }
 0x2e6   : > { %v3327_v61 = vadd.f32 %v3145_v33, %v260_v20  ;;  %v2159_v53 = vadd.f32 %v2158_v59, %v1858_v4  ;;  %v6933_v33 = vld [vmem:[#allocation64_spill] sm:$0xff] }
 0x2e7   : > { %v3156_v42 = vpop.f32.mrf.mxu1 }
 0x2e8   : > { %v3391_v6 = vmul.f32 %v3327_v61, %v893_v43  ;;  %v2523_v60 = vadd.f32 %v2522_v7, %v2159_v53  ;;  %v2878_v52 = vpop.f32.mrf.mxu0  ;;  %v6929_v7 = vand.u32 4294901760, %v6928_v18  ;;  %v6935_v61 = vld [vmem:[#allocation62_spill] sm:$0xff]  ;;  %v264_v53 = vld [vmem:[%s5727_s20 + $0xe0] sm:$0xff] }
 0x2e9   : > { %2629 = vmatmul.f32.gmra.mxu3 %v6919_v16  ;;  %v6936_v43 = vld [vmem:[#allocation158_spill] sm:$0xff] }
 0x2ea   : > { %3455 = vst [vmem:[%s5744_s27 + $0xc0] sm:$0xff] %v3391_v6  ;;  %v2875_v21 = vadd.f32 %v2874_v34, %v2523_v60  ;;  %3843 = vmatmul.msk.f32.gmra.mxu1 %vm818_vm1, %v6920_v0  ;;  %2242 = vmatmul.f32.gmra.mxu2 %v6913_v2 }
 0x2eb   : > { %3778 = vmatmul.msk.f32.gmra.mxu0 %vm818_vm1, %v6915_v3  ;;  %v902_v3 = vpop.xlane.xlu0 %901 }
 0x2ec   : > { %v3149_v50 = vadd.f32 %v3148_v12, %v2875_v21  ;;  %v2534_v9 = vpop.f32.mrf.mxu3  ;;  %v6927_v12 = vld [vmem:[#allocation47_spill] sm:$0xff] }
 0x2ed   : > { %v2163_v5 = vpop.f32.mrf.mxu2  ;;  %v1866_v62 = vadd.f32 %v6927_v12, %v6926_v41 }
 0x2ee   : > { %v3328_v38 = vadd.f32 %v3149_v50, %v261_v8  ;;  %v2164_v13 = vadd.f32 %v2163_v5, %v1862_v27  ;;  %v6938_v50 = vld [vmem:[#allocation68_spill] sm:$0xff] }
 0x2ef   : > { %v3160_v11 = vpop.f32.mrf.mxu1 }
 0x2f0   : > { %v3392_v45 = vmul.f32 %v3328_v38, %v896_v46  ;;  %v2529_v48 = vadd.f32 %v2528_v24, %v2164_v13  ;;  %v2882_v14 = vpop.f32.mrf.mxu0  ;;  %v6934_v24 = vand.u32 4294901760, %v6933_v33  ;;  %v6940_v38 = vld [vmem:[#allocation66_spill] sm:$0xff]  ;;  %v265_v13 = vld [vmem:[%s5727_s20 + $0xe8] sm:$0xff]  ;;  %v6941_v46 = vld [vmem:[#allocation159_spill] sm:$0xff] }
 0x2f1   : > { %2635 = vmatmul.f32.gmra.mxu3 %v6924_v49 }
 0x2f2   : > { %3456 = vst [vmem:[%s5744_s27 + $0xc8] sm:$0xff] %v3392_v45  ;;  %v2879_v55 = vadd.f32 %v2878_v52, %v2529_v48  ;;  %3844 = vmatmul.msk.f32.gmra.mxu1 %vm818_vm1, %v6925_v31  ;;  %2247 = vmatmul.f32.gmra.mxu2 %v6918_v58 }
 0x2f3   : > { %3779 = vmatmul.msk.f32.gmra.mxu0 %vm818_vm1, %v6920_v0  ;;  %v905_v0 = vpop.xlane.xlu1 %904 }
 0x2f4   : > { %v3153_v15 = vadd.f32 %v3152_v29, %v2879_v55  ;;  %v2540_v36 = vpop.f32.mrf.mxu3  ;;  %v6932_v29 = vld [vmem:[#allocation51_spill] sm:$0xff] }
 0x2f5   : > { %v2168_v44 = vpop.f32.mrf.mxu2  ;;  %v1870_v39 = vadd.f32 %v6932_v29, %v6931_v23 }
 0x2f6   : > { %v3329_v47 = vadd.f32 %v3153_v15, %v262_v17  ;;  %v2169_v51 = vadd.f32 %v2168_v44, %v1866_v62  ;;  %v6943_v15 = vld [vmem:[#allocation72_spill] sm:$0xff] }
 0x2f7   : > { %v3164_v54 = vpop.f32.mrf.mxu1 }
 0x2f8   : > { %v3393_v28 = vmul.f32 %v3329_v47, %v899_v19  ;;  %v2535_v63 = vadd.f32 %v2534_v9, %v2169_v51  ;;  %v2886_v25 = vpop.f32.mrf.mxu0  ;;  %v6939_v9 = vand.u32 4294901760, %v6938_v50  ;;  %v6945_v47 = vld [vmem:[#allocation70_spill] sm:$0xff]  ;;  %v6946_v19 = vld [vmem:[#allocation67_spill] sm:$0xff] }
 0x2f9   : > { %2641 = vmatmul.f32.gmra.mxu3 %v6929_v7  ;;  %v266_v51 = vld [vmem:[%s5727_s20 + $0xf0] sm:$0xff] }
 0x2fa   : > { %3457 = vst [vmem:[%s5744_s27 + $0xd0] sm:$0xff] %v3393_v28  ;;  %v2883_v22 = vadd.f32 %v2882_v14, %v2535_v63  ;;  %3845 = vmatmul.msk.f32.gmra.mxu1 %vm818_vm1, %v6930_v10  ;;  %2252 = vmatmul.f32.gmra.mxu2 %v6923_v56 }
 0x2fb   : > { %3780 = vmatmul.msk.f32.gmra.mxu0 %vm818_vm1, %v6925_v31  ;;  %v908_v31 = vpop.xlane.xlu2 %907 }
 0x2fc   : > { %v3157_v32 = vadd.f32 %v3156_v42, %v2883_v22  ;;  %v2546_v34 = vpop.f32.mrf.mxu3  ;;  %v6937_v42 = vld [vmem:[#allocation55_spill] sm:$0xff] }
 0x2fd   : > { %v2173_v2 = vpop.f32.mrf.mxu2  ;;  %v1874_v6 = vadd.f32 %v6937_v42, %v6936_v43  ;;  %v6952_v42 = vld [vmem:[#allocation85_spill] sm:$0xff] }
 0x2fe   : > { %v3330_v57 = vadd.f32 %v3157_v32, %v263_v26  ;;  %v2174_v40 = vadd.f32 %v2173_v2, %v1870_v39  ;;  %v6948_v32 = vld [vmem:[#allocation80_spill] sm:$0xff] }
 0x2ff   : > { %v3168_v20 = vpop.f32.mrf.mxu1 }
 0x300   : > { %v3394_v35 = vmul.f32 %v3330_v57, %v902_v3  ;;  %v2541_v37 = vadd.f32 %v2540_v36, %v2174_v40  ;;  %v2890_v4 = vpop.f32.mrf.mxu0  ;;  %v6944_v36 = vand.u32 4294901760, %v6943_v15  ;;  %v6950_v57 = vld [vmem:[#allocation76_spill] sm:$0xff]  ;;  %v267_v40 = vld [vmem:[%s5727_s20 + $0xf8] sm:$0xff] }
 0x301   : > { %2647 = vmatmul.f32.gmra.mxu3 %v6934_v24  ;;  %v914_v24 = vpop.xlane.xlu1 %913 }
 0x302   : > { %3458 = vst [vmem:[%s5744_s27 + $0xd8] sm:$0xff] %v3394_v35  ;;  %v2887_v59 = vadd.f32 %v2886_v25, %v2541_v37  ;;  %3846 = vmatmul.msk.f32.gmra.mxu1 %vm818_vm1, %v6935_v61  ;;  %2257 = vmatmul.f32.gmra.mxu2 %v6928_v18 }
 0x303   : > { %3781 = vmatmul.msk.f32.gmra.mxu0 %vm818_vm1, %v6930_v10  ;;  %v911_v10 = vpop.xlane.xlu0 %910 }
 0x304   : > { %v3161_v60 = vadd.f32 %v3160_v11, %v2887_v59  ;;  %v2552_v52 = vpop.f32.mrf.mxu3  ;;  %v6942_v11 = vld [vmem:[#allocation59_spill] sm:$0xff] }
 0x305   : > { %v2178_v58 = vpop.f32.mrf.mxu2  ;;  %v1878_v45 = vadd.f32 %v6942_v11, %v6941_v46 }
 0x306   : > { %v3331_v16 = vadd.f32 %v3161_v60, %v264_v53  ;;  %v2179_v21 = vadd.f32 %v2178_v58, %v1874_v6  ;;  %v6953_v6 = vand.u32 4294901760, %v6952_v42  ;;  %v268_v58 = vld [vmem:[%s5727_s20 + $0x100] sm:$0xff] }
 0x307   : > { %v3172_v8 = vpop.f32.mrf.mxu1 }
 0x308   : > { %v3395_v30 = vmul.f32 %v3331_v16, %v905_v0  ;;  %v2547_v1 = vadd.f32 %v2546_v34, %v2179_v21  ;;  %v2894_v27 = vpop.f32.mrf.mxu0  ;;  %v6949_v34 = vand.u32 4294901760, %v6948_v32 }
 0x309   : > { %2653 = vmatmul.f32.gmra.mxu3 %v6939_v9 }
 0x30a   : > { %3459 = vst [vmem:[%s5744_s27 + $0xe0] sm:$0xff] %v3395_v30  ;;  %v2891_v5 = vadd.f32 %v2890_v4, %v2547_v1  ;;  %3847 = vmatmul.msk.f32.gmra.mxu1 %vm818_vm1, %v6940_v38  ;;  %2262 = vmatmul.f32.gmra.mxu2 %v6933_v33  ;;  %v6951_v4 = vld [vmem:[#allocation88_spill] sm:$0xff]  ;;  %v6955_v30 = vld [vmem:[#allocation94_spill] sm:$0xff] }
 0x30b   : > { %3782 = vmatmul.msk.f32.gmra.mxu0 %vm818_vm1, %v6935_v61 }
 0x30c   : > { %v3165_v48 = vadd.f32 %v3164_v54, %v2891_v5  ;;  %v2558_v14 = vpop.f32.mrf.mxu3  ;;  %v6947_v54 = vld [vmem:[#allocation63_spill] sm:$0xff] }
 0x30d   : > { %v2183_v56 = vpop.f32.mrf.mxu2  ;;  %v1882_v28 = vadd.f32 %v6947_v54, %v6946_v19  ;;  %v6962_v19 = vld [vmem:[#allocation93_spill] sm:$0xff] }
 0x30e   : > { %v3332_v49 = vadd.f32 %v3165_v48, %v265_v13  ;;  %v2184_v55 = vadd.f32 %v2183_v56, %v1878_v45  ;;  %v6956_v13 = vld [vmem:[#allocation91_spill] sm:$0xff]  ;;  %v269_v48 = vld [vmem:[%s5727_s20 + $0x108] sm:$0xff]  ;;  %v270_v54 = vld [vmem:[%s5727_s20 + $0x110] sm:$0xff] }
 0x30f   : > { %v3176_v17 = vpop.f32.mrf.mxu1  ;;  %v6957_v46 = vand.u32 4294901760, %v6956_v13  ;;  %v6958_v45 = vld [vmem:[#allocation87_spill] sm:$0xff] }
 0x310   : > { %v3396_v41 = vmul.f32 %v3332_v49, %v908_v31  ;;  %v2553_v12 = vadd.f32 %v2552_v52, %v2184_v55  ;;  %v2898_v62 = vpop.f32.mrf.mxu0  ;;  %v6954_v52 = vld [vmem:[#allocation79_spill] sm:$0xff] }
 0x311   : > { %2659 = vmatmul.f32.gmra.mxu3 %v6944_v36  ;;  %v6959_v31 = vld [vmem:[#allocation99_spill] sm:$0xff] }
 0x312   : > { %3460 = vst [vmem:[%s5744_s27 + $0xe8] sm:$0xff] %v3396_v41  ;;  %v2895_v44 = vadd.f32 %v2894_v27, %v2553_v12  ;;  %3848 = vmatmul.msk.f32.gmra.mxu1 %vm818_vm1, %v6945_v47  ;;  %2267 = vmatmul.f32.gmra.mxu2 %v6938_v50  ;;  %v917_v27 = vpop.xlane.xlu2 %916  ;;  %v920_v41 = vpop.xlane.xlu0 %919 }
 0x313   : > { %3783 = vmatmul.msk.f32.gmra.mxu0 %vm818_vm1, %v6940_v38 }
 0x314   : > { %v3169_v63 = vadd.f32 %v3168_v20, %v2895_v44  ;;  %v2564_v25 = vpop.f32.mrf.mxu3  ;;  %v6960_v44 = vld [vmem:[#allocation97_spill] sm:$0xff] }
 0x315   : > { %v2188_v18 = vpop.f32.mrf.mxu2 }
 0x316   : > { %v3333_v7 = vadd.f32 %v3169_v63, %v266_v51  ;;  %v2189_v22 = vadd.f32 %v2188_v18, %v1882_v28 }
 0x317   : > { %v3180_v26 = vpop.f32.mrf.mxu1 }
 0x318   : > { %v3397_v23 = vmul.f32 %v3333_v7, %v911_v10  ;;  %v2559_v29 = vadd.f32 %v2558_v14, %v2189_v22  ;;  %v2902_v39 = vpop.f32.mrf.mxu0  ;;  %v6963_v7 = vld [vmem:[#allocation104_spill] sm:$0xff]  ;;  %v923_v10 = vpop.xlane.xlu1 %922 }
 0x319   : > { %2665 = vmatmul.f32.gmra.mxu3 %v6949_v34 }
 0x31a   : > { %3461 = vst [vmem:[%s5744_s27 + $0xf0] sm:$0xff] %v3397_v23  ;;  %v2899_v2 = vadd.f32 %v2898_v62, %v2559_v29  ;;  %3849 = vmatmul.msk.f32.gmra.mxu1 %vm818_vm1, %v6950_v57  ;;  %2272 = vmatmul.f32.gmra.mxu2 %v6943_v15 }
 0x31b   : > { %3784 = vmatmul.msk.f32.gmra.mxu0 %vm818_vm1, %v6945_v47  ;;  %v6961_v47 = vand.u32 4294901760, %v6960_v44 }
 0x31c   : > { %v3173_v3 = vadd.f32 %v3172_v8, %v2899_v2  ;;  %v2570_v20 = vpop.f32.mrf.mxu3 }
 0x31d   : > { %v2193_v35 = vpop.f32.mrf.mxu2 }
 0x31e   : > { %v3334_v37 = vadd.f32 %v3173_v3, %v267_v40  ;;  %v2194_v33 = vadd.f32 %v2193_v35, %v6951_v4  ;;  %v271_v40 = vld [vmem:[%s5727_s20 + $0x118] sm:$0xff]  ;;  %v6967_v4 = vld [vmem:[#allocation109_spill] sm:$0xff] }
 0x31f   : > { %v3184_v59 = vpop.f32.mrf.mxu1 }
 0x320   : > { %v3398_v61 = vmul.f32 %v3334_v37, %v914_v24  ;;  %v2565_v53 = vadd.f32 %v2564_v25, %v2194_v33  ;;  %v2906_v43 = vpop.f32.mrf.mxu0  ;;  %v926_v24 = vpop.xlane.xlu2 %925 }
 0x321   : > { %2671 = vmatmul.f32.gmra.mxu3 %v6953_v6 }
 0x322   : > { %3462 = vst [vmem:[%s5744_s27 + $0xf8] sm:$0xff] %v3398_v61  ;;  %v2903_v60 = vadd.f32 %v2902_v39, %v2565_v53  ;;  %3850 = vmatmul.msk.f32.gmra.mxu1 %vm818_vm1, %v6954_v52  ;;  %2277 = vmatmul.f32.gmra.mxu2 %v6948_v32  ;;  %v6964_v32 = vld [vmem:[#allocation102_spill] sm:$0xff] }
 0x323   : > { %3785 = vmatmul.msk.f32.gmra.mxu0 %vm818_vm1, %v6950_v57  ;;  %v6965_v34 = vand.u32 4294901760, %v6964_v32  ;;  %v6966_v57 = vld [vmem:[#allocation98_spill] sm:$0xff] }
 0x324   : > { %v3177_v16 = vadd.f32 %v3176_v17, %v2903_v60  ;;  %v2576_v21 = vpop.f32.mrf.mxu3 }
 0x325   : > { %v2198_v0 = vpop.f32.mrf.mxu2 }
 0x326   : > { %v3335_v8 = vadd.f32 %v3177_v16, %v268_v58  ;;  %v2199_v1 = vadd.f32 %v2198_v0, %v6955_v30  ;;  %v272_v58 = vld [vmem:[%s5727_s20 + $0x120] sm:$0xff] }
 0x327   : > { %v3188_v50 = vpop.f32.mrf.mxu1  ;;  %v6971_v30 = vld [vmem:[#allocation112_spill] sm:$0xff] }
 0x328   : > { %v3399_v9 = vmul.f32 %v3335_v8, %v917_v27  ;;  %v2571_v5 = vadd.f32 %v2570_v20, %v2199_v1  ;;  %v2910_v38 = vpop.f32.mrf.mxu0  ;;  %v929_v27 = vpop.xlane.xlu0 %928 }
 0x329   : > { %2677 = vmatmul.f32.gmra.mxu3 %v6957_v46 }
 0x32a   : > { %3463 = vst [vmem:[%s5744_s27 + $0x100] sm:$0xff] %v3399_v9  ;;  %v2907_v11 = vadd.f32 %v2906_v43, %v2571_v5  ;;  %3851 = vmatmul.msk.f32.gmra.mxu1 %vm818_vm1, %v6958_v45  ;;  %2282 = vmatmul.f32.gmra.mxu2 %v6952_v42  ;;  %v6968_v42 = vld [vmem:[#allocation107_spill] sm:$0xff] }
 0x32b   : > { %3786 = vmatmul.msk.f32.gmra.mxu0 %vm818_vm1, %v6954_v52  ;;  %v6969_v6 = vand.u32 4294901760, %v6968_v42  ;;  %v6970_v52 = vld [vmem:[#allocation103_spill] sm:$0xff] }
 0x32c   : > { %v3181_v14 = vadd.f32 %v3180_v26, %v2907_v11  ;;  %v2582_v56 = vpop.f32.mrf.mxu3 }
 0x32d   : > { %v2203_v49 = vpop.f32.mrf.mxu2 }
 0x32e   : > { %v3336_v55 = vadd.f32 %v3181_v14, %v269_v48  ;;  %v2204_v17 = vadd.f32 %v2203_v49, %v6959_v31  ;;  %v273_v48 = vld [vmem:[%s5727_s20 + $0x128] sm:$0xff]  ;;  %v6975_v31 = vld [vmem:[#allocation115_spill] sm:$0xff] }
 0x32f   : > { %v3192_v12 = vpop.f32.mrf.mxu1 }
 0x330   : > { %v3400_v62 = vmul.f32 %v3336_v55, %v920_v41  ;;  %v2577_v15 = vadd.f32 %v2576_v21, %v2204_v17  ;;  %v2914_v36 = vpop.f32.mrf.mxu0  ;;  %v932_v41 = vpop.xlane.xlu1 %931 }
 0x331   : > { %2683 = vmatmul.f32.gmra.mxu3 %v6961_v47 }
 0x332   : > { %3464 = vst [vmem:[%s5744_s27 + $0x108] sm:$0xff] %v3400_v62  ;;  %v2911_v51 = vadd.f32 %v2910_v38, %v2577_v15  ;;  %3852 = vmatmul.msk.f32.gmra.mxu1 %vm818_vm1, %v6962_v19  ;;  %2287 = vmatmul.f32.gmra.mxu2 %v6956_v13  ;;  %v6972_v13 = vld [vmem:[#allocation110_spill] sm:$0xff] }
 0x333   : > { %3787 = vmatmul.msk.f32.gmra.mxu0 %vm818_vm1, %v6958_v45  ;;  %v6973_v46 = vand.u32 4294901760, %v6972_v13  ;;  %v6974_v45 = vld [vmem:[#allocation108_spill] sm:$0xff] }
 0x334   : > { %v3185_v28 = vadd.f32 %v3184_v59, %v2911_v51  ;;  %v2588_v63 = vpop.f32.mrf.mxu3 }
 0x335   : > { %v2208_v25 = vpop.f32.mrf.mxu2 }
 0x336   : > { %v3337_v18 = vadd.f32 %v3185_v28, %v270_v54  ;;  %v2209_v22 = vadd.f32 %v2208_v25, %v6963_v7  ;;  %v274_v54 = vld [vmem:[%s5727_s20 + $0x130] sm:$0xff] }
 0x337   : > { %v3196_v26 = vpop.f32.mrf.mxu1  ;;  %v6979_v7 = vld [vmem:[#allocation118_spill] sm:$0xff] }
 0x338   : > { %v3401_v23 = vmul.f32 %v3337_v18, %v923_v10  ;;  %v2583_v29 = vadd.f32 %v2582_v56, %v2209_v22  ;;  %v2918_v39 = vpop.f32.mrf.mxu0  ;;  %v935_v10 = vpop.xlane.xlu2 %934 }
 0x339   : > { %2689 = vmatmul.f32.gmra.mxu3 %v6965_v34 }
 0x33a   : > { %3465 = vst [vmem:[%s5744_s27 + $0x110] sm:$0xff] %v3401_v23  ;;  %v2915_v2 = vadd.f32 %v2914_v36, %v2583_v29  ;;  %3853 = vmatmul.msk.f32.gmra.mxu1 %vm818_vm1, %v6966_v57  ;;  %2292 = vmatmul.f32.gmra.mxu2 %v6960_v44  ;;  %v6976_v44 = vld [vmem:[#allocation113_spill] sm:$0xff] }
 0x33b   : > { %3788 = vmatmul.msk.f32.gmra.mxu0 %vm818_vm1, %v6962_v19  ;;  %v6977_v47 = vand.u32 4294901760, %v6976_v44  ;;  %v6978_v19 = vld [vmem:[#allocation111_spill] sm:$0xff] }
 0x33c   : > { %v3189_v3 = vadd.f32 %v3188_v50, %v2915_v2  ;;  %v2594_v20 = vpop.f32.mrf.mxu3 }
 0x33d   : > { %v2213_v35 = vpop.f32.mrf.mxu2 }
 0x33e   : > { %v3338_v37 = vadd.f32 %v3189_v3, %v271_v40  ;;  %v2214_v33 = vadd.f32 %v2213_v35, %v6967_v4  ;;  %v275_v40 = vld [vmem:[%s5727_s20 + $0x138] sm:$0xff]  ;;  %v6983_v4 = vld [vmem:[#allocation121_spill] sm:$0xff] }
 0x33f   : > { %v3200_v59 = vpop.f32.mrf.mxu1 }
 0x340   : > { %v3402_v61 = vmul.f32 %v3338_v37, %v926_v24  ;;  %v2589_v53 = vadd.f32 %v2588_v63, %v2214_v33  ;;  %v2922_v43 = vpop.f32.mrf.mxu0  ;;  %v938_v24 = vpop.xlane.xlu0 %937 }
 0x341   : > { %2695 = vmatmul.f32.gmra.mxu3 %v6969_v6 }
 0x342   : > { %3466 = vst [vmem:[%s5744_s27 + $0x118] sm:$0xff] %v3402_v61  ;;  %v2919_v60 = vadd.f32 %v2918_v39, %v2589_v53  ;;  %3854 = vmatmul.msk.f32.gmra.mxu1 %vm818_vm1, %v6970_v52  ;;  %2297 = vmatmul.f32.gmra.mxu2 %v6964_v32  ;;  %v6980_v32 = vld [vmem:[#allocation116_spill] sm:$0xff] }
 0x343   : > { %3789 = vmatmul.msk.f32.gmra.mxu0 %vm818_vm1, %v6966_v57  ;;  %v6981_v34 = vand.u32 4294901760, %v6980_v32  ;;  %v6982_v57 = vld [vmem:[#allocation114_spill] sm:$0xff] }
 0x344   : > { %v3193_v16 = vadd.f32 %v3192_v12, %v2919_v60  ;;  %v2600_v21 = vpop.f32.mrf.mxu3 }
 0x345   : > { %v2218_v0 = vpop.f32.mrf.mxu2 }
 0x346   : > { %v3339_v8 = vadd.f32 %v3193_v16, %v272_v58  ;;  %v2219_v1 = vadd.f32 %v2218_v0, %v6971_v30  ;;  %v276_v58 = vld [vmem:[%s5727_s20 + $0x140] sm:$0xff] }
 0x347   : > { %v3204_v50 = vpop.f32.mrf.mxu1  ;;  %v6987_v30 = vld [vmem:[#allocation124_spill] sm:$0xff] }
 0x348   : > { %v3403_v9 = vmul.f32 %v3339_v8, %v929_v27  ;;  %v2595_v5 = vadd.f32 %v2594_v20, %v2219_v1  ;;  %v2926_v38 = vpop.f32.mrf.mxu0  ;;  %v941_v27 = vpop.xlane.xlu1 %940 }
 0x349   : > { %2701 = vmatmul.f32.gmra.mxu3 %v6973_v46 }
 0x34a   : > { %3467 = vst [vmem:[%s5744_s27 + $0x120] sm:$0xff] %v3403_v9  ;;  %v2923_v11 = vadd.f32 %v2922_v43, %v2595_v5  ;;  %3855 = vmatmul.msk.f32.gmra.mxu1 %vm818_vm1, %v6974_v45  ;;  %2302 = vmatmul.f32.gmra.mxu2 %v6968_v42  ;;  %v6984_v42 = vld [vmem:[#allocation119_spill] sm:$0xff] }
 0x34b   : > { %3790 = vmatmul.msk.f32.gmra.mxu0 %vm818_vm1, %v6970_v52  ;;  %v6985_v6 = vand.u32 4294901760, %v6984_v42  ;;  %v6986_v52 = vld [vmem:[#allocation117_spill] sm:$0xff] }
 0x34c   : > { %v3197_v14 = vadd.f32 %v3196_v26, %v2923_v11  ;;  %v2606_v56 = vpop.f32.mrf.mxu3 }
 0x34d   : > { %v2223_v49 = vpop.f32.mrf.mxu2 }
 0x34e   : > { %v3340_v55 = vadd.f32 %v3197_v14, %v273_v48  ;;  %v2224_v17 = vadd.f32 %v2223_v49, %v6975_v31  ;;  %v277_v48 = vld [vmem:[%s5727_s20 + $0x148] sm:$0xff]  ;;  %v6991_v31 = vld [vmem:[#allocation127_spill] sm:$0xff] }
 0x34f   : > { %v3208_v12 = vpop.f32.mrf.mxu1 }
 0x350   : > { %v3404_v62 = vmul.f32 %v3340_v55, %v932_v41  ;;  %v2601_v15 = vadd.f32 %v2600_v21, %v2224_v17  ;;  %v2930_v36 = vpop.f32.mrf.mxu0  ;;  %v944_v41 = vpop.xlane.xlu2 %943 }
 0x351   : > { %2707 = vmatmul.f32.gmra.mxu3 %v6977_v47 }
 0x352   : > { %3468 = vst [vmem:[%s5744_s27 + $0x128] sm:$0xff] %v3404_v62  ;;  %v2927_v51 = vadd.f32 %v2926_v38, %v2601_v15  ;;  %3856 = vmatmul.msk.f32.gmra.mxu1 %vm818_vm1, %v6978_v19  ;;  %2307 = vmatmul.f32.gmra.mxu2 %v6972_v13  ;;  %v6988_v13 = vld [vmem:[#allocation122_spill] sm:$0xff] }
 0x353   : > { %3791 = vmatmul.msk.f32.gmra.mxu0 %vm818_vm1, %v6974_v45  ;;  %v6989_v46 = vand.u32 4294901760, %v6988_v13  ;;  %v6990_v45 = vld [vmem:[#allocation120_spill] sm:$0xff] }
 0x354   : > { %v3201_v28 = vadd.f32 %v3200_v59, %v2927_v51  ;;  %v2612_v63 = vpop.f32.mrf.mxu3 }
 0x355   : > { %v2228_v25 = vpop.f32.mrf.mxu2 }
 0x356   : > { %v3341_v18 = vadd.f32 %v3201_v28, %v274_v54  ;;  %v2229_v22 = vadd.f32 %v2228_v25, %v6979_v7  ;;  %v278_v54 = vld [vmem:[%s5727_s20 + $0x150] sm:$0xff] }
 0x357   : > { %v3212_v26 = vpop.f32.mrf.mxu1  ;;  %v6995_v7 = vld [vmem:[#allocation130_spill] sm:$0xff] }
 0x358   : > { %v3405_v23 = vmul.f32 %v3341_v18, %v935_v10  ;;  %v2607_v29 = vadd.f32 %v2606_v56, %v2229_v22  ;;  %v2934_v39 = vpop.f32.mrf.mxu0  ;;  %v947_v10 = vpop.xlane.xlu0 %946 }
 0x359   : > { %2713 = vmatmul.f32.gmra.mxu3 %v6981_v34 }
 0x35a   : > { %3469 = vst [vmem:[%s5744_s27 + $0x130] sm:$0xff] %v3405_v23  ;;  %v2931_v2 = vadd.f32 %v2930_v36, %v2607_v29  ;;  %3857 = vmatmul.msk.f32.gmra.mxu1 %vm818_vm1, %v6982_v57  ;;  %2312 = vmatmul.f32.gmra.mxu2 %v6976_v44  ;;  %v6992_v44 = vld [vmem:[#allocation125_spill] sm:$0xff] }
 0x35b   : > { %3792 = vmatmul.msk.f32.gmra.mxu0 %vm818_vm1, %v6978_v19  ;;  %v6993_v47 = vand.u32 4294901760, %v6992_v44  ;;  %v6994_v19 = vld [vmem:[#allocation123_spill] sm:$0xff] }
 0x35c   : > { %v3205_v3 = vadd.f32 %v3204_v50, %v2931_v2  ;;  %v2618_v20 = vpop.f32.mrf.mxu3 }
 0x35d   : > { %v2233_v35 = vpop.f32.mrf.mxu2 }
 0x35e   : > { %v3342_v37 = vadd.f32 %v3205_v3, %v275_v40  ;;  %v2234_v33 = vadd.f32 %v2233_v35, %v6983_v4  ;;  %v279_v40 = vld [vmem:[%s5727_s20 + $0x158] sm:$0xff] }
 0x35f   : > { %v3216_v59 = vpop.f32.mrf.mxu1  ;;  %v6999_v4 = vld [vmem:[#allocation134_spill] sm:$0xff] }
 0x360   : > { %v3406_v61 = vmul.f32 %v3342_v37, %v938_v24  ;;  %v2613_v53 = vadd.f32 %v2612_v63, %v2234_v33  ;;  %v2938_v43 = vpop.f32.mrf.mxu0  ;;  %v950_v24 = vpop.xlane.xlu1 %949 }
 0x361   : > { %2719 = vmatmul.f32.gmra.mxu3 %v6985_v6 }
 0x362   : > { %3470 = vst [vmem:[%s5744_s27 + $0x138] sm:$0xff] %v3406_v61  ;;  %v2935_v60 = vadd.f32 %v2934_v39, %v2613_v53  ;;  %3858 = vmatmul.msk.f32.gmra.mxu1 %vm818_vm1, %v6986_v52  ;;  %2317 = vmatmul.f32.gmra.mxu2 %v6980_v32  ;;  %v6996_v32 = vld [vmem:[#allocation128_spill] sm:$0xff] }
 0x363   : > { %3793 = vmatmul.msk.f32.gmra.mxu0 %vm818_vm1, %v6982_v57  ;;  %v6997_v34 = vand.u32 4294901760, %v6996_v32  ;;  %v6998_v57 = vld [vmem:[#allocation126_spill] sm:$0xff] }
 0x364   : > { %v3209_v16 = vadd.f32 %v3208_v12, %v2935_v60  ;;  %v2624_v21 = vpop.f32.mrf.mxu3 }
 0x365   : > { %v2238_v0 = vpop.f32.mrf.mxu2 }
 0x366   : > { %v3343_v8 = vadd.f32 %v3209_v16, %v276_v58  ;;  %v2239_v1 = vadd.f32 %v2238_v0, %v6987_v30  ;;  %v280_v58 = vld [vmem:[%s5727_s20 + $0x160] sm:$0xff]  ;;  %v7003_v30 = vld [vmem:[#allocation137_spill] sm:$0xff] }
 0x367   : > { %v3220_v50 = vpop.f32.mrf.mxu1 }
 0x368   : > { %v3407_v9 = vmul.f32 %v3343_v8, %v941_v27  ;;  %v2619_v5 = vadd.f32 %v2618_v20, %v2239_v1  ;;  %v2942_v38 = vpop.f32.mrf.mxu0  ;;  %v953_v27 = vpop.xlane.xlu2 %952 }
 0x369   : > { %2725 = vmatmul.f32.gmra.mxu3 %v6989_v46 }
 0x36a   : > { %3471 = vst [vmem:[%s5744_s27 + $0x140] sm:$0xff] %v3407_v9  ;;  %v2939_v11 = vadd.f32 %v2938_v43, %v2619_v5  ;;  %3859 = vmatmul.msk.f32.gmra.mxu1 %vm818_vm1, %v6990_v45  ;;  %2322 = vmatmul.f32.gmra.mxu2 %v6984_v42  ;;  %v7000_v42 = vld [vmem:[#allocation132_spill] sm:$0xff] }
 0x36b   : > { %3794 = vmatmul.msk.f32.gmra.mxu0 %vm818_vm1, %v6986_v52  ;;  %v7001_v6 = vand.u32 4294901760, %v7000_v42  ;;  %v7002_v52 = vld [vmem:[#allocation129_spill] sm:$0xff] }
 0x36c   : > { %v3213_v14 = vadd.f32 %v3212_v26, %v2939_v11  ;;  %v2630_v56 = vpop.f32.mrf.mxu3 }
 0x36d   : > { %v2243_v49 = vpop.f32.mrf.mxu2 }
 0x36e   : > { %v3344_v55 = vadd.f32 %v3213_v14, %v277_v48  ;;  %v2244_v17 = vadd.f32 %v2243_v49, %v6991_v31  ;;  %v281_v48 = vld [vmem:[%s5727_s20 + $0x168] sm:$0xff] }
 0x36f   : > { %v3224_v12 = vpop.f32.mrf.mxu1  ;;  %v7007_v31 = vld [vmem:[#allocation140_spill] sm:$0xff] }
 0x370   : > { %v3408_v62 = vmul.f32 %v3344_v55, %v944_v41  ;;  %v2625_v15 = vadd.f32 %v2624_v21, %v2244_v17  ;;  %v2946_v36 = vpop.f32.mrf.mxu0  ;;  %v956_v41 = vpop.xlane.xlu0 %955 }
 0x371   : > { %2731 = vmatmul.f32.gmra.mxu3 %v6993_v47  ;;  %v282_v47 = vld [vmem:[%s5727_s20 + $0x170] sm:$0xff] }
 0x372   : > { %3472 = vst [vmem:[%s5744_s27 + $0x148] sm:$0xff] %v3408_v62  ;;  %v2943_v51 = vadd.f32 %v2942_v38, %v2625_v15  ;;  %3860 = vmatmul.msk.f32.gmra.mxu1 %vm818_vm1, %v6994_v19  ;;  %2327 = vmatmul.f32.gmra.mxu2 %v6988_v13  ;;  %v7004_v13 = vld [vmem:[#allocation136_spill] sm:$0xff] }
 0x373   : > { %3795 = vmatmul.msk.f32.gmra.mxu0 %vm818_vm1, %v6990_v45  ;;  %v7005_v46 = vand.u32 4294901760, %v7004_v13  ;;  %v7006_v45 = vld [vmem:[#allocation133_spill] sm:$0xff] }
 0x374   : > { %v3217_v28 = vadd.f32 %v3216_v59, %v2943_v51  ;;  %v2636_v63 = vpop.f32.mrf.mxu3 }
 0x375   : > { %v2248_v25 = vpop.f32.mrf.mxu2 }
 0x376   : > { %v3345_v18 = vadd.f32 %v3217_v28, %v278_v54  ;;  %v2249_v22 = vadd.f32 %v2248_v25, %v6995_v7 }
 0x377   : > { %v3228_v26 = vpop.f32.mrf.mxu1 }
 0x378   : > { %v3409_v23 = vmul.f32 %v3345_v18, %v947_v10  ;;  %v2631_v29 = vadd.f32 %v2630_v56, %v2249_v22  ;;  %v2950_v39 = vpop.f32.mrf.mxu0  ;;  %v959_v18 = vpop.xlane.xlu1 %958 }
 0x379   : > { %2737 = vmatmul.f32.gmra.mxu3 %v6997_v34 }
 0x37a   : > { %3473 = vst [vmem:[%s5744_s27 + $0x150] sm:$0xff] %v3409_v23  ;;  %v2947_v2 = vadd.f32 %v2946_v36, %v2631_v29  ;;  %3861 = vmatmul.msk.f32.gmra.mxu1 %vm818_vm1, %v6998_v57  ;;  %2332 = vmatmul.f32.gmra.mxu2 %v6992_v44  ;;  %v283_v29 = vld [vmem:[%s5727_s20 + $0x178] sm:$0xff] }
 0x37b   : > { %3796 = vmatmul.msk.f32.gmra.mxu0 %vm818_vm1, %v6994_v19 }
 0x37c   : > { %v3221_v3 = vadd.f32 %v3220_v50, %v2947_v2  ;;  %v2642_v20 = vpop.f32.mrf.mxu3 }
 0x37d   : > { %v2253_v35 = vpop.f32.mrf.mxu2 }
 0x37e   : > { %v3346_v37 = vadd.f32 %v3221_v3, %v279_v40  ;;  %v2254_v33 = vadd.f32 %v2253_v35, %v6999_v4  ;;  %v962_v3 = vpop.xlane.xlu2 %961 }
 0x37f   : > { %v3232_v59 = vpop.f32.mrf.mxu1 }
 0x380   : > { %v3410_v61 = vmul.f32 %v3346_v37, %v950_v24  ;;  %v2637_v53 = vadd.f32 %v2636_v63, %v2254_v33  ;;  %v2954_v43 = vpop.f32.mrf.mxu0  ;;  %v7008_v63 = vld [vmem:[#allocation143_spill] sm:$0xff] }
 0x381   : > { %2743 = vmatmul.f32.gmra.mxu3 %v7001_v6  ;;  %v284_v24 = vld [vmem:[%s5727_s20 + $0x180] sm:$0xff] }
 0x382   : > { %3474 = vst [vmem:[%s5744_s27 + $0x158] sm:$0xff] %v3410_v61  ;;  %v2951_v60 = vadd.f32 %v2950_v39, %v2637_v53  ;;  %3862 = vmatmul.msk.f32.gmra.mxu1 %vm818_vm1, %v7002_v52  ;;  %2337 = vmatmul.f32.gmra.mxu2 %v6996_v32 }
 0x383   : > { %3797 = vmatmul.msk.f32.gmra.mxu0 %vm818_vm1, %v6998_v57  ;;  %v7009_v57 = vld [vmem:[#allocation11_spill] sm:$0xff] }
 0x384   : > { %v3225_v16 = vadd.f32 %v3224_v12, %v2951_v60  ;;  %v2648_v21 = vpop.f32.mrf.mxu3  ;;  %v965_v60 = vpop.xlane.xlu0 %964 }
 0x385   : > { %v2258_v0 = vpop.f32.mrf.mxu2 }
 0x386   : > { %v3347_v8 = vadd.f32 %v3225_v16, %v280_v58  ;;  %v2259_v1 = vadd.f32 %v2258_v0, %v7003_v30 }
 0x387   : > { %v3236_v50 = vpop.f32.mrf.mxu1 }
 0x388   : > { %v3411_v9 = vmul.f32 %v3347_v8, %v953_v27  ;;  %v2643_v5 = vadd.f32 %v2642_v20, %v2259_v1  ;;  %v2958_v38 = vpop.f32.mrf.mxu0  ;;  %v285_v8 = vld [vmem:[%s5727_s20 + $0x188] sm:$0xff] }
 0x389   : > { %2749 = vmatmul.f32.gmra.mxu3 %v7005_v46 }
 0x38a   : > { %3475 = vst [vmem:[%s5744_s27 + $0x160] sm:$0xff] %v3411_v9  ;;  %v2955_v11 = vadd.f32 %v2954_v43, %v2643_v5  ;;  %3863 = vmatmul.msk.f32.gmra.mxu1 %vm818_vm1, %v7006_v45  ;;  %2342 = vmatmul.f32.gmra.mxu2 %v7000_v42  ;;  %v7010_v42 = vld [vmem:[#allocation19_spill] sm:$0xff]  ;;  %v7011_v9 = vld [vmem:[#allocation21_spill] sm:$0xff] }
 0x38b   : > { %3798 = vmatmul.msk.f32.gmra.mxu0 %vm818_vm1, %v7002_v52 }
 0x38c   : > { %v3229_v14 = vadd.f32 %v3228_v26, %v2955_v11  ;;  %v2654_v56 = vpop.f32.mrf.mxu3 }
 0x38d   : > { %v2263_v49 = vpop.f32.mrf.mxu2 }
 0x38e   : > { %v3348_v55 = vadd.f32 %v3229_v14, %v281_v48  ;;  %v2264_v17 = vadd.f32 %v2263_v49, %v7007_v31  ;;  %v286_v14 = vld [vmem:[%s5727_s20 + $0x190] sm:$0xff] }
 0x38f   : > { %v3240_v12 = vpop.f32.mrf.mxu1 }
 0x390   : > { %v3412_v62 = vmul.f32 %v3348_v55, %v956_v41  ;;  %v2649_v15 = vadd.f32 %v2648_v21, %v2264_v17  ;;  %v2962_v36 = vpop.f32.mrf.mxu0  ;;  %v7012_v17 = vld [vmem:[#allocation25_spill] sm:$0xff] }
 0x392   : > { %3476 = vst [vmem:[%s5744_s27 + $0x168] sm:$0xff] %v3412_v62  ;;  %v2959_v44 = vadd.f32 %v2958_v38, %v2649_v15  ;;  %2347 = vmatmul.f32.gmra.mxu2 %v7004_v13  ;;  %v968_v38 = vpop.xlane.xlu1 %967 }
 0x393   : > { %3799 = vmatmul.msk.f32.gmra.mxu0 %vm818_vm1, %v7006_v45 }
 0x394   : > { %v3233_v51 = vadd.f32 %v3232_v59, %v2959_v44  ;;  %v2660_v19 = vpop.f32.mrf.mxu3 }
 0x395   : > { %v2268_v54 = vpop.f32.mrf.mxu2 }
 0x396   : > { %v3349_v28 = vadd.f32 %v3233_v51, %v282_v47  ;;  %v2269_v25 = vadd.f32 %v2268_v54, %v7008_v63  ;;  %v287_v51 = vld [vmem:[%s5727_s20 + $0x198] sm:$0xff] }
 0x397   : > { %v3244_v7 = vpop.f32.mrf.mxu1 }
 0x398   : > { %v3413_v22 = vmul.f32 %v3349_v28, %v959_v18  ;;  %v2655_v10 = vadd.f32 %v2654_v56, %v2269_v25  ;;  %v2966_v26 = vpop.f32.mrf.mxu0  ;;  %v7013_v25 = vld [vmem:[#allocation29_spill] sm:$0xff] }
 0x39a   : > { %3477 = vst [vmem:[%s5744_s27 + $0x170] sm:$0xff] %v3413_v22  ;;  %v2963_v23 = vadd.f32 %v2962_v36, %v2655_v10 }
 0x39c   : > { %v3237_v39 = vadd.f32 %v3236_v50, %v2963_v23  ;;  %v2666_v32 = vpop.f32.mrf.mxu3 }
 0x39d   : > { %v2273_v34 = vpop.f32.mrf.mxu2 }
 0x39e   : > { %v3350_v2 = vadd.f32 %v3237_v39, %v283_v29  ;;  %v2274_v40 = vadd.f32 %v2273_v34, %v7009_v57  ;;  %v288_v39 = vld [vmem:[%s5727_s20 + $0x1a0] sm:$0xff] }
 0x39f   : > { %v3248_v20 = vpop.f32.mrf.mxu1 }
 0x3a0   : > { %v3414_v35 = vmul.f32 %v3350_v2, %v962_v3  ;;  %v2661_v37 = vadd.f32 %v2660_v19, %v2274_v40  ;;  %v2970_v4 = vpop.f32.mrf.mxu0  ;;  %v7014_v40 = vld [vmem:[#allocation33_spill] sm:$0xff] }
 0x3a2   : > { %3478 = vst [vmem:[%s5744_s27 + $0x178] sm:$0xff] %v3414_v35  ;;  %v2967_v33 = vadd.f32 %v2966_v26, %v2661_v37 }
 0x3a4   : > { %v3241_v59 = vadd.f32 %v3240_v12, %v2967_v33  ;;  %v2672_v61 = vpop.f32.mrf.mxu3  ;;  %v971_v12 = vpop.xlane.xlu2 %970 }
 0x3a5   : > { %v2278_v53 = vpop.f32.mrf.mxu2 }
 0x3a6   : > { %v3351_v43 = vadd.f32 %v3241_v59, %v284_v24  ;;  %v2279_v6 = vadd.f32 %v2278_v53, %v7010_v42  ;;  %v289_v24 = vld [vmem:[%s5727_s20 + $0x1a8] sm:$0xff] }
 0x3a7   : > { %v3252_v52 = vpop.f32.mrf.mxu1 }
 0x3a8   : > { %v3415_v58 = vmul.f32 %v3351_v43, %v965_v60  ;;  %v2667_v16 = vadd.f32 %v2666_v32, %v2279_v6  ;;  %v2974_v21 = vpop.f32.mrf.mxu0  ;;  %v7015_v6 = vld [vmem:[#allocation37_spill] sm:$0xff] }
 0x3aa   : > { %3479 = vst [vmem:[%s5744_s27 + $0x180] sm:$0xff] %v3415_v58  ;;  %v2971_v0 = vadd.f32 %v2970_v4, %v2667_v16 }
 0x3ac   : > { %v3245_v30 = vadd.f32 %v3244_v7, %v2971_v0  ;;  %v2678_v1 = vpop.f32.mrf.mxu3  ;;  %v974_v7 = vpop.xlane.xlu0 %973 }
 0x3ad   : > { %v2283_v27 = vpop.f32.mrf.mxu2 }
 0x3ae   : > { %v3352_v50 = vadd.f32 %v3245_v30, %v285_v8  ;;  %v2284_v5 = vadd.f32 %v2283_v27, %v7011_v9  ;;  %v290_v8 = vld [vmem:[%s5727_s20 + $0x1b0] sm:$0xff] }
 0x3af   : > { %v3256_v13 = vpop.f32.mrf.mxu1 }
 0x3b0   : > { %v3416_v46 = vmul.f32 %v3352_v50, %v968_v38  ;;  %v2673_v11 = vadd.f32 %v2672_v61, %v2284_v5  ;;  %v2978_v45 = vpop.f32.mrf.mxu0  ;;  %v7016_v5 = vld [vmem:[#allocation41_spill] sm:$0xff] }
 0x3b2   : > { %3480 = vst [vmem:[%s5744_s27 + $0x188] sm:$0xff] %v3416_v46  ;;  %v2975_v48 = vadd.f32 %v2974_v21, %v2673_v11 }
 0x3b4   : > { %v3249_v56 = vadd.f32 %v3248_v20, %v2975_v48  ;;  %v2684_v49 = vpop.f32.mrf.mxu3  ;;  %v977_v20 = vpop.xlane.xlu1 %976 }
 0x3b5   : > { %v2288_v55 = vpop.f32.mrf.mxu2 }
 0x3b6   : > { %v3353_v31 = vadd.f32 %v3249_v56, %v286_v14  ;;  %v2289_v41 = vadd.f32 %v2288_v55, %v7012_v17  ;;  %v291_v14 = vld [vmem:[%s5727_s20 + $0x1b8] sm:$0xff]  ;;  %v7017_v17 = vld [vmem:[#allocation45_spill] sm:$0xff] }
 0x3b7   : > { %v3260_v62 = vpop.f32.mrf.mxu1 }
 0x3b8   : > { %v3417_v15 = vmul.f32 %v3353_v31, %v971_v12  ;;  %v2679_v36 = vadd.f32 %v2678_v1, %v2289_v41  ;;  %v2982_v44 = vpop.f32.mrf.mxu0 }
 0x3ba   : > { %3481 = vst [vmem:[%s5744_s27 + $0x190] sm:$0xff] %v3417_v15  ;;  %v2979_v47 = vadd.f32 %v2978_v45, %v2679_v36 }
 0x3bc   : > { %v3253_v19 = vadd.f32 %v3252_v52, %v2979_v47  ;;  %v2690_v54 = vpop.f32.mrf.mxu3  ;;  %v980_v52 = vpop.xlane.xlu2 %979 }
 0x3bd   : > { %v2293_v28 = vpop.f32.mrf.mxu2  ;;  %v986_v12 = vpop.xlane.xlu1 %985 }
 0x3be   : > { %v3354_v63 = vadd.f32 %v3253_v19, %v287_v51  ;;  %v2294_v18 = vadd.f32 %v2293_v28, %v7013_v25  ;;  %v292_v51 = vld [vmem:[%s5727_s20 + $0x1c0] sm:$0xff]  ;;  %v7018_v25 = vld [vmem:[#allocation49_spill] sm:$0xff] }
 0x3bf   : > { %v3264_v23 = vpop.f32.mrf.mxu1 }
 0x3c0   : > { %v3418_v22 = vmul.f32 %v3354_v63, %v974_v7  ;;  %v2685_v10 = vadd.f32 %v2684_v49, %v2294_v18  ;;  %v2986_v26 = vpop.f32.mrf.mxu0 }
 0x3c2   : > { %3482 = vst [vmem:[%s5744_s27 + $0x198] sm:$0xff] %v3418_v22  ;;  %v2983_v29 = vadd.f32 %v2982_v44, %v2685_v10 }
 0x3c4   : > { %v3257_v32 = vadd.f32 %v3256_v13, %v2983_v29  ;;  %v2696_v34 = vpop.f32.mrf.mxu3  ;;  %v983_v13 = vpop.xlane.xlu0 %982 }
 0x3c5   : > { %v2298_v2 = vpop.f32.mrf.mxu2  ;;  %v989_v7 = vpop.xlane.xlu2 %988 }
 0x3c6   : > { %v3355_v57 = vadd.f32 %v3257_v32, %v288_v39  ;;  %v2299_v3 = vadd.f32 %v2298_v2, %v7014_v40  ;;  %v293_v39 = vld [vmem:[%s5727_s20 + $0x1c8] sm:$0xff] }
 0x3c7   : > { %v3268_v59 = vpop.f32.mrf.mxu1 }
 0x3c8   : > { %v3419_v35 = vmul.f32 %v3355_v57, %v977_v20  ;;  %v2691_v37 = vadd.f32 %v2690_v54, %v2299_v3  ;;  %v2990_v4 = vpop.f32.mrf.mxu0  ;;  %v7019_v57 = vld [vmem:[#allocation53_spill] sm:$0xff] }
 0x3ca   : > { %3483 = vst [vmem:[%s5744_s27 + $0x1a0] sm:$0xff] %v3419_v35  ;;  %v2987_v33 = vadd.f32 %v2986_v26, %v2691_v37 }
 0x3cc   : > { %v3261_v61 = vadd.f32 %v3260_v62, %v2987_v33  ;;  %v2702_v53 = vpop.f32.mrf.mxu3  ;;  %v992_v3 = vpop.xlane.xlu0 %991 }
 0x3cd   : > { %v2303_v43 = vpop.f32.mrf.mxu2 }
 0x3ce   : > { %v3356_v42 = vadd.f32 %v3261_v61, %v289_v24  ;;  %v2304_v60 = vadd.f32 %v2303_v43, %v7015_v6 }
 0x3cf   : > { %v3272_v27 = vpop.f32.mrf.mxu1 }
 0x3d0   : > { %v3420_v58 = vmul.f32 %v3356_v42, %v980_v52  ;;  %v2697_v16 = vadd.f32 %v2696_v34, %v2304_v60  ;;  %v2994_v21 = vpop.f32.mrf.mxu0  ;;  %v7020_v42 = vld [vmem:[#allocation57_spill] sm:$0xff]  ;;  %v995_v60 = vpop.xlane.xlu1 %994 }
 0x3d2   : > { %3484 = vst [vmem:[%s5744_s27 + $0x1a8] sm:$0xff] %v3420_v58  ;;  %v2991_v0 = vadd.f32 %v2990_v4, %v2697_v16 }
 0x3d4   : > { %v3265_v30 = vadd.f32 %v3264_v23, %v2991_v0  ;;  %v2708_v1 = vpop.f32.mrf.mxu3  ;;  %v295_v0 = vld [vmem:[%s5727_s20 + $0x1d8] sm:$0xff] }
 0x3d5   : > { %v2308_v50 = vpop.f32.mrf.mxu2 }
 0x3d6   : > { %v3357_v9 = vadd.f32 %v3265_v30, %v290_v8  ;;  %v2309_v38 = vadd.f32 %v2308_v50, %v7016_v5 }
 0x3d7   : > { %v3276_v62 = vpop.f32.mrf.mxu1 }
 0x3d8   : > { %v3421_v46 = vmul.f32 %v3357_v9, %v983_v13  ;;  %v2703_v11 = vadd.f32 %v2702_v53, %v2309_v38  ;;  %v2998_v45 = vpop.f32.mrf.mxu0  ;;  %v7021_v9 = vld [vmem:[#allocation61_spill] sm:$0xff]  ;;  %v998_v38 = vpop.xlane.xlu2 %997 }
 0x3da   : > { %3485 = vst [vmem:[%s5744_s27 + $0x1b0] sm:$0xff] %v3421_v46  ;;  %v2995_v48 = vadd.f32 %v2994_v21, %v2703_v11 }
 0x3dc   : > { %v3269_v56 = vadd.f32 %v3268_v59, %v2995_v48  ;;  %v2714_v49 = vpop.f32.mrf.mxu3  ;;  %v294_v59 = vld [vmem:[%s5727_s20 + $0x1d0] sm:$0xff]  ;;  %v296_v48 = vld [vmem:[%s5727_s20 + $0x1e0] sm:$0xff] }
 0x3dd   : > { %v2313_v55 = vpop.f32.mrf.mxu2 }
 0x3de   : > { %v3358_v31 = vadd.f32 %v3269_v56, %v291_v14  ;;  %v2314_v41 = vadd.f32 %v2313_v55, %v7017_v17 }
 0x3df   : > { %v3280_v23 = vpop.f32.mrf.mxu1 }
 0x3e0   : > { %v3422_v15 = vmul.f32 %v3358_v31, %v986_v12  ;;  %v2709_v36 = vadd.f32 %v2708_v1, %v2314_v41  ;;  %v3002_v44 = vpop.f32.mrf.mxu0  ;;  %v7022_v31 = vld [vmem:[#allocation65_spill] sm:$0xff]  ;;  %v1001_v41 = vpop.xlane.xlu0 %1000 }
 0x3e2   : > { %3486 = vst [vmem:[%s5744_s27 + $0x1b8] sm:$0xff] %v3422_v15  ;;  %v2999_v47 = vadd.f32 %v2998_v45, %v2709_v36 }
 0x3e4   : > { %v3273_v19 = vadd.f32 %v3272_v27, %v2999_v47  ;;  %v2720_v54 = vpop.f32.mrf.mxu3 }
 0x3e5   : > { %v2318_v28 = vpop.f32.mrf.mxu2 }
 0x3e6   : > { %v3359_v63 = vadd.f32 %v3273_v19, %v292_v51  ;;  %v2319_v18 = vadd.f32 %v2318_v28, %v7018_v25  ;;  %v7023_v28 = vld [vmem:[#allocation69_spill] sm:$0xff]  ;;  %v1004_v25 = vpop.xlane.xlu1 %1003 }
 0x3e7   : > { %v3284_v24 = vpop.f32.mrf.mxu1 }
 0x3e8   : > { %v3423_v22 = vmul.f32 %v3359_v63, %v989_v7  ;;  %v2715_v10 = vadd.f32 %v2714_v49, %v2319_v18  ;;  %v3006_v26 = vpop.f32.mrf.mxu0 }
 0x3ea   : > { %3487 = vst [vmem:[%s5744_s27 + $0x1c0] sm:$0xff] %v3423_v22  ;;  %v3003_v29 = vadd.f32 %v3002_v44, %v2715_v10  ;;  %v297_v44 = vld [vmem:[%s5727_s20 + $0x1e8] sm:$0xff] }
 0x3ec   : > { %v3277_v32 = vadd.f32 %v3276_v62, %v3003_v29  ;;  %v2726_v20 = vpop.f32.mrf.mxu3 }
 0x3ed   : > { %v2323_v34 = vpop.f32.mrf.mxu2 }
 0x3ee   : > { %v3360_v2 = vadd.f32 %v3277_v32, %v293_v39  ;;  %v2324_v40 = vadd.f32 %v2323_v34, %v7019_v57  ;;  %v7024_v34 = vld [vmem:[#allocation74_spill] sm:$0xff]  ;;  %v1007_v57 = vpop.xlane.xlu2 %1006 }
 0x3ef   : > { %v3288_v1 = vpop.f32.mrf.mxu1 }
 0x3f0   : > { %v3424_v35 = vmul.f32 %v3360_v2, %v992_v3  ;;  %v2721_v37 = vadd.f32 %v2720_v54, %v2324_v40  ;;  %v3010_v4 = vpop.f32.mrf.mxu0 }
 0x3f2   : > { %3488 = vst [vmem:[%s5744_s27 + $0x1c8] sm:$0xff] %v3424_v35  ;;  %v3007_v33 = vadd.f32 %v3006_v26, %v2721_v37 }
 0x3f4   : > { %v3281_v61 = vadd.f32 %v3280_v23, %v3007_v33  ;;  %v2732_v16 = vpop.f32.mrf.mxu3  ;;  %v298_v23 = vld [vmem:[%s5727_s20 + $0x1f0] sm:$0xff]  ;;  %v299_v33 = vld [vmem:[%s5727_s20 + $0x1f8] sm:$0xff] }
 0x3f5   : > { %v2328_v53 = vpop.f32.mrf.mxu2 }
 0x3f6   : > { %v3361_v43 = vadd.f32 %v3281_v61, %v294_v59  ;;  %v2329_v6 = vadd.f32 %v2328_v53, %v7020_v42  ;;  %v1010_v61 = vpop.xlane.xlu0 %1009 }
 0x3f7   : > { %v3292_v12 = vpop.f32.mrf.mxu1 }
 0x3f8   : > { %v3425_v52 = vmul.f32 %v3361_v43, %v995_v60  ;;  %v2727_v58 = vadd.f32 %v2726_v20, %v2329_v6  ;;  %v3014_v8 = vpop.f32.mrf.mxu0 }
 0x3fa   : > { %3489 = vst [vmem:[%s5744_s27 + $0x1d0] sm:$0xff] %v3425_v52  ;;  %v3011_v21 = vadd.f32 %v3010_v4, %v2727_v58 }
 0x3fc   : > { %v3285_v30 = vadd.f32 %v3284_v24, %v3011_v21  ;;  %v2738_v45 = vpop.f32.mrf.mxu3 }
 0x3fd   : > { %v2333_v27 = vpop.f32.mrf.mxu2 }
 0x3fe   : > { %v3362_v50 = vadd.f32 %v3285_v30, %v295_v0  ;;  %v2334_v5 = vadd.f32 %v2333_v27, %v7021_v9 }
 0x3ff   : > { %v3296_v10 = vpop.f32.mrf.mxu1 }
 0x400   : > { %v3426_v13 = vmul.f32 %v3362_v50, %v998_v38  ;;  %v2733_v46 = vadd.f32 %v2732_v16, %v2334_v5  ;;  %v3018_v56 = vpop.f32.mrf.mxu0 }
 0x402   : > { %3490 = vst [vmem:[%s5744_s27 + $0x1d8] sm:$0xff] %v3426_v13  ;;  %v3015_v11 = vadd.f32 %v3014_v8, %v2733_v46 }
 0x404   : > { %v3289_v14 = vadd.f32 %v3288_v1, %v3015_v11  ;;  %v2744_v51 = vpop.f32.mrf.mxu3 }
 0x405   : > { %v2338_v49 = vpop.f32.mrf.mxu2 }
 0x406   : > { %v3363_v55 = vadd.f32 %v3289_v14, %v296_v48  ;;  %v2339_v17 = vadd.f32 %v2338_v49, %v7022_v31 }
 0x407   : > { %v3300_v4 = vpop.f32.mrf.mxu1 }
 0x408   : > { %v3427_v62 = vmul.f32 %v3363_v55, %v1001_v41  ;;  %v2739_v15 = vadd.f32 %v2738_v45, %v2339_v17  ;;  %v3022_v18 = vpop.f32.mrf.mxu0 }
 0x40a   : > { %3491 = vst [vmem:[%s5744_s27 + $0x1e0] sm:$0xff] %v3427_v62  ;;  %v3019_v36 = vadd.f32 %v3018_v56, %v2739_v15 }
 0x40c   : > { %v3293_v47 = vadd.f32 %v3292_v12, %v3019_v36  ;;  %v2750_v40 = vpop.f32.mrf.mxu3 }
 0x40d   : > { %v2343_v19 = vpop.f32.mrf.mxu2 }
 0x40e   : > { %v3364_v54 = vadd.f32 %v3293_v47, %v297_v44  ;;  %v2344_v63 = vadd.f32 %v2343_v19, %v7023_v28 }
 0x410   : > { %v3428_v7 = vmul.f32 %v3364_v54, %v1004_v25  ;;  %v2745_v22 = vadd.f32 %v2744_v51, %v2344_v63  ;;  %v3026_v35 = vpop.f32.mrf.mxu0 }
 0x412   : > { %3492 = vst [vmem:[%s5744_s27 + $0x1e8] sm:$0xff] %v3428_v7  ;;  %v3023_v26 = vadd.f32 %v3022_v18, %v2745_v22 }
 0x414   : > { %v3297_v29 = vadd.f32 %v3296_v10, %v3023_v26 }
 0x415   : > { %v2348_v39 = vpop.f32.mrf.mxu2 }
 0x416   : > { %v3365_v32 = vadd.f32 %v3297_v29, %v298_v23  ;;  %v2349_v2 = vadd.f32 %v2348_v39, %v7024_v34 }
 0x418   : > { %v3429_v3 = vmul.f32 %v3365_v32, %v1007_v57  ;;  %v2751_v20 = vadd.f32 %v2750_v40, %v2349_v2 }
 0x41a   : > { %3493 = vst [vmem:[%s5744_s27 + $0x1f0] sm:$0xff] %v3429_v3  ;;  %v3027_v37 = vadd.f32 %v3026_v35, %v2751_v20 }
 0x41c   : > { %v3301_v24 = vadd.f32 %v3300_v4, %v3027_v37 }
 0x41e   : > { %v3366_v59 = vadd.f32 %v3301_v24, %v299_v33 }
 0x420   : > { %v3430_v53 = vmul.f32 %v3366_v59, %v1010_v61 }
 0x422   : > { %3494 = vst [vmem:[%s5744_s27 + $0x1f8] sm:$0xff] %v3430_v53 }
 0x423   : > { %3988 = shalt.err (!%p3985_p8)
}
 0x424   : > { %s4032_s20 = smov 128   ;;  %s4033_s22 = smov 8  }
 0x425   : > { %3876 = dma.vmem_to_hbm [thread:$0]  (%p4097_p5), %s3509_s6, 8192, %s3511_s7, %s3496_s19, %s4032_s20, %s4032_s20, %s4033_s22  }
 0x426 PF: > { %p3888_p9 = scmp.ge.s32.totalorder %s4027_s18, 2  ;;  %s3525_s23 = sand.u32 1, %s4015_s15  }
 0x427   : > { %s3526_s27 = scalar_lea.sflag [#allocation4], %s3525_s23 }
 0x428   : > { %p3883_p10 = pnand %p3888_p9, %p4101_p6 }
 0x42a   : > { %p3884_p11 = pneg %p3883_p10 }
 0x42c   : > { %4010 = dma.done.wait (%p3884_p11), %s3526_s27, 8192  }
 0x42d   : > { %4012 = vsyncadd (%p3884_p11), %s3526_s27, 4294959104  ;;  %p15_p12 = scmp.ge.s32.totalorder %s4084_s21, 4   ;;  %s7025_s15 = smov %s4019_s16 }
 0x42e   : > { %s7026_s16 = smov %s4023_s17  ;;  %s7027_s17 = smov %s4095_s24 }
 0x42f   : > { %s7028_s18 = smov %s4084_s21  ;;  %17 = sbr.rel (!%p15_p12) target bundleno = 4 (0x4), region = 79 }
 0x434   :  { %3532 = vsyncpa [#allocation3], 1 }
 0x435   :  { %3534 = vsyncpa [#allocation3 + $0x1], 1 }
 0x436   :  { %3535 = vsyncpa [#allocation4], 1 }
 0x437   :  { %3537 = vsyncpa [#allocation4 + $0x1], 1 }

</bundles_post_ra>
